<compile_context>
chip_gen: v5e
topology: v5e:2x2
jax: 0.10.0
libtpu: 0.0.40
codegen_flags: <defaults>
</compile_context>

<pallas_src>
import functools
import math

import jax
import jax.numpy as jnp
from jax.experimental import pallas as pl
from jax.experimental.pallas import tpu as pltpu


# ----------------------------------------------------------------------------
# Fused Fire kernel
# ----------------------------------------------------------------------------

def _fire_kernel(x_ref, wsq_ref, bsq_ref, we1_ref, be1_ref, we3_ref, be3_ref,
                 out_ref, spad_ref, *, H, W):
    """One image per grid step.

    x_ref   : (1, H*W, Cin)   bf16   flattened NHWC input
    wsq_ref : (Cin, SQ)       bf16   squeeze 1x1 weights
    bsq_ref : (1, SQ)         f32
    we1_ref : (SQ, E1)        bf16   expand1x1 weights
    be1_ref : (1, E1)         f32
    we3_ref : (9, SQ, E3)     bf16   expand3x3 weights, tap t = di*3 + dj
    be3_ref : (1, E3)         f32
    out_ref : (1, H*W, E1+E3) f32    pre-concatenated expand output
    spad_ref: (H+2, W+2, SQ)  bf16   VMEM scratch: squeeze act + zero halo
    """
    HW = H * W
    SQ = wsq_ref.shape[1]

    # --- squeeze 1x1 conv == matmul on the MXU (bf16 in, f32 accumulate) ---
    x = x_ref[0]                                                   # (HW, Cin)
    s = jnp.dot(x, wsq_ref[...], preferred_element_type=jnp.float32)
    s = jnp.maximum(s + bsq_ref[...], 0.0)                         # (HW, SQ) f32
    s_bf = s.astype(jnp.bfloat16)

    # --- expand1x1: straight from the in-register squeeze activation ---
    e1 = jnp.dot(s_bf, we1_ref[...], preferred_element_type=jnp.float32)
    e1 = jnp.maximum(e1 + be1_ref[...], 0.0)                       # (HW, E1)

    # --- stage squeeze activation with a zero 1-px halo in VMEM ---
    # (zero every step: the scratch is per-core and uninitialized, and with a
    #  "parallel" grid we cannot rely on program_id==0 running on every core)
    spad_ref[...] = jnp.zeros_like(spad_ref)
    spad_ref[1:H + 1, 1:W + 1, :] = s_bf.reshape(H, W, SQ)

    # --- expand3x3: 9 shifted-tap matmuls accumulated from VMEM (no im2col) ---
    acc3 = None
    for t in range(9):
        di, dj = t // 3, t % 3
        tap = spad_ref[di:di + H, dj:dj + W, :].reshape(HW, SQ)
        p = jnp.dot(tap, we3_ref[t], preferred_element_type=jnp.float32)
        acc3 = p if acc3 is None else acc3 + p
    e3 = jnp.maximum(acc3 + be3_ref[...], 0.0)                     # (HW, E3)

    # --- single lane-dense store of the pre-concatenated result ---
    out_ref[0] = jnp.concatenate([e1, e3], axis=-1).astype(out_ref.dtype)


# ----------------------------------------------------------------------------
# Parameter construction / one-time weight relayout
# ----------------------------------------------------------------------------

def init_fire_params(key, inplanes, squeeze_planes, e1_planes, e3_planes):
    """Deterministic PyTorch-layout Conv2d parameters (Cout, Cin, kh, kw)."""
    ks = jax.random.split(key, 6)

    def conv_init(kw_key, kb_key, cout, cin, k):
        fan_in = cin * k * k
        w_bound = math.sqrt(6.0 / fan_in)
        b_bound = math.sqrt(1.0 / fan_in)
        w = jax.random.uniform(kw_key, (cout, cin, k, k), jnp.float32,
                               -w_bound, w_bound)
        b = jax.random.uniform(kb_key, (cout,), jnp.float32, -b_bound, b_bound)
        return w, b

    sw, sb = conv_init(ks[0], ks[1], squeeze_planes, inplanes, 1)
    e1w, e1b = conv_init(ks[2], ks[3], e1_planes, squeeze_planes, 1)
    e3w, e3b = conv_init(ks[4], ks[5], e3_planes, squeeze_planes, 3)
    return dict(squeeze_w=sw, squeeze_b=sb,
                e1_w=e1w, e1_b=e1b, e3_w=e3w, e3_b=e3b)


def prepare_fire_params(raw):
    """One-time relayout + bf16 cast of the weights (kept out of the forward)."""
    SQ, Cin = raw["squeeze_w"].shape[:2]
    E1 = raw["e1_w"].shape[0]
    E3 = raw["e3_w"].shape[0]
    w_sq = raw["squeeze_w"].reshape(SQ, Cin).T.astype(jnp.bfloat16)      # (Cin, SQ)
    w_e1 = raw["e1_w"].reshape(E1, SQ).T.astype(jnp.bfloat16)            # (SQ, E1)
    # (E3, SQ, 3, 3) -> (3, 3, SQ, E3) -> (9, SQ, E3), tap t = di*3 + dj
    w_e3 = jnp.transpose(raw["e3_w"], (2, 3, 1, 0)).reshape(9, SQ, E3)
    w_e3 = w_e3.astype(jnp.bfloat16)
    return dict(
        w_sq=w_sq, b_sq=raw["squeeze_b"].reshape(1, SQ).astype(jnp.float32),
        w_e1=w_e1, b_e1=raw["e1_b"].reshape(1, E1).astype(jnp.float32),
        w_e3=w_e3, b_e3=raw["e3_b"].reshape(1, E3).astype(jnp.float32),
    )


# ----------------------------------------------------------------------------
# Forward pass (PyTorch-style NCHW in / NCHW out)
# ----------------------------------------------------------------------------

def fire_forward(x_nchw, prep):
    B, Cin, H, W = x_nchw.shape
    SQ = prep["w_sq"].shape[1]
    E1 = prep["w_e1"].shape[1]
    E3 = prep["w_e3"].shape[2]
    Cout = E1 + E3
    HW = H * W

    # NCHW -> flattened NHWC, bf16 for the MXU (halves HBM read traffic).
    x = jnp.transpose(x_nchw, (0, 2, 3, 1)).reshape(B, HW, Cin)
    x = x.astype(jnp.bfloat16)

    kernel = functools.partial(_fire_kernel, H=H, W=W)

    out = pl.pallas_call(
        kernel,
        out_shape=jax.ShapeDtypeStruct((B, HW, Cout), jnp.float32),
        grid=(B,),
        in_specs=[
            pl.BlockSpec((1, HW, Cin), lambda b: (b, 0, 0)),
            pl.BlockSpec((Cin, SQ), lambda b: (0, 0)),
            pl.BlockSpec((1, SQ), lambda b: (0, 0)),
            pl.BlockSpec((SQ, E1), lambda b: (0, 0)),
            pl.BlockSpec((1, E1), lambda b: (0, 0)),
            pl.BlockSpec((9, SQ, E3), lambda b: (0, 0, 0)),
            pl.BlockSpec((1, E3), lambda b: (0, 0)),
        ],
        out_specs=pl.BlockSpec((1, HW, Cout), lambda b: (b, 0, 0)),
        scratch_shapes=[pltpu.VMEM((H + 2, W + 2, SQ), jnp.bfloat16)],
        compiler_params=pltpu.CompilerParams(
            dimension_semantics=("parallel",)),
    )(x, prep["w_sq"], prep["b_sq"], prep["w_e1"], prep["b_e1"],
      prep["w_e3"], prep["b_e3"])

    # TODO(synk): Fire.clamp() branch is only taken when clamp_ is not None;
    # the default (clamp=None) never calls it, so it is omitted here.

    out = out.reshape(B, H, W, Cout)
    return jnp.transpose(out, (0, 3, 1, 2))            # back to NCHW, f32


# ----------------------------------------------------------------------------
# Plain-JAX reference (same bf16 operand / f32 accumulation recipe)
# ----------------------------------------------------------------------------

def fire_reference(x_nchw, raw):
    x = jnp.transpose(x_nchw, (0, 2, 3, 1)).astype(jnp.bfloat16)     # NHWC
    dn = ("NHWC", "HWIO", "NHWC")
    wsq = jnp.transpose(raw["squeeze_w"], (2, 3, 1, 0)).astype(jnp.bfloat16)
    we1 = jnp.transpose(raw["e1_w"], (2, 3, 1, 0)).astype(jnp.bfloat16)
    we3 = jnp.transpose(raw["e3_w"], (2, 3, 1, 0)).astype(jnp.bfloat16)

    s = jax.lax.conv_general_dilated(x, wsq, (1, 1), "VALID",
                                     dimension_numbers=dn,
                                     preferred_element_type=jnp.float32)
    s = jnp.maximum(s + raw["squeeze_b"], 0.0).astype(jnp.bfloat16)

    e1 = jax.lax.conv_general_dilated(s, we1, (1, 1), "VALID",
                                      dimension_numbers=dn,
                                      preferred_element_type=jnp.float32)
    e1 = jnp.maximum(e1 + raw["e1_b"], 0.0)

    e3 = jax.lax.conv_general_dilated(s, we3, (1, 1), "SAME",
                                      dimension_numbers=dn,
                                      preferred_element_type=jnp.float32)
    e3 = jnp.maximum(e3 + raw["e3_b"], 0.0)

    out = jnp.concatenate([e1, e3], axis=-1)                          # NHWC
    return jnp.transpose(out, (0, 3, 1, 2))                           # NCHW


# ----------------------------------------------------------------------------
# Demo / self-check
# ----------------------------------------------------------------------------

if __name__ == "__main__":
    key = jax.random.PRNGKey(0)
    pkey, xkey = jax.random.split(key)

    # Fire(inplanes=96, squeeze=16, expand1x1=64, expand3x3=64)
    # (SqueezeNet fire2 config) at a small 16x16 spatial size, batch 2.
    B, Cin, H, W = 2, 96, 16, 16
    SQ, E1, E3 = 16, 64, 64

    raw = init_fire_params(pkey, Cin, SQ, E1, E3)
    prep = prepare_fire_params(raw)

    x = jax.random.normal(xkey, (B, Cin, H, W), jnp.float32)

    fwd = jax.jit(lambda inp: fire_forward(inp, prep))
    out = jax.block_until_ready(fwd(x))

    ref = jax.block_until_ready(fire_reference(x, raw))

    assert out.shape == (B, E1 + E3, H, W), out.shape
    assert bool(jnp.all(jnp.isfinite(out)))
    max_err = float(jnp.max(jnp.abs(out - ref)))
    assert max_err < 2e-2, f"max abs err vs reference: {max_err}"
    print("KERNEL_OK")
</pallas_src>

<mosaic_0001>
module attributes {stable_mosaic.version = 11 : i64} {
  func.func @_fire_kernel(%arg0: i32, %arg1: memref<1x256x96xbf16, #tpu.memory_space<vmem>>, %arg2: memref<96x16xbf16, #tpu.memory_space<vmem>>, %arg3: memref<1x16xf32, #tpu.memory_space<vmem>>, %arg4: memref<16x64xbf16, #tpu.memory_space<vmem>>, %arg5: memref<1x64xf32, #tpu.memory_space<vmem>>, %arg6: memref<9x16x64xbf16, #tpu.memory_space<vmem>>, %arg7: memref<1x64xf32, #tpu.memory_space<vmem>>, %arg8: memref<1x256x128xf32, #tpu.memory_space<vmem>>, %arg9: memref<18x18x16xbf16, #tpu.memory_space<vmem>>) attributes {dimension_semantics = [#tpu.dimension_semantics<parallel>], iteration_bounds = array<i64: 2>, scalar_prefetch = 0 : i64, scratch_operands = 1 : i64, tpu.core_type = #tpu.core_type<tc>, window_params = [{transform_indices = @transform_0, window_bounds = array<i64: 1, 256, 96>}, {pipeline_mode = #tpu.pipeline_mode<synchronous>, transform_indices = @transform_1, window_bounds = array<i64: 96, 16>}, {pipeline_mode = #tpu.pipeline_mode<synchronous>, transform_indices = @transform_2, window_bounds = array<i64: 1, 16>}, {pipeline_mode = #tpu.pipeline_mode<synchronous>, transform_indices = @transform_3, window_bounds = array<i64: 16, 64>}, {pipeline_mode = #tpu.pipeline_mode<synchronous>, transform_indices = @transform_4, window_bounds = array<i64: 1, 64>}, {pipeline_mode = #tpu.pipeline_mode<synchronous>, transform_indices = @transform_5, window_bounds = array<i64: 9, 16, 64>}, {pipeline_mode = #tpu.pipeline_mode<synchronous>, transform_indices = @transform_6, window_bounds = array<i64: 1, 64>}, {transform_indices = @transform_7, window_bounds = array<i64: 1, 256, 128>}]} {
    %c0 = arith.constant 0 : index
    %c0_0 = arith.constant 0 : index
    %c0_1 = arith.constant 0 : index
    %0 = vector.load %arg1[%c0, %c0_0, %c0_1] : memref<1x256x96xbf16, #tpu.memory_space<vmem>>, vector<1x256x96xbf16>
    %1 = vector.shape_cast %0 : vector<1x256x96xbf16> to vector<256x96xbf16>
    %c0_2 = arith.constant 0 : index
    %c0_3 = arith.constant 0 : index
    %2 = vector.load %arg2[%c0_2, %c0_3] : memref<96x16xbf16, #tpu.memory_space<vmem>>, vector<96x16xbf16>
    %cst = arith.constant dense<0.000000e+00> : vector<256x16xf32>
    %3 = tpu.matmul %1, %2, %cst {dimension_numbers = #tpu.dot_dimension_numbers<[1], [0], [0], [1], [0, 0, 1, 1], [], []>} : vector<256x96xbf16>, vector<96x16xbf16>, vector<256x16xf32> -> vector<256x16xf32>
    %c0_4 = arith.constant 0 : index
    %c0_5 = arith.constant 0 : index
    %4 = vector.load %arg3[%c0_4, %c0_5] : memref<1x16xf32, #tpu.memory_space<vmem>>, vector<1x16xf32>
    %5 = vector.broadcast %4 : vector<1x16xf32> to vector<256x16xf32>
    %6 = arith.addf %3, %5 : vector<256x16xf32>
    %cst_6 = arith.constant 0.000000e+00 : f32
    %7 = vector.broadcast %cst_6 : f32 to vector<256x16xf32>
    %8 = arith.maximumf %6, %7 : vector<256x16xf32>
    %9 = arith.truncf %8 : vector<256x16xf32> to vector<256x16xbf16>
    %c0_7 = arith.constant 0 : index
    %c0_8 = arith.constant 0 : index
    %10 = vector.load %arg4[%c0_7, %c0_8] : memref<16x64xbf16, #tpu.memory_space<vmem>>, vector<16x64xbf16>
    %cst_9 = arith.constant dense<0.000000e+00> : vector<256x64xf32>
    %11 = tpu.matmul %9, %10, %cst_9 {dimension_numbers = #tpu.dot_dimension_numbers<[1], [0], [0], [1], [0, 0, 1, 1], [], []>} : vector<256x16xbf16>, vector<16x64xbf16>, vector<256x64xf32> -> vector<256x64xf32>
    %c0_10 = arith.constant 0 : index
    %c0_11 = arith.constant 0 : index
    %12 = vector.load %arg5[%c0_10, %c0_11] : memref<1x64xf32, #tpu.memory_space<vmem>>, vector<1x64xf32>
    %13 = vector.broadcast %12 : vector<1x64xf32> to vector<256x64xf32>
    %14 = arith.addf %11, %13 : vector<256x64xf32>
    %cst_12 = arith.constant 0.000000e+00 : f32
    %15 = vector.broadcast %cst_12 : f32 to vector<256x64xf32>
    %16 = arith.maximumf %14, %15 : vector<256x64xf32>
    %cst_13 = arith.constant 0.000000e+00 : bf16
    %17 = vector.broadcast %cst_13 : bf16 to vector<18x18x16xbf16>
    %c0_14 = arith.constant 0 : index
    %c0_15 = arith.constant 0 : index
    %c0_16 = arith.constant 0 : index
    %18 = vector.load %arg9[%c0_14, %c0_15, %c0_16] : memref<18x18x16xbf16, #tpu.memory_space<vmem>>, vector<18x18x16xbf16>
    tpu.vector_store %arg9[%c0_14, %c0_15, %c0_16], %17 {strides = array<i32>} : memref<18x18x16xbf16, #tpu.memory_space<vmem>>, vector<18x18x16xbf16>,
    %19 = vector.shape_cast %9 : vector<256x16xbf16> to vector<16x16x16xbf16>
    %c1 = arith.constant 1 : index
    %c1_17 = arith.constant 1 : index
    %c0_18 = arith.constant 0 : index
    %20 = vector.load %arg9[%c1, %c1_17, %c0_18] : memref<18x18x16xbf16, #tpu.memory_space<vmem>>, vector<16x16x16xbf16>
    tpu.vector_store %arg9[%c1, %c1_17, %c0_18], %19 {strides = array<i32>} : memref<18x18x16xbf16, #tpu.memory_space<vmem>>, vector<16x16x16xbf16>,
    %c0_19 = arith.constant 0 : index
    %c0_20 = arith.constant 0 : index
    %c0_21 = arith.constant 0 : index
    %21 = vector.load %arg9[%c0_19, %c0_20, %c0_21] : memref<18x18x16xbf16, #tpu.memory_space<vmem>>, vector<16x16x16xbf16>
    %22 = vector.shape_cast %21 : vector<16x16x16xbf16> to vector<256x16xbf16>
    %c0_22 = arith.constant 0 : index
    %c0_23 = arith.constant 0 : index
    %c0_24 = arith.constant 0 : index
    %23 = vector.load %arg6[%c0_22, %c0_23, %c0_24] : memref<9x16x64xbf16, #tpu.memory_space<vmem>>, vector<1x16x64xbf16>
    %24 = vector.shape_cast %23 : vector<1x16x64xbf16> to vector<16x64xbf16>
    %cst_25 = arith.constant dense<0.000000e+00> : vector<256x64xf32>
    %25 = tpu.matmul %22, %24, %cst_25 {dimension_numbers = #tpu.dot_dimension_numbers<[1], [0], [0], [1], [0, 0, 1, 1], [], []>} : vector<256x16xbf16>, vector<16x64xbf16>, vector<256x64xf32> -> vector<256x64xf32>
    %c0_26 = arith.constant 0 : index
    %c1_27 = arith.constant 1 : index
    %c0_28 = arith.constant 0 : index
    %26 = vector.load %arg9[%c0_26, %c1_27, %c0_28] : memref<18x18x16xbf16, #tpu.memory_space<vmem>>, vector<16x16x16xbf16>
    %27 = vector.shape_cast %26 : vector<16x16x16xbf16> to vector<256x16xbf16>
    %c1_29 = arith.constant 1 : index
    %c0_30 = arith.constant 0 : index
    %c0_31 = arith.constant 0 : index
    %28 = vector.load %arg6[%c1_29, %c0_30, %c0_31] : memref<9x16x64xbf16, #tpu.memory_space<vmem>>, vector<1x16x64xbf16>
    %29 = vector.shape_cast %28 : vector<1x16x64xbf16> to vector<16x64xbf16>
    %cst_32 = arith.constant dense<0.000000e+00> : vector<256x64xf32>
    %30 = tpu.matmul %27, %29, %cst_32 {dimension_numbers = #tpu.dot_dimension_numbers<[1], [0], [0], [1], [0, 0, 1, 1], [], []>} : vector<256x16xbf16>, vector<16x64xbf16>, vector<256x64xf32> -> vector<256x64xf32>
    %31 = arith.addf %25, %30 : vector<256x64xf32>
    %c0_33 = arith.constant 0 : index
    %c2 = arith.constant 2 : index
    %c0_34 = arith.constant 0 : index
    %32 = vector.load %arg9[%c0_33, %c2, %c0_34] : memref<18x18x16xbf16, #tpu.memory_space<vmem>>, vector<16x16x16xbf16>
    %33 = vector.shape_cast %32 : vector<16x16x16xbf16> to vector<256x16xbf16>
    %c2_35 = arith.constant 2 : index
    %c0_36 = arith.constant 0 : index
    %c0_37 = arith.constant 0 : index
    %34 = vector.load %arg6[%c2_35, %c0_36, %c0_37] : memref<9x16x64xbf16, #tpu.memory_space<vmem>>, vector<1x16x64xbf16>
    %35 = vector.shape_cast %34 : vector<1x16x64xbf16> to vector<16x64xbf16>
    %cst_38 = arith.constant dense<0.000000e+00> : vector<256x64xf32>
    %36 = tpu.matmul %33, %35, %cst_38 {dimension_numbers = #tpu.dot_dimension_numbers<[1], [0], [0], [1], [0, 0, 1, 1], [], []>} : vector<256x16xbf16>, vector<16x64xbf16>, vector<256x64xf32> -> vector<256x64xf32>
    %37 = arith.addf %31, %36 : vector<256x64xf32>
    %c1_39 = arith.constant 1 : index
    %c0_40 = arith.constant 0 : index
    %c0_41 = arith.constant 0 : index
    %38 = vector.load %arg9[%c1_39, %c0_40, %c0_41] : memref<18x18x16xbf16, #tpu.memory_space<vmem>>, vector<16x16x16xbf16>
    %39 = vector.shape_cast %38 : vector<16x16x16xbf16> to vector<256x16xbf16>
    %c3 = arith.constant 3 : index
    %c0_42 = arith.constant 0 : index
    %c0_43 = arith.constant 0 : index
    %40 = vector.load %arg6[%c3, %c0_42, %c0_43] : memref<9x16x64xbf16, #tpu.memory_space<vmem>>, vector<1x16x64xbf16>
    %41 = vector.shape_cast %40 : vector<1x16x64xbf16> to vector<16x64xbf16>
    %cst_44 = arith.constant dense<0.000000e+00> : vector<256x64xf32>
    %42 = tpu.matmul %39, %41, %cst_44 {dimension_numbers = #tpu.dot_dimension_numbers<[1], [0], [0], [1], [0, 0, 1, 1], [], []>} : vector<256x16xbf16>, vector<16x64xbf16>, vector<256x64xf32> -> vector<256x64xf32>
    %43 = arith.addf %37, %42 : vector<256x64xf32>
    %c1_45 = arith.constant 1 : index
    %c1_46 = arith.constant 1 : index
    %c0_47 = arith.constant 0 : index
    %44 = vector.load %arg9[%c1_45, %c1_46, %c0_47] : memref<18x18x16xbf16, #tpu.memory_space<vmem>>, vector<16x16x16xbf16>
    %45 = vector.shape_cast %44 : vector<16x16x16xbf16> to vector<256x16xbf16>
    %c4 = arith.constant 4 : index
    %c0_48 = arith.constant 0 : index
    %c0_49 = arith.constant 0 : index
    %46 = vector.load %arg6[%c4, %c0_48, %c0_49] : memref<9x16x64xbf16, #tpu.memory_space<vmem>>, vector<1x16x64xbf16>
    %47 = vector.shape_cast %46 : vector<1x16x64xbf16> to vector<16x64xbf16>
    %cst_50 = arith.constant dense<0.000000e+00> : vector<256x64xf32>
    %48 = tpu.matmul %45, %47, %cst_50 {dimension_numbers = #tpu.dot_dimension_numbers<[1], [0], [0], [1], [0, 0, 1, 1], [], []>} : vector<256x16xbf16>, vector<16x64xbf16>, vector<256x64xf32> -> vector<256x64xf32>
    %49 = arith.addf %43, %48 : vector<256x64xf32>
    %c1_51 = arith.constant 1 : index
    %c2_52 = arith.constant 2 : index
    %c0_53 = arith.constant 0 : index
    %50 = vector.load %arg9[%c1_51, %c2_52, %c0_53] : memref<18x18x16xbf16, #tpu.memory_space<vmem>>, vector<16x16x16xbf16>
    %51 = vector.shape_cast %50 : vector<16x16x16xbf16> to vector<256x16xbf16>
    %c5 = arith.constant 5 : index
    %c0_54 = arith.constant 0 : index
    %c0_55 = arith.constant 0 : index
    %52 = vector.load %arg6[%c5, %c0_54, %c0_55] : memref<9x16x64xbf16, #tpu.memory_space<vmem>>, vector<1x16x64xbf16>
    %53 = vector.shape_cast %52 : vector<1x16x64xbf16> to vector<16x64xbf16>
    %cst_56 = arith.constant dense<0.000000e+00> : vector<256x64xf32>
    %54 = tpu.matmul %51, %53, %cst_56 {dimension_numbers = #tpu.dot_dimension_numbers<[1], [0], [0], [1], [0, 0, 1, 1], [], []>} : vector<256x16xbf16>, vector<16x64xbf16>, vector<256x64xf32> -> vector<256x64xf32>
    %55 = arith.addf %49, %54 : vector<256x64xf32>
    %c2_57 = arith.constant 2 : index
    %c0_58 = arith.constant 0 : index
    %c0_59 = arith.constant 0 : index
    %56 = vector.load %arg9[%c2_57, %c0_58, %c0_59] : memref<18x18x16xbf16, #tpu.memory_space<vmem>>, vector<16x16x16xbf16>
    %57 = vector.shape_cast %56 : vector<16x16x16xbf16> to vector<256x16xbf16>
    %c6 = arith.constant 6 : index
    %c0_60 = arith.constant 0 : index
    %c0_61 = arith.constant 0 : index
    %58 = vector.load %arg6[%c6, %c0_60, %c0_61] : memref<9x16x64xbf16, #tpu.memory_space<vmem>>, vector<1x16x64xbf16>
    %59 = vector.shape_cast %58 : vector<1x16x64xbf16> to vector<16x64xbf16>
    %cst_62 = arith.constant dense<0.000000e+00> : vector<256x64xf32>
    %60 = tpu.matmul %57, %59, %cst_62 {dimension_numbers = #tpu.dot_dimension_numbers<[1], [0], [0], [1], [0, 0, 1, 1], [], []>} : vector<256x16xbf16>, vector<16x64xbf16>, vector<256x64xf32> -> vector<256x64xf32>
    %61 = arith.addf %55, %60 : vector<256x64xf32>
    %c2_63 = arith.constant 2 : index
    %c1_64 = arith.constant 1 : index
    %c0_65 = arith.constant 0 : index
    %62 = vector.load %arg9[%c2_63, %c1_64, %c0_65] : memref<18x18x16xbf16, #tpu.memory_space<vmem>>, vector<16x16x16xbf16>
    %63 = vector.shape_cast %62 : vector<16x16x16xbf16> to vector<256x16xbf16>
    %c7 = arith.constant 7 : index
    %c0_66 = arith.constant 0 : index
    %c0_67 = arith.constant 0 : index
    %64 = vector.load %arg6[%c7, %c0_66, %c0_67] : memref<9x16x64xbf16, #tpu.memory_space<vmem>>, vector<1x16x64xbf16>
    %65 = vector.shape_cast %64 : vector<1x16x64xbf16> to vector<16x64xbf16>
    %cst_68 = arith.constant dense<0.000000e+00> : vector<256x64xf32>
    %66 = tpu.matmul %63, %65, %cst_68 {dimension_numbers = #tpu.dot_dimension_numbers<[1], [0], [0], [1], [0, 0, 1, 1], [], []>} : vector<256x16xbf16>, vector<16x64xbf16>, vector<256x64xf32> -> vector<256x64xf32>
    %67 = arith.addf %61, %66 : vector<256x64xf32>
    %c2_69 = arith.constant 2 : index
    %c2_70 = arith.constant 2 : index
    %c0_71 = arith.constant 0 : index
    %68 = vector.load %arg9[%c2_69, %c2_70, %c0_71] : memref<18x18x16xbf16, #tpu.memory_space<vmem>>, vector<16x16x16xbf16>
    %69 = vector.shape_cast %68 : vector<16x16x16xbf16> to vector<256x16xbf16>
    %c8 = arith.constant 8 : index
    %c0_72 = arith.constant 0 : index
    %c0_73 = arith.constant 0 : index
    %70 = vector.load %arg6[%c8, %c0_72, %c0_73] : memref<9x16x64xbf16, #tpu.memory_space<vmem>>, vector<1x16x64xbf16>
    %71 = vector.shape_cast %70 : vector<1x16x64xbf16> to vector<16x64xbf16>
    %cst_74 = arith.constant dense<0.000000e+00> : vector<256x64xf32>
    %72 = tpu.matmul %69, %71, %cst_74 {dimension_numbers = #tpu.dot_dimension_numbers<[1], [0], [0], [1], [0, 0, 1, 1], [], []>} : vector<256x16xbf16>, vector<16x64xbf16>, vector<256x64xf32> -> vector<256x64xf32>
    %73 = arith.addf %67, %72 : vector<256x64xf32>
    %c0_75 = arith.constant 0 : index
    %c0_76 = arith.constant 0 : index
    %74 = vector.load %arg7[%c0_75, %c0_76] : memref<1x64xf32, #tpu.memory_space<vmem>>, vector<1x64xf32>
    %75 = vector.broadcast %74 : vector<1x64xf32> to vector<256x64xf32>
    %76 = arith.addf %73, %75 : vector<256x64xf32>
    %cst_77 = arith.constant 0.000000e+00 : f32
    %77 = vector.broadcast %cst_77 : f32 to vector<256x64xf32>
    %78 = arith.maximumf %76, %77 : vector<256x64xf32>
    %79 = tpu.concatenate %16, %78 in 1 : vector<256x64xf32>, vector<256x64xf32> -> vector<256x128xf32>
    %c0_78 = arith.constant 0 : index
    %c0_79 = arith.constant 0 : index
    %c0_80 = arith.constant 0 : index
    %80 = vector.load %arg8[%c0_78, %c0_79, %c0_80] : memref<1x256x128xf32, #tpu.memory_space<vmem>>, vector<1x256x128xf32>
    %81 = vector.shape_cast %80 : vector<1x256x128xf32> to vector<256x128xf32>
    %82 = vector.shape_cast %79 : vector<256x128xf32> to vector<1x256x128xf32>
    tpu.vector_store %arg8[%c0_78, %c0_79, %c0_80], %82 {strides = array<i32>} : memref<1x256x128xf32, #tpu.memory_space<vmem>>, vector<1x256x128xf32>,
    return
  }
  func.func @transform_0(%arg0: i32) -> (i32, i32, i32) {
    %c0_i32 = arith.constant 0 : i32
    %c0_i32_0 = arith.constant 0 : i32
    %c0_i32_1 = arith.constant 0 : i32
    return %arg0, %c0_i32, %c0_i32_0 : i32, i32, i32
  }
  func.func @transform_1(%arg0: i32) -> (i32, i32) {
    %c0_i32 = arith.constant 0 : i32
    %c0_i32_0 = arith.constant 0 : i32
    %c0_i32_1 = arith.constant 0 : i32
    return %c0_i32, %c0_i32_0 : i32, i32
  }
  func.func @transform_2(%arg0: i32) -> (i32, i32) {
    %c0_i32 = arith.constant 0 : i32
    %c0_i32_0 = arith.constant 0 : i32
    %c0_i32_1 = arith.constant 0 : i32
    return %c0_i32, %c0_i32_0 : i32, i32
  }
  func.func @transform_3(%arg0: i32) -> (i32, i32) {
    %c0_i32 = arith.constant 0 : i32
    %c0_i32_0 = arith.constant 0 : i32
    %c0_i32_1 = arith.constant 0 : i32
    return %c0_i32, %c0_i32_0 : i32, i32
  }
  func.func @transform_4(%arg0: i32) -> (i32, i32) {
    %c0_i32 = arith.constant 0 : i32
    %c0_i32_0 = arith.constant 0 : i32
    %c0_i32_1 = arith.constant 0 : i32
    return %c0_i32, %c0_i32_0 : i32, i32
  }
  func.func @transform_5(%arg0: i32) -> (i32, i32, i32) {
    %c0_i32 = arith.constant 0 : i32
    %c0_i32_0 = arith.constant 0 : i32
    %c0_i32_1 = arith.constant 0 : i32
    %c0_i32_2 = arith.constant 0 : i32
    return %c0_i32, %c0_i32_0, %c0_i32_1 : i32, i32, i32
  }
  func.func @transform_6(%arg0: i32) -> (i32, i32) {
    %c0_i32 = arith.constant 0 : i32
    %c0_i32_0 = arith.constant 0 : i32
    %c0_i32_1 = arith.constant 0 : i32
    return %c0_i32, %c0_i32_0 : i32, i32
  }
  func.func @transform_7(%arg0: i32) -> (i32, i32, i32) {
    %c0_i32 = arith.constant 0 : i32
    %c0_i32_0 = arith.constant 0 : i32
    %c0_i32_1 = arith.constant 0 : i32
    return %arg0, %c0_i32, %c0_i32_0 : i32, i32, i32
  }
}

</mosaic_0001>

<bundles_post_ra>
// kernel: _lambda_.1
= control target key start
LH: loop header
LB: loop body
LE: loop exit
PB: predicated region body
PF: predicated region fallthrough
CT: control target
= control target key end

     0   :  { %12 = vsyncpa [#allocation4], 0  ;;  %s8293_s0 = inlined_call_operand.vmem [shape: bf16[2,256,96], index: 0, kind: input, shape index: {}]   ;;  %s8294_s1 = inlined_call_operand.vmem [shape: bf16[96,16], index: 1, kind: input, shape index: {}]   ;;  %s8295_s2 = inlined_call_operand.vmem [shape: f32[1,16], index: 2, kind: input, shape index: {}]   ;;  %s8296_s3 = inlined_call_operand.vmem [shape: bf16[16,64], index: 3, kind: input, shape index: {}]   ;;  %s8297_s4 = inlined_call_operand.vmem [shape: f32[1,64], index: 4, kind: input, shape index: {}]   ;;  %s8298_s5 = inlined_call_operand.vmem [shape: bf16[9,16,64], index: 5, kind: input, shape index: {}]   ;;  %s8299_s6 = inlined_call_operand.vmem [shape: f32[1,64], index: 6, kind: input, shape index: {}]   ;;  %s8300_s7 = inlined_call_operand.hbm [shape: f32[2,256,128], index: 7, kind: output, shape index: {}]  }
   0x1   :  { %14 = vsyncpa [#allocation4 + $0x1], 0  ;;  %s6523_s24 = smov 0   ;;  %s6525_s25 = smov 0  }
   0x2   :  { %s6527_s26 = smov 0   ;;  %s6529_s27 = smov 0  }
   0x3 LB: > { %s6544_s28 = sadd.s32 4294967295, %s6477_s27   ;;  %s5686_s29 = sadd.s32 4294967294, %s6477_s27   ;;  %s6477_s27 = sphi %s6529_s27, %s8400_s27   ;;  %s6473_s26 = sphi %s6527_s26, %s8399_s26   ;;  %s6469_s25 = sphi %s6525_s25, %s8398_s25   ;;  %s6465_s24 = sphi %s6523_s24, %s8397_s24  }
   0x4   : > { %s6548_s30 = sadd.s32 1, %s6477_s27   ;;  %s179_s8 = sadd.s32 1, %s6473_s26 }
   0x5   : > { %s176_s9 = ssub.s32 %s6477_s27, %s6548_s30  ;;  %p189_p0 = scmp.ne.s32.totalorder %s6473_s26, %s6469_s25 }
   0x6   : > { %p177_p1 = scmp.eq.s32.totalorder %s176_s9, 0  ;;  %p190_p2 = scmp.eq.s32.totalorder %s6544_s28, 1 }
   0x7   : > { %p195_p3 = scmp.ne.s32.totalorder %s6469_s25, %s6465_s24  ;;  %p196_p4 = scmp.eq.s32.totalorder %s5686_s29, 1 }
   0x8   : > { %s6559_s10 = scalar_select %p177_p1, %s6473_s26, %s179_s8  }
   0x9   : > { %p6561_p5 = por %p190_p2, %p189_p0  ;;  %p6565_p6 = por %p196_p4, %p195_p3 }
   0xa   : > { %p5689_p7 = scmp.ge.s32.totalorder %s6477_s27, 1  ;;  %p240_p8 = scmp.lt.s32.totalorder %s6477_s27, 3 }
   0xc   : > { %p241_p9 = pnand %p5689_p7, %p240_p8 }
   0xe   : > { %244 = sbr.rel (%p241_p9) target bundleno = 1216 (0x4c0), region = 48 }
  0x13   : > { %v6280_v0 = vld [vmem:[%s8294_s1 + $0x28] sm:$0xff]  ;;  %v6279_v1 = vld [vmem:[%s8294_s1 + $0x20] sm:$0xff]  ;;  %v6278_v2 = vld [vmem:[%s8294_s1 + $0x18] sm:$0xff]  ;;  %p272_p10 = scmp.lt.s32.totalorder %s6544_s28, 1  ;;  %vm442_vm0 = vcmask 785408   ;;  %vm906_vm1 = vcmask 125952  }
  0x14   : > { %493 = vmatpush.bf16.msra.mxu0 %v6280_v0  ;;  %v6277_v3 = vld [vmem:[%s8294_s1 + $0x10] sm:$0xff]  ;;  %v6276_v4 = vld [vmem:[%s8294_s1 + $0x8] sm:$0xff]  ;;  %v6275_v5 = vld [vmem:[%s8294_s1] sm:$0xff]  ;;  %v6479_v13 = vmov 0   ;;  %vm909_vm2 = vcmask 122880   ;;  %vm2305_vm9 = vcmask 1042432  }
  0x15   : > { %s273_s21 = scalar_select %p272_p10, %s6544_s28, 1  ;;  %911 = vst.msk [vmem:[#allocation2 + $0xc] sm:$0xf] %vm906_vm1, %v6479_v13  ;;  %v6663_v15 = vld [vmem:[%s8295_s2] ss:$0 sm:$0xff]  ;;  %vm2306_vm10 = vcmask 1046532  }
  0x16   : > { %907 = vst.msk [vmem:[#allocation2] sm:$0xf] %vm906_vm1, %v6479_v13  ;;  %vm1287_vm3 = vsmask.f32 7938  ;;  %vm962_vm5 = vsmask.f32 256  ;;  %vm6812_vm14 = vmor %vm2305_vm9, %vm2306_vm10 }
  0x17   : > { %s6258_s29 = sshll.u32 %s273_s21, 7  ;;  %908 = vst.msk [vmem:[#allocation2 + $0x4] sm:$0xf] %vm906_vm1, %v6479_v13  ;;  %vm6696_vm4 = vmand %vm906_vm1, %vm1287_vm3  ;;  %vm963_vm6 = vsmask.f32 4368  ;;  %v6759_v59 = vld [vmem:[%s8298_s5] sm:$0xff] }
  0x18   : > { %494 = vmatpush.bf16.msra.mxu0 %v6279_v1  ;;  %s6594_s15 = scalar_lea.vmem %s8293_s0, %s6258_s29  ;;  %912 = vst.msk [vmem:[#allocation2 + $0x10] sm:$0xf] %vm906_vm1, %v6479_v13  ;;  %vm6718_vm7 = vmor %vm962_vm5, %vm963_vm6  ;;  %6342 = vmatpush.bf16.msra.mxu3 %v6759_v59  ;;  %vm736_vm11 = vcmask 130048   ;;  %vm1453_vm12 = vsmask.f32 3328  ;;  %s6480_s14 = smov 64  }
  0x19   : > { %v6259_v6 = vld [vmem:[%s6594_s15] sm:$0xff]  ;;  %v6260_v7 = vld [vmem:[%s6594_s15 + $0x8] sm:$0xff]  ;;  %v6261_v8 = vld [vmem:[%s6594_s15 + $0x10] sm:$0xff]  ;;  %914 = vst.msk [vmem:[#allocation2 + $0x18] sm:$0xf] %vm906_vm1, %v6479_v13  ;;  %s269_s17 = sand.u32 1, %s6469_s25  }
  0x1a   : > { %v6262_v9 = vld [vmem:[%s6594_s15 + $0x18] sm:$0xff]  ;;  %v6263_v10 = vld [vmem:[%s6594_s15 + $0x20] sm:$0xff]  ;;  %v6264_v11 = vld [vmem:[%s6594_s15 + $0x28] sm:$0xff]  ;;  %915 = vst.msk [vmem:[#allocation2 + $0x1c] sm:$0xf] %vm906_vm1, %v6479_v13  ;;  %s5690_s18 = sshll.u32 %s269_s17, 8 }
  0x1b   : > { %v6265_v12 = vld [vmem:[%s6594_s15 + $0x30] sm:$0xff]  ;;  %917 = vst.msk [vmem:[#allocation2 + $0x24] sm:$0xf] %vm906_vm1, %v6479_v13  ;;  %v6266_v14 = vld [vmem:[%s6594_s15 + $0x38] sm:$0xff]  ;;  %v6267_v16 = vld [vmem:[%s6594_s15 + $0x40] sm:$0xff]  ;;  %s8076_s19 = scalar_lea.vmem [#allocation3], %s5690_s18 }
  0x1c   : > { %495 = vmatpush.bf16.msra.mxu0 %v6278_v2  ;;  %918 = vst.msk [vmem:[#allocation2 + $0x28] sm:$0xf] %vm906_vm1, %v6479_v13  ;;  %v1289_v27 = vld [vmem:[#allocation2 + $0xc] sm:$0xf]  ;;  %vm6727_vm8 = vmand %vm909_vm2, %vm962_vm5  ;;  %v6269_v1 = vld [vmem:[%s6594_s15 + $0x50] sm:$0xff]  ;;  %s6339_s22 = sshll.u32 %s6544_s28, 8 }
  0x1d   : > { %920 = vst.msk [vmem:[#allocation2 + $0x30] sm:$0xf] %vm906_vm1, %v6479_v13  ;;  %v6268_v35 = vld [vmem:[%s6594_s15 + $0x48] sm:$0xff]  ;;  %v6281_v2 = vld [vmem:[%s8296_s3] sm:$0xff]  ;;  %vm1454_vm13 = vsmask.f32 7440  ;;  %s5620_s8 = scalar_lea.hbm %s8300_s7, %s6339_s22 }
  0x1e   : > { %921 = vst.msk [vmem:[#allocation2 + $0x34] sm:$0xf] %vm906_vm1, %v6479_v13  ;;  %6340 = vmatpush.bf16.msra.mxu1 %v6281_v2  ;;  %vm6840_vm15 = vmor %vm1453_vm12, %vm1454_vm13  ;;  %s5621_s9 = sshll.u32 %s8076_s19, 4  ;;  %s5623_s13 = sshll.u32 %s5620_s8, 4  ;;  %s5622_s9 = int_to_ptr.vmem [resolvable:$true] %s5621_s9  ;;  %s5624_s13 = int_to_ptr.hbm [resolvable:$true] %s5623_s13 }
  0x1f   : > { %923 = vst.msk [vmem:[#allocation2 + $0x3c] sm:$0xf] %vm906_vm1, %v6479_v13  ;;  %s5609_s28 = scalar_lea.sflag [#allocation4], %s269_s17  ;;  %s6435_s20 = scalar_lea.hbm %s8300_s7, 512 }
  0x20   : > { %496 = vmatpush.bf16.msra.mxu0 %v6277_v3  ;;  %924 = vst.msk [vmem:[#allocation2 + $0x40] sm:$0xf] %vm906_vm1, %v6479_v13  ;;  %v1298_v56 = vld [vmem:[#allocation2 + $0x18] sm:$0xf] }
  0x21   : > { %926 = vst.msk [vmem:[#allocation2 + $0x48] sm:$0xf] %vm906_vm1, %v6479_v13 }
  0x22   : > { %927 = vst.msk [vmem:[#allocation2 + $0x4c] sm:$0xf] %vm906_vm1, %v6479_v13 }
  0x23   : > { %929 = vst.msk [vmem:[#allocation2 + $0x54] sm:$0xf] %vm906_vm1, %v6479_v13 }
  0x24   : > { %497 = vmatpush.bf16.msra.mxu0 %v6276_v4  ;;  %930 = vst.msk [vmem:[#allocation2 + $0x58] sm:$0xf] %vm906_vm1, %v6479_v13 }
  0x25   : > { %932 = vst.msk [vmem:[#allocation2 + $0x60] sm:$0xf] %vm906_vm1, %v6479_v13 }
  0x26   : > { %933 = vst.msk [vmem:[#allocation2 + $0x64] sm:$0xf] %vm906_vm1, %v6479_v13 }
  0x27   : > { %935 = vst.msk [vmem:[#allocation2 + $0x6c] sm:$0xf] %vm906_vm1, %v6479_v13 }
  0x28   : > { %498 = vmatpush.bf16.msra.mxu0 %v6275_v5  ;;  %936 = vst.msk [vmem:[#allocation2 + $0x70] sm:$0xf] %vm906_vm1, %v6479_v13 }
  0x29   : > { %938 = vst.msk [vmem:[#allocation2 + $0x78] sm:$0xf] %vm906_vm1, %v6479_v13 }
  0x2a   : > { %939 = vst.msk [vmem:[#allocation2 + $0x7c] sm:$0xf] %vm906_vm1, %v6479_v13 }
  0x2b   : > { %5781 = vmatmul.msk.bf16.vlgmr.msra.gmra.mxu0 %vm442_vm0, %v6259_v6  ;;  %941 = vst.msk [vmem:[#allocation2 + $0x84] sm:$0xf] %vm906_vm1, %v6479_v13 }
  0x2c   : > { %942 = vst.msk [vmem:[#allocation2 + $0x88] sm:$0xf] %vm906_vm1, %v6479_v13  ;;  %792 = vmatpush.bf16.msrb.mxu0 %v6281_v2 }
  0x2d   : > { %944 = vst.msk [vmem:[#allocation2 + $0x90] sm:$0xf] %vm906_vm1, %v6479_v13 }
  0x2e   : > { %945 = vst.msk [vmem:[#allocation2 + $0x94] sm:$0xf] %vm906_vm1, %v6479_v13 }
  0x2f   : > { %947 = vst.msk [vmem:[#allocation2 + $0x9c] sm:$0xf] %vm906_vm1, %v6479_v13 }
  0x30   : > { %948 = vst.msk [vmem:[#allocation2 + $0xa0] sm:$0xf] %vm906_vm1, %v6479_v13 }
  0x31   : > { %950 = vst.msk [vmem:[#allocation2 + $0xa8] sm:$0xf] %vm906_vm1, %v6479_v13 }
  0x32   : > { %951 = vst.msk [vmem:[#allocation2 + $0xac] sm:$0xf] %vm906_vm1, %v6479_v13 }
  0x33   : > { %953 = vst.msk [vmem:[#allocation2 + $0xb4] sm:$0xf] %vm906_vm1, %v6479_v13 }
  0x34   : > { %954 = vst.msk [vmem:[#allocation2 + $0xb8] sm:$0xf] %vm906_vm1, %v6479_v13 }
  0x35   : > { %956 = vst.msk [vmem:[#allocation2 + $0xc0] sm:$0xf] %vm906_vm1, %v6479_v13 }
  0x36   : > { %957 = vst.msk [vmem:[#allocation2 + $0xc4] sm:$0xf] %vm906_vm1, %v6479_v13 }
  0x37   : > { %959 = vst.msk [vmem:[#allocation2 + $0xcc] sm:$0xf] %vm906_vm1, %v6479_v13 }
  0x38   : > { %960 = vst.msk [vmem:[#allocation2 + $0xd0] sm:$0xf] %vm906_vm1, %v6479_v13 }
  0x39   : > { %913 = vst.msk [vmem:[#allocation2 + $0x14] sm:$0x1] %vm909_vm2, %v6479_v13 }
  0x3a   : > { %910 = vst.msk [vmem:[#allocation2 + $0x8] sm:$0x1] %vm909_vm2, %v6479_v13 }
  0x3b   : > { %5782 = vmatmul.msk.bf16.gmra.mxu0 %vm442_vm0, %v6260_v7  ;;  %916 = vst.msk [vmem:[#allocation2 + $0x20] sm:$0x1] %vm909_vm2, %v6479_v13 }
  0x3c   : > { %919 = vst.msk [vmem:[#allocation2 + $0x2c] sm:$0x1] %vm909_vm2, %v6479_v13 }
  0x3d   : > { %922 = vst.msk [vmem:[#allocation2 + $0x38] sm:$0x1] %vm909_vm2, %v6479_v13 }
  0x3e   : > { %925 = vst.msk [vmem:[#allocation2 + $0x44] sm:$0x1] %vm909_vm2, %v6479_v13 }
  0x3f   : > { %928 = vst.msk [vmem:[#allocation2 + $0x50] sm:$0x1] %vm909_vm2, %v6479_v13 }
  0x40   : > { %931 = vst.msk [vmem:[#allocation2 + $0x5c] sm:$0x1] %vm909_vm2, %v6479_v13  ;;  %v1295_v43 = vld [vmem:[#allocation2 + $0x14] sm:$0x1] }
  0x41   : > { %934 = vst.msk [vmem:[#allocation2 + $0x68] sm:$0x1] %vm909_vm2, %v6479_v13 }
  0x42   : > { %937 = vst.msk [vmem:[#allocation2 + $0x74] sm:$0x1] %vm909_vm2, %v6479_v13 }
  0x43   : > { %940 = vst.msk [vmem:[#allocation2 + $0x80] sm:$0x1] %vm909_vm2, %v6479_v13 }
  0x44   : > { %943 = vst.msk [vmem:[#allocation2 + $0x8c] sm:$0x1] %vm909_vm2, %v6479_v13 }
  0x45   : > { %946 = vst.msk [vmem:[#allocation2 + $0x98] sm:$0x1] %vm909_vm2, %v6479_v13 }
  0x46   : > { %949 = vst.msk [vmem:[#allocation2 + $0xa4] sm:$0x1] %vm909_vm2, %v6479_v13 }
  0x47   : > { %952 = vst.msk [vmem:[#allocation2 + $0xb0] sm:$0x1] %vm909_vm2, %v6479_v13 }
  0x48   : > { %955 = vst.msk [vmem:[#allocation2 + $0xbc] sm:$0x1] %vm909_vm2, %v6479_v13 }
  0x49   : > { %958 = vst.msk [vmem:[#allocation2 + $0xc8] sm:$0x1] %vm909_vm2, %v6479_v13 }
  0x4a   : > { %961 = vst.msk [vmem:[#allocation2 + $0xd4] sm:$0x1] %vm909_vm2, %v6479_v13 }
  0x4b   : > { %5783 = vmatmul.msk.bf16.gmra.mxu0 %vm442_vm0, %v6261_v8  ;;  %v1302_v8 = vld [vmem:[#allocation2 + $0x20] sm:$0x1] }
  0x5b   : > { %5784 = vmatmul.msk.bf16.gmra.mxu0 %vm442_vm0, %v6262_v9 }
  0x6b   : > { %5785 = vmatmul.msk.bf16.gmra.mxu0 %vm442_vm0, %v6263_v10 }
  0x7b   : > { %5786 = vmatmul.msk.bf16.gmra.mxu0 %vm442_vm0, %v6264_v11 }
  0x8b   : > { %5787 = vmatmul.msk.bf16.gmra.mxu0 %vm442_vm0, %v6265_v12 }
  0x9b   : > { %5788 = vmatmul.msk.bf16.gmra.mxu0 %vm442_vm0, %v6266_v14 }
  0xa8   : > { %v500_v17 = vpop.f32.mrf.mxu0 }
  0xa9   : > { %v501_v18 = vadd.f32 %v6663_v15, %v500_v17 }
  0xab   : > { %v580_v19 = vmax.f32 %v501_v18, 0.0  ;;  %5789 = vmatmul.msk.bf16.gmra.mxu0 %vm442_vm0, %v6267_v16  ;;  %v6299_v18 = vld [vmem:[%s8298_s5 + $0x8] sm:$0xff] }
  0xac   : > { %6341 = vmatpush.bf16.msra.mxu2 %v6299_v18  ;;  %1952 = vmatpush.bf16.msra.mxu0 %v6299_v18 }
  0xad   : > { %v612_v20 = vpack.c.bf16 %v580_v19, %v580_v19 }
  0xaf   : > { %v966_v21 = vshrl.u32 %v612_v20, 16  ;;  %v969_v24 = vshll.u32 %v612_v20, 16  ;;  %v682_v32 = vunpack.c.l.b16 %v612_v20 }
  0xb0   : > { %v502_v22 = vpop.f32.mrf.mxu0 }
  0xb1   : > { %v968_v23 = vrot.slane %v966_v21, 7  ;;  %v503_v25 = vadd.f32 %v6663_v15, %v502_v22 }
  0xb3   : > { %v971_v28 = vor.u32 %v969_v24, %v968_v23  ;;  %v581_v29 = vmax.f32 %v503_v25, 0.0  ;;  %v972_v44 = vrot.slane %v968_v23, 4  ;;  %v1305_v23 = vld [vmem:[#allocation2 + $0x24] sm:$0xf] }
  0xb5   : > { %v1290_v30 = vsel %vm6696_vm4, %v971_v28, %v1289_v27  ;;  %v613_v31 = vpack.c.bf16 %v581_v29, %v581_v29 }
  0xb6   : > { %1291 = vst [vmem:[#allocation2 + $0xc] sm:$0xf] %v1290_v30 }
  0xb7   : > { %v683_v33 = vunpack.c.l.b16 %v613_v31  ;;  %v974_v34 = vshrl.u32 %v613_v31, 16  ;;  %v977_v40 = vshll.u32 %v613_v31, 16 }
  0xb8   : > { %v505_v36 = vpop.f32.mrf.mxu0 }
  0xb9   : > { %v6715_v37 = vpack.c.b16 %v683_v33, %v682_v32  ;;  %v976_v39 = vrot.slane %v974_v34, 7  ;;  %v506_v41 = vadd.f32 %v6663_v15, %v505_v36  ;;  %v6270_v32 = vld [vmem:[%s6594_s15 + $0x58] sm:$0xff] }
  0xbb   : > { %v979_v45 = vor.u32 %v977_v40, %v976_v39  ;;  %v981_v46 = vrot.slane %v976_v39, 4  ;;  %v582_v47 = vmax.f32 %v506_v41, 0.0  ;;  %5790 = vmatmul.msk.bf16.gmra.mxu0 %vm442_vm0, %v6268_v35  ;;  %v1309_v40 = vld [vmem:[#allocation2 + $0x2c] sm:$0x1] }
  0xbd   : > { %v980_v48 = vsel %vm6718_vm7, %v972_v44, %v979_v45  ;;  %v1296_v49 = vsel %vm6727_vm8, %v981_v46, %v1295_v43  ;;  %v614_v50 = vpack.c.bf16 %v582_v47, %v582_v47 }
  0xbe   : > { %1292 = vst.msk [vmem:[#allocation2 + $0x10] sm:$0xf] %vm906_vm1, %v980_v48 }
  0xbf   : > { %1297 = vst [vmem:[#allocation2 + $0x14] sm:$0x1] %v1296_v49  ;;  %v983_v51 = vshrl.u32 %v614_v50, 16  ;;  %v986_v54 = vshll.u32 %v614_v50, 16  ;;  %v684_v62 = vunpack.c.l.b16 %v614_v50 }
  0xc0   : > { %v507_v52 = vpop.f32.mrf.mxu0 }
  0xc1   : > { %v985_v53 = vrot.slane %v983_v51, 7  ;;  %v508_v55 = vadd.f32 %v6663_v15, %v507_v52 }
  0xc3   : > { %v988_v57 = vor.u32 %v986_v54, %v985_v53  ;;  %v583_v58 = vmax.f32 %v508_v55, 0.0  ;;  %v989_v9 = vrot.slane %v985_v53, 4  ;;  %v6317_v54 = vld [vmem:[%s8298_s5 + $0x18] sm:$0xff]  ;;  %v6318_v55 = vld [vmem:[%s8298_s5 + $0x20] sm:$0xff] }
  0xc4   : > { %2822 = vmatpush.bf16.msrb.mxu2 %v6317_v54  ;;  %3480 = vmatpush.bf16.msrb.mxu3 %v6318_v55 }
  0xc5   : > { %v1299_v60 = vsel %vm6696_vm4, %v988_v57, %v1298_v56  ;;  %v615_v61 = vpack.c.bf16 %v583_v58, %v583_v58  ;;  %v6795_v52 = vld [vmem:[#allocation2 + $0x10] sm:$0xf] }
  0xc6   : > { %1300 = vst [vmem:[#allocation2 + $0x18] sm:$0xf] %v1299_v60  ;;  %v6300_v57 = vld [vmem:[%s8298_s5 + $0x10] sm:$0xff]  ;;  %v2317_v2 = vrot.slane %v6795_v52, 5 }
  0xc7   : > { %v685_v63 = vunpack.c.l.b16 %v615_v61  ;;  %v991_v0 = vshrl.u32 %v615_v61, 16  ;;  %v994_v5 = vshll.u32 %v615_v61, 16  ;;  %2532 = vmatpush.bf16.msrb.mxu1 %v6300_v57 }
  0xc8   : > { %v510_v3 = vpop.f32.mrf.mxu0 }
  0xc9   : > { %v993_v4 = vrot.slane %v991_v0, 7  ;;  %v511_v6 = vadd.f32 %v6663_v15, %v510_v3  ;;  %v6771_v7 = vpack.c.b16 %v685_v63, %v684_v62  ;;  %v2258_v62 = vld [vmem:[#allocation2 + $0xc] sm:$0xe]  ;;  %v1312_v63 = vld [vmem:[#allocation2 + $0x30] sm:$0xf] }
  0xcb   : > { %v996_v10 = vor.u32 %v994_v5, %v993_v4  ;;  %v998_v11 = vrot.slane %v993_v4, 4  ;;  %v584_v12 = vmax.f32 %v511_v6, 0.0  ;;  %5791 = vmatmul.msk.bf16.gmra.mxu0 %vm442_vm0, %v6269_v1  ;;  %v5924_v6 = vrot.slane %v2258_v62, 9 }
  0xcd   : > { %v997_v13 = vsel %vm6718_vm7, %v989_v9, %v996_v10  ;;  %v1303_v14 = vsel %vm6727_vm8, %v998_v11, %v1302_v8  ;;  %v616_v16 = vpack.c.bf16 %v584_v12, %v584_v12  ;;  %v6820_v12 = vld [vmem:[#allocation2 + $0x14] sm:$0x1] }
  0xce   : > { %1301 = vst.msk [vmem:[#allocation2 + $0x1c] sm:$0xf] %vm906_vm1, %v997_v13  ;;  %v2319_v13 = vrot.slane %v2317_v2, 4 }
  0xcf   : > { %1304 = vst [vmem:[#allocation2 + $0x20] sm:$0x1] %v1303_v14  ;;  %v1000_v17 = vshrl.u32 %v616_v16, 16  ;;  %v1003_v21 = vshll.u32 %v616_v16, 16  ;;  %v686_v29 = vunpack.c.l.b16 %v616_v16 }
  0xd0   : > { %v512_v19 = vpop.f32.mrf.mxu0 }
  0xd1   : > { %v1002_v20 = vrot.slane %v1000_v17, 7  ;;  %v513_v22 = vadd.f32 %v6663_v15, %v512_v19 }
  0xd3   : > { %v1005_v24 = vor.u32 %v1003_v21, %v1002_v20  ;;  %v585_v25 = vmax.f32 %v513_v22, 0.0  ;;  %v1006_v41 = vrot.slane %v1002_v20, 4  ;;  %v6271_v20 = vld [vmem:[%s6594_s15 + $0x60] sm:$0xff] }
  0xd5   : > { %v1306_v27 = vsel %vm6696_vm4, %v1005_v24, %v1305_v23  ;;  %v617_v28 = vpack.c.bf16 %v585_v25, %v585_v25  ;;  %v2318_v23 = vsel %vm6812_vm14, %v5924_v6, %v2317_v2 }
  0xd6   : > { %1307 = vst [vmem:[#allocation2 + $0x24] sm:$0xf] %v1306_v27 }
  0xd7   : > { %v687_v30 = vunpack.c.l.b16 %v617_v28  ;;  %v1008_v31 = vshrl.u32 %v617_v28, 16  ;;  %v1011_v35 = vshll.u32 %v617_v28, 16 }
  0xd8   : > { %v515_v33 = vpop.f32.mrf.mxu0 }
  0xd9   : > { %v1010_v34 = vrot.slane %v1008_v31, 7  ;;  %v516_v36 = vadd.f32 %v6663_v15, %v515_v33  ;;  %v6787_v39 = vpack.c.b16 %v687_v30, %v686_v29  ;;  %v2320_v29 = vrot.slane %v6820_v12, 5 }
  0xdb   : > { %v1013_v43 = vor.u32 %v1011_v35, %v1010_v34  ;;  %v1015_v44 = vrot.slane %v1010_v34, 4  ;;  %v586_v45 = vmax.f32 %v516_v36, 0.0  ;;  %5792 = vmatmul.msk.bf16.gmra.mxu0 %vm442_vm0, %v6270_v32  ;;  %v1316_v35 = vld [vmem:[#allocation2 + $0x38] sm:$0x1] }
  0xdd   : > { %v1014_v46 = vsel %vm6718_vm7, %v1006_v41, %v1013_v43  ;;  %v1310_v47 = vsel %vm6727_vm8, %v1015_v44, %v1309_v40  ;;  %v618_v48 = vpack.c.bf16 %v586_v45, %v586_v45  ;;  %v1409_v49 = vld [vmem:[#allocation2 + $0x24] sm:$0xf]  ;;  %v2321_v41 = vsel %vm6812_vm14, %v2319_v13, %v2320_v29 }
  0xde   : > { %1308 = vst.msk [vmem:[#allocation2 + $0x28] sm:$0xf] %vm906_vm1, %v1014_v46  ;;  %v1529_v50 = vshrl.u32 %v1409_v49, 16  ;;  %v1532_v51 = vshll.u32 %v1409_v49, 16 }
  0xdf   : > { %1311 = vst [vmem:[#allocation2 + $0x2c] sm:$0x1] %v1310_v47  ;;  %v1017_v53 = vshrl.u32 %v618_v48, 16  ;;  %v1020_v60 = vshll.u32 %v618_v48, 16  ;;  %v688_v21 = vunpack.c.l.b16 %v618_v48  ;;  %v2425_v47 = vunpack.c.l.b16 %v2318_v23 }
  0xe0   : > { %v517_v56 = vpop.f32.mrf.mxu0  ;;  %v1531_v0 = vrot.slane %v1529_v50, 4  ;;  %v1534_v1 = vrot.slane %v1532_v51, 5  ;;  %v2426_v51 = vunpack.c.l.b16 %v2321_v41  ;;  %v1323_v41 = vld [vmem:[#allocation2 + $0x44] sm:$0x1] }
  0xe1   : > { %v6806_v58 = vrot.slane %v1017_v53, 7  ;;  %v518_v61 = vadd.f32 %v6663_v15, %v517_v56 }
  0xe2   : > { %v1535_v16 = vor.u32 %v1534_v1, %v1531_v0 }
  0xe3   : > { %v1022_v3 = vor.u32 %v1020_v60, %v6806_v58  ;;  %v587_v4 = vmax.f32 %v518_v61, 0.0  ;;  %v1023_v34 = vrot.slane %v6806_v58, 4  ;;  %v6853_v61 = vpack.c.b16 %v2426_v51, %v2425_v47 }
  0xe4   : > { %v1536_v36 = vrot.slane %v1535_v16, 4 }
  0xe5   : > { %v1313_v8 = vsel %vm6696_vm4, %v1022_v3, %v1312_v63  ;;  %v619_v9 = vpack.c.bf16 %v587_v4, %v587_v4  ;;  %v6285_v10 = vld [vmem:[#allocation2 + $0x24] sm:$0xff] }
  0xe6   : > { %v6818_v11 = vld [vmem:[#allocation2 + $0x28] sm:$0xf]  ;;  %1314 = vst [vmem:[#allocation2 + $0x30] sm:$0xf] %v1313_v8  ;;  %v6822_v14 = vld [vmem:[#allocation2 + $0x2c] sm:$0x1]  ;;  %5910 = vmatmul.msk.bf16.vlgmr.msra.gmra.mxu3 %vm736_vm11, %v6285_v10 }
  0xe7   : > { %v1538_v17 = vshll.u32 %v6818_v11, 16  ;;  %v1542_v18 = vshrl.u32 %v6818_v11, 16  ;;  %v1025_v19 = vshrl.u32 %v619_v9, 16  ;;  %v689_v22 = vunpack.c.l.b16 %v619_v9  ;;  %v1319_v8 = vld [vmem:[#allocation2 + $0x3c] sm:$0xf] }
  0xe8   : > { %v520_v24 = vpop.f32.mrf.mxu0  ;;  %v1548_v28 = vshll.u32 %v6822_v14, 16  ;;  %v1028_v31 = vshll.u32 %v619_v9, 16 }
  0xe9   : > { %v1540_v25 = vrot.slane %v1538_v17, 5  ;;  %v1544_v27 = vrot.slane %v1542_v18, 4  ;;  %v1027_v30 = vrot.slane %v1025_v19, 7  ;;  %v521_v32 = vadd.f32 %v6663_v15, %v520_v24 }
  0xea   : > { %v717_v33 = vpack.c.b16 %v689_v22, %v688_v21  ;;  %v1550_v50 = vrot.slane %v1548_v28, 5 }
  0xeb   : > { %v1545_v40 = vor.u32 %v1544_v27, %v1540_v25  ;;  %v1030_v43 = vor.u32 %v1028_v31, %v1027_v30  ;;  %v1032_v44 = vrot.slane %v1027_v30, 4  ;;  %v588_v45 = vmax.f32 %v521_v32, 0.0  ;;  %5793 = vmatmul.msk.bf16.gmra.mxu0 %vm442_vm0, %v6271_v20  ;;  %v6272_v27 = vld [vmem:[%s6594_s15 + $0x68] sm:$0xff] }
  0xec   : > { %5804 = vmatmul.msk.bf16.vlgmr.msra.gmra.mxu1 %vm736_vm11, %v717_v33  ;;  %v1541_v48 = vsel %vm6840_vm15, %v1536_v36, %v1540_v25 }
  0xed   : > { %v1546_v49 = vrot.slane %v1545_v40, 4  ;;  %v1031_v53 = vsel %vm6718_vm7, %v1023_v34, %v1030_v43  ;;  %v1317_v54 = vsel %vm6727_vm8, %v1032_v44, %v1316_v35  ;;  %v620_v55 = vpack.c.bf16 %v588_v45, %v588_v45  ;;  %v1411_v56 = vld [vmem:[#allocation2 + $0x30] sm:$0xf] }
  0xee   : > { %1315 = vst.msk [vmem:[#allocation2 + $0x34] sm:$0xf] %vm906_vm1, %v1031_v53  ;;  %v1553_v58 = vshrl.u32 %v1411_v56, 16  ;;  %v1556_v60 = vshll.u32 %v1411_v56, 16  ;;  %v1849_v63 = vunpack.c.l.b16 %v1541_v48 }
  0xef   : > { %v1551_v57 = vsel %vm6840_vm15, %v1546_v49, %v1550_v50  ;;  %1318 = vst [vmem:[#allocation2 + $0x38] sm:$0x1] %v1317_v54  ;;  %v1034_v62 = vshrl.u32 %v620_v55, 16  ;;  %v1037_v3 = vshll.u32 %v620_v55, 16  ;;  %v690_v28 = vunpack.c.l.b16 %v620_v55 }
  0xf0   : > { %v1850_v0 = vunpack.c.l.b16 %v1551_v57  ;;  %v522_v1 = vpop.f32.mrf.mxu0  ;;  %v1555_v9 = vrot.slane %v1553_v58, 4  ;;  %v1558_v10 = vrot.slane %v1556_v60, 5 }
  0xf1   : > { %v1036_v2 = vrot.slane %v1034_v62, 7  ;;  %v523_v4 = vadd.f32 %v6663_v15, %v522_v1 }
  0xf2   : > { %v1878_v6 = vpack.c.b16 %v1850_v0, %v1849_v63  ;;  %v1559_v22 = vor.u32 %v1558_v10, %v1555_v9  ;;  %v2259_v63 = vld [vmem:[#allocation2 + $0x18] sm:$0xe] }
  0xf3   : > { %v1039_v13 = vor.u32 %v1037_v3, %v1036_v2  ;;  %v589_v16 = vmax.f32 %v523_v4, 0.0  ;;  %v1040_v45 = vrot.slane %v1036_v2, 4  ;;  %v6873_v3 = vld [vmem:[#allocation2 + $0x1c] sm:$0xf] }
  0xf4   : > { %5826 = vmatmul.msk.bf16.vlgmr.msra.gmra.mxu2 %vm736_vm11, %v1878_v6  ;;  %v1560_v43 = vrot.slane %v1559_v22, 4 }
  0xf5   : > { %v1320_v17 = vsel %vm6696_vm4, %v1039_v13, %v1319_v8  ;;  %v621_v18 = vpack.c.bf16 %v589_v16, %v589_v16  ;;  %v6286_v19 = vld [vmem:[#allocation2 + $0x30] sm:$0xff]  ;;  %v6876_v13 = vld [vmem:[#allocation2 + $0x20] sm:$0x1]  ;;  %v1326_v16 = vld [vmem:[#allocation2 + $0x48] sm:$0xf] }
  0xf6   : > { %v1412_v20 = vld [vmem:[#allocation2 + $0x34] sm:$0xf]  ;;  %1321 = vst [vmem:[#allocation2 + $0x3c] sm:$0xf] %v1320_v17  ;;  %v1441_v21 = vld [vmem:[#allocation2 + $0x38] sm:$0x1]  ;;  %5911 = vmatmul.msk.bf16.gmra.mxu3 %vm736_vm11, %v6286_v19 }
  0xf7   : > { %v1562_v23 = vshll.u32 %v1412_v20, 16  ;;  %v1566_v24 = vshrl.u32 %v1412_v20, 16  ;;  %v1042_v25 = vshrl.u32 %v621_v18, 16  ;;  %v691_v29 = vunpack.c.l.b16 %v621_v18 }
  0xf8   : > { %v525_v30 = vpop.f32.mrf.mxu0  ;;  %v1572_v33 = vshll.u32 %v1441_v21, 16  ;;  %v1045_v35 = vshll.u32 %v621_v18, 16  ;;  %v5925_v19 = vrot.slane %v2259_v63, 9  ;;  %v2324_v20 = vrot.slane %v6873_v3, 5 }
  0xf9   : > { %v1564_v31 = vrot.slane %v1562_v23, 5  ;;  %v1568_v32 = vrot.slane %v1566_v24, 4  ;;  %v1044_v34 = vrot.slane %v1042_v25, 7  ;;  %v526_v36 = vadd.f32 %v6663_v15, %v525_v30 }
  0xfa   : > { %v718_v40 = vpack.c.b16 %v691_v29, %v690_v28  ;;  %v1574_v53 = vrot.slane %v1572_v33, 5  ;;  %v2325_v23 = vsel %vm6812_vm14, %v5925_v19, %v2324_v20  ;;  %v2326_v24 = vrot.slane %v2324_v20, 4 }
  0xfb   : > { %v1569_v44 = vor.u32 %v1568_v32, %v1564_v31  ;;  %v1047_v47 = vor.u32 %v1045_v35, %v1044_v34  ;;  %v1049_v48 = vrot.slane %v1044_v34, 4  ;;  %v590_v49 = vmax.f32 %v526_v36, 0.0  ;;  %5794 = vmatmul.msk.bf16.gmra.mxu0 %vm442_vm0, %v6272_v27 }
  0xfc   : > { %5805 = vmatmul.msk.bf16.gmra.mxu1 %vm736_vm11, %v718_v40  ;;  %v1565_v50 = vsel %vm6840_vm15, %v1560_v43, %v1564_v31  ;;  %v2327_v25 = vrot.slane %v6876_v13, 5  ;;  %v6273_v40 = vld [vmem:[%s6594_s15 + $0x70] sm:$0xff] }
  0xfd   : > { %v1570_v51 = vrot.slane %v1569_v44, 4  ;;  %v1048_v54 = vsel %vm6718_vm7, %v1040_v45, %v1047_v47  ;;  %v1324_v55 = vsel %vm6727_vm8, %v1049_v48, %v1323_v41  ;;  %v622_v56 = vpack.c.bf16 %v590_v49, %v590_v49  ;;  %v1413_v57 = vld [vmem:[#allocation2 + $0x3c] sm:$0xf] }
  0xfe   : > { %1322 = vst.msk [vmem:[#allocation2 + $0x40] sm:$0xf] %vm906_vm1, %v1048_v54  ;;  %v1577_v60 = vshrl.u32 %v1413_v57, 16  ;;  %v1580_v62 = vshll.u32 %v1413_v57, 16  ;;  %v1851_v1 = vunpack.c.l.b16 %v1565_v50  ;;  %v2328_v35 = vsel %vm6812_vm14, %v2326_v24, %v2327_v25  ;;  %v1330_v57 = vld [vmem:[#allocation2 + $0x50] sm:$0x1] }
  0xff   : > { %v1575_v58 = vsel %vm6840_vm15, %v1570_v51, %v1574_v53  ;;  %1325 = vst [vmem:[#allocation2 + $0x44] sm:$0x1] %v1324_v55  ;;  %v1051_v0 = vshrl.u32 %v622_v56, 16  ;;  %v1054_v8 = vshll.u32 %v622_v56, 16  ;;  %v692_v41 = vunpack.c.l.b16 %v622_v56 }
 0x100   : > { %v1852_v2 = vunpack.c.l.b16 %v1575_v58  ;;  %v527_v4 = vpop.f32.mrf.mxu0  ;;  %v1579_v17 = vrot.slane %v1577_v60, 4  ;;  %v1582_v18 = vrot.slane %v1580_v62, 5  ;;  %v2427_v44 = vunpack.c.l.b16 %v2325_v23 }
 0x101   : > { %v1053_v6 = vrot.slane %v1051_v0, 7  ;;  %v528_v9 = vadd.f32 %v6663_v15, %v527_v4  ;;  %v2428_v50 = vunpack.c.l.b16 %v2328_v35 }
 0x102   : > { %v1879_v10 = vpack.c.b16 %v1852_v2, %v1851_v1  ;;  %v1583_v32 = vor.u32 %v1582_v18, %v1579_v17 }
 0x103   : > { %v1056_v21 = vor.u32 %v1054_v8, %v1053_v6  ;;  %v591_v22 = vmax.f32 %v528_v9, 0.0  ;;  %v6890_v62 = vpack.c.b16 %v2428_v50, %v2427_v44  ;;  %v1057_v63 = vrot.slane %v1053_v6, 4 }
 0x104   : > { %5827 = vmatmul.msk.bf16.gmra.mxu2 %vm736_vm11, %v1879_v10  ;;  %v1584_v58 = vrot.slane %v1583_v32, 4 }
 0x105   : > { %v1327_v27 = vsel %vm6696_vm4, %v1056_v21, %v1326_v16  ;;  %v623_v28 = vpack.c.bf16 %v591_v22, %v591_v22  ;;  %v6287_v29 = vld [vmem:[#allocation2 + $0x3c] sm:$0xff] }
 0x106   : > { %v1414_v30 = vld [vmem:[#allocation2 + $0x40] sm:$0xf]  ;;  %1328 = vst [vmem:[#allocation2 + $0x48] sm:$0xf] %v1327_v27  ;;  %v1442_v31 = vld [vmem:[#allocation2 + $0x44] sm:$0x1]  ;;  %5912 = vmatmul.msk.bf16.gmra.mxu3 %vm736_vm11, %v6287_v29 }
 0x107   : > { %v1586_v33 = vshll.u32 %v1414_v30, 16  ;;  %v1590_v34 = vshrl.u32 %v1414_v30, 16  ;;  %v1059_v36 = vshrl.u32 %v623_v28, 16  ;;  %v693_v43 = vunpack.c.l.b16 %v623_v28  ;;  %v1333_v29 = vld [vmem:[#allocation2 + $0x54] sm:$0xf] }
 0x108   : > { %v530_v45 = vpop.f32.mrf.mxu0  ;;  %v1596_v49 = vshll.u32 %v1442_v31, 16  ;;  %v1062_v53 = vshll.u32 %v623_v28, 16 }
 0x109   : > { %v1588_v47 = vrot.slane %v1586_v33, 5  ;;  %v1592_v48 = vrot.slane %v1590_v34, 4  ;;  %v1061_v51 = vrot.slane %v1059_v36, 7  ;;  %v531_v54 = vadd.f32 %v6663_v15, %v530_v45 }
 0x10a   : > { %v719_v55 = vpack.c.b16 %v693_v43, %v692_v41  ;;  %v1598_v8 = vrot.slane %v1596_v49, 5 }
 0x10b   : > { %v1593_v60 = vor.u32 %v1592_v48, %v1588_v47  ;;  %v1064_v0 = vor.u32 %v1062_v53, %v1061_v51  ;;  %v1066_v56 = vrot.slane %v1061_v51, 4  ;;  %v592_v1 = vmax.f32 %v531_v54, 0.0  ;;  %5795 = vmatmul.msk.bf16.gmra.mxu0 %vm442_vm0, %v6273_v40  ;;  %v6274_v48 = vld [vmem:[%s6594_s15 + $0x78] sm:$0xff] }
 0x10c   : > { %5806 = vmatmul.msk.bf16.gmra.mxu1 %vm736_vm11, %v719_v55  ;;  %v1589_v2 = vsel %vm6840_vm15, %v1584_v58, %v1588_v47 }
 0x10d   : > { %v1594_v4 = vrot.slane %v1593_v60, 4  ;;  %v1065_v9 = vsel %vm6718_vm7, %v1057_v63, %v1064_v0  ;;  %v1331_v10 = vsel %vm6727_vm8, %v1066_v56, %v1330_v57  ;;  %v624_v16 = vpack.c.bf16 %v592_v1, %v592_v1  ;;  %v1415_v6 = vld [vmem:[#allocation2 + $0x48] sm:$0xf]  ;;  %v1337_v0 = vld [vmem:[#allocation2 + $0x5c] sm:$0x1] }
 0x10e   : > { %1329 = vst.msk [vmem:[#allocation2 + $0x4c] sm:$0xf] %vm906_vm1, %v1065_v9  ;;  %v1601_v18 = vshrl.u32 %v1415_v6, 16  ;;  %v1604_v19 = vshll.u32 %v1415_v6, 16  ;;  %v1853_v21 = vunpack.c.l.b16 %v1589_v2 }
 0x10f   : > { %v1599_v17 = vsel %vm6840_vm15, %v1594_v4, %v1598_v8  ;;  %1332 = vst [vmem:[#allocation2 + $0x50] sm:$0x1] %v1331_v10  ;;  %v1068_v20 = vshrl.u32 %v624_v16, 16  ;;  %v1071_v25 = vshll.u32 %v624_v16, 16  ;;  %v694_v49 = vunpack.c.l.b16 %v624_v16 }
 0x110   : > { %v1854_v22 = vunpack.c.l.b16 %v1599_v17  ;;  %v532_v23 = vpop.f32.mrf.mxu0  ;;  %v1603_v30 = vrot.slane %v1601_v18, 4  ;;  %v1606_v31 = vrot.slane %v1604_v19, 5 }
 0x111   : > { %v1070_v24 = vrot.slane %v1068_v20, 7  ;;  %v533_v27 = vadd.f32 %v6663_v15, %v532_v23 }
 0x112   : > { %v1880_v28 = vpack.c.b16 %v1854_v22, %v1853_v21  ;;  %v1607_v43 = vor.u32 %v1606_v31, %v1603_v30  ;;  %v2260_v21 = vld [vmem:[#allocation2 + $0x24] sm:$0xe]  ;;  %v2331_v22 = vrot.slane %v6818_v11, 5  ;;  %v2334_v11 = vrot.slane %v6822_v14, 5 }
 0x113   : > { %v1073_v32 = vor.u32 %v1071_v25, %v1070_v24  ;;  %v593_v33 = vmax.f32 %v533_v27, 0.0  ;;  %v1074_v2 = vrot.slane %v1070_v24, 4 }
 0x114   : > { %5828 = vmatmul.msk.bf16.gmra.mxu2 %vm736_vm11, %v1880_v28  ;;  %v1608_v56 = vrot.slane %v1607_v43, 4 }
 0x115   : > { %v1334_v34 = vsel %vm6696_vm4, %v1073_v32, %v1333_v29  ;;  %v625_v35 = vpack.c.bf16 %v593_v33, %v593_v33  ;;  %v6288_v36 = vld [vmem:[#allocation2 + $0x48] sm:$0xff]  ;;  %v5926_v32 = vrot.slane %v2260_v21, 9 }
 0x116   : > { %v1416_v40 = vld [vmem:[#allocation2 + $0x4c] sm:$0xf]  ;;  %1335 = vst [vmem:[#allocation2 + $0x54] sm:$0xf] %v1334_v34  ;;  %v1443_v41 = vld [vmem:[#allocation2 + $0x50] sm:$0x1]  ;;  %5913 = vmatmul.msk.bf16.gmra.mxu3 %vm736_vm11, %v6288_v36 }
 0x117   : > { %v1610_v44 = vshll.u32 %v1416_v40, 16  ;;  %v1614_v45 = vshrl.u32 %v1416_v40, 16  ;;  %v1076_v47 = vshrl.u32 %v625_v35, 16  ;;  %v695_v50 = vunpack.c.l.b16 %v625_v35  ;;  %v1340_v40 = vld [vmem:[#allocation2 + $0x60] sm:$0xf] }
 0x118   : > { %v535_v51 = vpop.f32.mrf.mxu0  ;;  %v1620_v55 = vshll.u32 %v1443_v41, 16  ;;  %v1079_v58 = vshll.u32 %v625_v35, 16  ;;  %v2333_v36 = vrot.slane %v2331_v22, 4 }
 0x119   : > { %v1612_v53 = vrot.slane %v1610_v44, 5  ;;  %v1616_v54 = vrot.slane %v1614_v45, 4  ;;  %v1078_v57 = vrot.slane %v1076_v47, 7  ;;  %v536_v60 = vadd.f32 %v6663_v15, %v535_v51 }
 0x11a   : > { %v720_v63 = vpack.c.b16 %v695_v50, %v694_v49  ;;  %v1622_v6 = vrot.slane %v1620_v55, 5  ;;  %v2332_v47 = vsel %vm6812_vm14, %v5926_v32, %v2331_v22 }
 0x11b   : > { %v1617_v1 = vor.u32 %v1616_v54, %v1612_v53  ;;  %v1081_v4 = vor.u32 %v1079_v58, %v1078_v57  ;;  %v1083_v8 = vrot.slane %v1078_v57, 4  ;;  %v594_v9 = vmax.f32 %v536_v60, 0.0  ;;  %5796 = vmatmul.msk.bf16.gmra.mxu0 %vm442_vm0, %v6274_v48 }
 0x11c   : > { %5807 = vmatmul.msk.bf16.gmra.mxu1 %vm736_vm11, %v720_v63  ;;  %v1613_v10 = vsel %vm6840_vm15, %v1608_v56, %v1612_v53  ;;  %v2335_v48 = vsel %vm6812_vm14, %v2333_v36, %v2334_v11  ;;  %v2429_v60 = vunpack.c.l.b16 %v2332_v47  ;;  %vm5543_vm0 = vcmask 523264  }
 0x11d   : > { %v1618_v16 = vrot.slane %v1617_v1, 4  ;;  %v1082_v17 = vsel %vm6718_vm7, %v1074_v2, %v1081_v4  ;;  %v1338_v18 = vsel %vm6727_vm8, %v1083_v8, %v1337_v0  ;;  %v626_v19 = vpack.c.bf16 %v594_v9, %v594_v9  ;;  %v1417_v20 = vld [vmem:[#allocation2 + $0x54] sm:$0xf] }
 0x11e   : > { %1336 = vst.msk [vmem:[#allocation2 + $0x58] sm:$0xf] %vm906_vm1, %v1082_v17  ;;  %v1625_v24 = vshrl.u32 %v1417_v20, 16  ;;  %v1628_v25 = vshll.u32 %v1417_v20, 16  ;;  %v1855_v28 = vunpack.c.l.b16 %v1613_v10  ;;  %v2430_v14 = vunpack.c.l.b16 %v2335_v48 }
 0x11f   : > { %v1623_v23 = vsel %vm6840_vm15, %v1618_v16, %v1622_v6  ;;  %1339 = vst [vmem:[#allocation2 + $0x5c] sm:$0x1] %v1338_v18  ;;  %v1085_v27 = vshrl.u32 %v626_v19, 16  ;;  %v1088_v30 = vshll.u32 %v626_v19, 16  ;;  %v696_v0 = vunpack.c.l.b16 %v626_v19  ;;  %v1344_v18 = vld [vmem:[#allocation2 + $0x68] sm:$0x1] }
 0x120   : > { %v1856_v29 = vunpack.c.l.b16 %v1623_v23  ;;  %v537_v31 = vpop.f32.mrf.mxu0  ;;  %v1627_v41 = vrot.slane %v1625_v24, 4  ;;  %v1630_v43 = vrot.slane %v1628_v25, 5  ;;  %v6932_v9 = vpack.c.b16 %v2430_v14, %v2429_v60 }
 0x121   : > { %v1087_v33 = vrot.slane %v1085_v27, 7  ;;  %v538_v34 = vadd.f32 %v6663_v15, %v537_v31 }
 0x122   : > { %v1881_v35 = vpack.c.b16 %v1856_v29, %v1855_v28  ;;  %v1631_v55 = vor.u32 %v1630_v43, %v1627_v41 }
 0x123   : > { %v1090_v44 = vor.u32 %v1088_v30, %v1087_v33  ;;  %v595_v45 = vmax.f32 %v538_v34, 0.0  ;;  %v1091_v22 = vrot.slane %v1087_v33, 4 }
 0x124   : > { %5829 = vmatmul.msk.bf16.gmra.mxu2 %vm736_vm11, %v1881_v35  ;;  %v1632_v20 = vrot.slane %v1631_v55, 4 }
 0x125   : > { %v1341_v49 = vsel %vm6696_vm4, %v1090_v44, %v1340_v40  ;;  %v627_v50 = vpack.c.bf16 %v595_v45, %v595_v45  ;;  %v6289_v51 = vld [vmem:[#allocation2 + $0x54] sm:$0xff]  ;;  %v1347_v45 = vld [vmem:[#allocation2 + $0x6c] sm:$0xf] }
 0x126   : > { %v1418_v53 = vld [vmem:[#allocation2 + $0x58] sm:$0xf]  ;;  %1342 = vst [vmem:[#allocation2 + $0x60] sm:$0xf] %v1341_v49  ;;  %v1444_v54 = vld [vmem:[#allocation2 + $0x5c] sm:$0x1]  ;;  %5914 = vmatmul.msk.bf16.gmra.mxu3 %vm736_vm11, %v6289_v51 }
 0x127   : > { %v1634_v57 = vshll.u32 %v1418_v53, 16  ;;  %v1638_v58 = vshrl.u32 %v1418_v53, 16  ;;  %v1093_v63 = vshrl.u32 %v627_v50, 16  ;;  %v697_v56 = vunpack.c.l.b16 %v627_v50 }
 0x128   : > { %v540_v1 = vpop.f32.mrf.mxu0  ;;  %v1644_v8 = vshll.u32 %v1444_v54, 16  ;;  %v1096_v16 = vshll.u32 %v627_v50, 16 }
 0x129   : > { %v1636_v2 = vrot.slane %v1634_v57, 5  ;;  %v1640_v4 = vrot.slane %v1638_v58, 4  ;;  %v1095_v10 = vrot.slane %v1093_v63, 7  ;;  %v541_v6 = vadd.f32 %v6663_v15, %v540_v1  ;;  %v1403_v1 = vld [vmem:[#allocation2] sm:$0xf] }
 0x12a   : > { %v721_v17 = vpack.c.b16 %v697_v56, %v696_v0  ;;  %v1646_v28 = vrot.slane %v1644_v8, 5 }
 0x12b   : > { %v1641_v21 = vor.u32 %v1640_v4, %v1636_v2  ;;  %v1098_v23 = vor.u32 %v1096_v16, %v1095_v10  ;;  %v1100_v24 = vrot.slane %v1095_v10, 4  ;;  %v596_v25 = vmax.f32 %v541_v6, 0.0  ;;  %5801 = vmatmul.msk.bf16.vlgmr.msrb.gmra.mxu0 %vm736_vm11, %v6715_v37 }
 0x12c   : > { %5808 = vmatmul.msk.bf16.gmra.mxu1 %vm736_vm11, %v721_v17  ;;  %v1637_v19 = vsel %vm6840_vm15, %v1632_v20, %v1636_v2  ;;  %2175 = vmatpush.bf16.msrb.mxu0 %v6759_v59  ;;  %v1351_v20 = vld [vmem:[#allocation2 + $0x74] sm:$0x1] }
 0x12d   : > { %v1642_v27 = vrot.slane %v1641_v21, 4  ;;  %v1099_v29 = vsel %vm6718_vm7, %v1091_v22, %v1098_v23  ;;  %v1345_v30 = vsel %vm6727_vm8, %v1100_v24, %v1344_v18  ;;  %v628_v31 = vpack.c.bf16 %v596_v25, %v596_v25  ;;  %v1419_v32 = vld [vmem:[#allocation2 + $0x60] sm:$0xf]  ;;  %v6954_v23 = vld [vmem:[#allocation2 + $0x4] sm:$0xf] }
 0x12e   : > { %1343 = vst.msk [vmem:[#allocation2 + $0x64] sm:$0xf] %vm906_vm1, %v1099_v29  ;;  %v1649_v33 = vshrl.u32 %v1419_v32, 16  ;;  %v1652_v34 = vshll.u32 %v1419_v32, 16  ;;  %v1857_v36 = vunpack.c.l.b16 %v1637_v19  ;;  %v1457_v24 = vshrl.u32 %v1403_v1, 16 }
 0x12f   : > { %v1647_v37 = vsel %vm6840_vm15, %v1642_v27, %v1646_v28  ;;  %1346 = vst [vmem:[#allocation2 + $0x68] sm:$0x1] %v1345_v30  ;;  %v1102_v35 = vshrl.u32 %v628_v31, 16  ;;  %v1105_v41 = vshll.u32 %v628_v31, 16  ;;  %v698_v0 = vunpack.c.l.b16 %v628_v31 }
 0x130   : > { %v1858_v11 = vunpack.c.l.b16 %v1647_v37  ;;  %v542_v59 = vpop.f32.mrf.mxu0  ;;  %v1651_v47 = vrot.slane %v1649_v33, 4  ;;  %v1654_v48 = vrot.slane %v1652_v34, 5  ;;  %v1460_v31 = vshll.u32 %v1403_v1, 16 }
 0x131   : > { %v1104_v40 = vrot.slane %v1102_v35, 7  ;;  %v543_v43 = vadd.f32 %v6663_v15, %v542_v59  ;;  %v1466_v35 = vshll.u32 %v6954_v23, 16  ;;  %v1470_v59 = vshrl.u32 %v6954_v23, 16 }
 0x132   : > { %v1882_v44 = vpack.c.b16 %v1858_v11, %v1857_v36  ;;  %v1655_v57 = vor.u32 %v1654_v48, %v1651_v47  ;;  %v1462_v47 = vrot.slane %v1460_v31, 5 }
 0x133   : > { %v1107_v49 = vor.u32 %v1105_v41, %v1104_v40  ;;  %v597_v50 = vmax.f32 %v543_v43, 0.0  ;;  %v1108_v25 = vrot.slane %v1104_v40, 4 }
 0x134   : > { %5830 = vmatmul.msk.bf16.gmra.mxu2 %vm736_vm11, %v1882_v44  ;;  %v1656_v21 = vrot.slane %v1655_v57, 4 }
 0x135   : > { %v1348_v51 = vsel %vm6696_vm4, %v1107_v49, %v1347_v45  ;;  %v629_v53 = vpack.c.bf16 %v597_v50, %v597_v50  ;;  %v6290_v14 = vld [vmem:[#allocation2 + $0x60] sm:$0xff]  ;;  %v1459_v45 = vrot.slane %v1457_v24, 4 }
 0x136   : > { %v1420_v54 = vld [vmem:[#allocation2 + $0x64] sm:$0xf]  ;;  %1349 = vst [vmem:[#allocation2 + $0x6c] sm:$0xf] %v1348_v51  ;;  %v1445_v55 = vld [vmem:[#allocation2 + $0x68] sm:$0x1]  ;;  %5915 = vmatmul.msk.bf16.gmra.mxu3 %vm736_vm11, %v6290_v14 }
 0x137   : > { %v1658_v58 = vshll.u32 %v1420_v54, 16  ;;  %v1662_v60 = vshrl.u32 %v1420_v54, 16  ;;  %v1110_v63 = vshrl.u32 %v629_v53, 16  ;;  %v699_v56 = vunpack.c.l.b16 %v629_v53  ;;  %v6973_v50 = vld [vmem:[%s8295_s2] ss:$0 sm:$0xff] }
 0x138   : > { %v545_v2 = vpop.f32.mrf.mxu0  ;;  %v1668_v10 = vshll.u32 %v1445_v55, 16  ;;  %v1113_v6 = vshll.u32 %v629_v53, 16  ;;  %v6976_v14 = vld [vmem:[#allocation2 + $0xc] sm:$0xf]  ;;  %v1354_v54 = vld [vmem:[#allocation2 + $0x78] sm:$0xf] }
 0x139   : > { %v1660_v4 = vrot.slane %v1658_v58, 5  ;;  %v1664_v8 = vrot.slane %v1662_v60, 4  ;;  %v1112_v16 = vrot.slane %v1110_v63, 7  ;;  %v546_v17 = vadd.f32 %v6663_v15, %v545_v2 }
 0x13a   : > { %v722_v18 = vpack.c.b16 %v699_v56, %v698_v0  ;;  %v1670_v30 = vrot.slane %v1668_v10, 5  ;;  %v6978_v58 = vrot.slane %v1466_v35, 5  ;;  %v1472_v60 = vrot.slane %v1470_v59, 4  ;;  %v1358_v35 = vld [vmem:[#allocation2 + $0x80] sm:$0x1] }
 0x13b   : > { %v1665_v22 = vor.u32 %v1664_v8, %v1660_v4  ;;  %v1115_v19 = vor.u32 %v1113_v6, %v1112_v16  ;;  %v1117_v27 = vrot.slane %v1112_v16, 4  ;;  %v598_v28 = vmax.f32 %v546_v17, 0.0  ;;  %5802 = vmatmul.msk.bf16.gmra.mxu0 %vm736_vm11, %v6771_v7  ;;  %v6983_v8 = vld [vmem:[#allocation2 + $0x8] sm:$0x1] }
 0x13c   : > { %5809 = vmatmul.msk.bf16.gmra.mxu1 %vm736_vm11, %v722_v18  ;;  %v1661_v29 = vsel %vm6840_vm15, %v1656_v21, %v1660_v4  ;;  %v1463_v10 = vor.u32 %v1462_v47, %v1459_v45  ;;  %v1481_v16 = vshrl.u32 %v6976_v14, 16  ;;  %v1473_v21 = vor.u32 %v1472_v60, %v6978_v58 }
 0x13d   : > { %v1666_v15 = vrot.slane %v1665_v22, 4  ;;  %v1116_v32 = vsel %vm6718_vm7, %v1108_v25, %v1115_v19  ;;  %v1352_v37 = vsel %vm6727_vm8, %v1117_v27, %v1351_v20  ;;  %v630_v33 = vpack.c.bf16 %v598_v28, %v598_v28  ;;  %v1421_v34 = vld [vmem:[#allocation2 + $0x6c] sm:$0xf] }
 0x13e   : > { %1350 = vst.msk [vmem:[#allocation2 + $0x70] sm:$0xf] %vm906_vm1, %v1116_v32  ;;  %v1673_v36 = vshrl.u32 %v1421_v34, 16  ;;  %v1676_v11 = vshll.u32 %v1421_v34, 16  ;;  %v1859_v41 = vunpack.c.l.b16 %v1661_v29  ;;  %v1484_v19 = vshll.u32 %v6976_v14, 16 }
 0x13f   : > { %v1671_v7 = vsel %vm6840_vm15, %v1666_v15, %v1670_v30  ;;  %1353 = vst [vmem:[#allocation2 + $0x74] sm:$0x1] %v1352_v37  ;;  %v1119_v40 = vshrl.u32 %v630_v33, 16  ;;  %v1122_v49 = vshll.u32 %v630_v33, 16  ;;  %v700_v24 = vunpack.c.l.b16 %v630_v33 }
 0x140   : > { %v1860_v43 = vunpack.c.l.b16 %v1671_v7  ;;  %v547_v44 = vpop.f32.mrf.mxu0  ;;  %v1675_v55 = vrot.slane %v1673_v36, 4  ;;  %v1678_v57 = vrot.slane %v1676_v11, 5  ;;  %v1476_v30 = vshll.u32 %v6983_v8, 16 }
 0x141   : > { %v1121_v48 = vrot.slane %v1119_v40, 7  ;;  %v548_v51 = vadd.f32 %v6973_v50, %v547_v44  ;;  %v1464_v11 = vrot.slane %v1463_v10, 4  ;;  %v1474_v59 = vrot.slane %v1473_v21, 4 }
 0x142   : > { %v1883_v53 = vpack.c.b16 %v1860_v43, %v1859_v41  ;;  %v1679_v17 = vor.u32 %v1678_v57, %v1675_v55  ;;  %v1494_v60 = vshrl.u32 %v6795_v52, 16  ;;  %v1483_v10 = vrot.slane %v1481_v16, 4 }
 0x143   : > { %v1124_v63 = vor.u32 %v1122_v49, %v1121_v48  ;;  %v599_v0 = vmax.f32 %v548_v51, 0.0  ;;  %v1125_v33 = vrot.slane %v1121_v48, 4  ;;  %v1478_v49 = vrot.slane %v1476_v30, 5 }
 0x144   : > { %5831 = vmatmul.msk.bf16.gmra.mxu2 %vm736_vm11, %v1883_v53  ;;  %v1680_v7 = vrot.slane %v1679_v17, 4 }
 0x145   : > { %v1355_v56 = vsel %vm6696_vm4, %v1124_v63, %v1354_v54  ;;  %v631_v1 = vpack.c.bf16 %v599_v0, %v599_v0  ;;  %v6291_v2 = vld [vmem:[#allocation2 + $0x6c] sm:$0xff]  ;;  %v1490_v54 = vshll.u32 %v6795_v52, 16  ;;  %v1361_v52 = vld [vmem:[#allocation2 + $0x84] sm:$0xf] }
 0x146   : > { %v1422_v4 = vld [vmem:[#allocation2 + $0x70] sm:$0xf]  ;;  %1356 = vst [vmem:[#allocation2 + $0x78] sm:$0xf] %v1355_v56  ;;  %v1446_v6 = vld [vmem:[#allocation2 + $0x74] sm:$0x1]  ;;  %5916 = vmatmul.msk.bf16.gmra.mxu3 %vm736_vm11, %v6291_v2  ;;  %v1469_v2 = vsel %vm6840_vm15, %v1464_v11, %v6978_v58 }
 0x147   : > { %v1682_v18 = vshll.u32 %v1422_v4, 16  ;;  %v1686_v20 = vshrl.u32 %v1422_v4, 16  ;;  %v1127_v22 = vshrl.u32 %v631_v1, 16  ;;  %v701_v25 = vunpack.c.l.b16 %v631_v1 }
 0x148   : > { %v550_v27 = vpop.f32.mrf.mxu0  ;;  %v1692_v15 = vshll.u32 %v1446_v6, 16  ;;  %v1130_v32 = vshll.u32 %v631_v1, 16  ;;  %v1479_v4 = vsel %vm6840_vm15, %v1474_v59, %v1478_v49  ;;  %v1486_v6 = vrot.slane %v1484_v19, 5 }
 0x149   : > { %v1684_v28 = vrot.slane %v1682_v18, 5  ;;  %v1688_v29 = vrot.slane %v1686_v20, 4  ;;  %v1129_v31 = vrot.slane %v1127_v22, 7  ;;  %v551_v37 = vadd.f32 %v6973_v50, %v550_v27 }
 0x14a   : > { %v723_v34 = vpack.c.b16 %v701_v25, %v700_v24  ;;  %v1694_v47 = vrot.slane %v1692_v15, 5  ;;  %v7011_v25 = vrot.slane %v1490_v54, 5  ;;  %v1496_v27 = vrot.slane %v1494_v60, 4  ;;  %v1365_v54 = vld [vmem:[#allocation2 + $0x8c] sm:$0x1] }
 0x14b   : > { %v1689_v36 = vor.u32 %v1688_v29, %v1684_v28  ;;  %v1132_v40 = vor.u32 %v1130_v32, %v1129_v31  ;;  %v1134_v41 = vrot.slane %v1129_v31, 4  ;;  %v600_v43 = vmax.f32 %v551_v37, 0.0  ;;  %5803 = vmatmul.msk.bf16.gmra.mxu0 %vm736_vm11, %v6787_v39 }
 0x14c   : > { %5810 = vmatmul.msk.bf16.gmra.mxu1 %vm736_vm11, %v723_v34  ;;  %v1685_v44 = vsel %vm6840_vm15, %v1680_v7, %v1684_v28  ;;  %v1843_v58 = vunpack.c.l.b16 %v1469_v2  ;;  %v1844_v15 = vunpack.c.l.b16 %v1479_v4  ;;  %v1487_v32 = vor.u32 %v1486_v6, %v1483_v10 }
 0x14d   : > { %v1690_v45 = vrot.slane %v1689_v36, 4  ;;  %v1133_v51 = vsel %vm6718_vm7, %v1125_v33, %v1132_v40  ;;  %v1359_v48 = vsel %vm6727_vm8, %v1134_v41, %v1358_v35  ;;  %v632_v53 = vpack.c.bf16 %v600_v43, %v600_v43  ;;  %v1423_v14 = vld [vmem:[#allocation2 + $0x78] sm:$0xf] }
 0x14e   : > { %1357 = vst.msk [vmem:[#allocation2 + $0x7c] sm:$0xf] %vm906_vm1, %v1133_v51  ;;  %v1697_v55 = vshrl.u32 %v1423_v14, 16  ;;  %v1700_v57 = vshll.u32 %v1423_v14, 16  ;;  %v1861_v0 = vunpack.c.l.b16 %v1685_v44  ;;  %v1497_v36 = vor.u32 %v1496_v27, %v7011_v25 }
 0x14f   : > { %v1695_v39 = vsel %vm6840_vm15, %v1690_v45, %v1694_v47  ;;  %1360 = vst [vmem:[#allocation2 + $0x80] sm:$0x1] %v1359_v48  ;;  %v1136_v63 = vshrl.u32 %v632_v53, 16  ;;  %v1139_v18 = vshll.u32 %v632_v53, 16  ;;  %v702_v59 = vunpack.c.l.b16 %v632_v53 }
 0x150   : > { %v1862_v56 = vunpack.c.l.b16 %v1695_v39  ;;  %v552_v1 = vpop.f32.mrf.mxu0  ;;  %v1699_v22 = vrot.slane %v1697_v55, 4  ;;  %v1702_v24 = vrot.slane %v1700_v57, 5  ;;  %v1875_v40 = vpack.c.b16 %v1844_v15, %v1843_v58 }
 0x151   : > { %v1138_v17 = vrot.slane %v1136_v63, 7  ;;  %v553_v20 = vadd.f32 %v6973_v50, %v552_v1  ;;  %v1500_v47 = vshll.u32 %v6820_v12, 16  ;;  %v1498_v57 = vrot.slane %v1497_v36, 4 }
 0x152   : > { %v1884_v21 = vpack.c.b16 %v1862_v56, %v1861_v0  ;;  %v1703_v34 = vor.u32 %v1702_v24, %v1699_v22  ;;  %v1488_v2 = vrot.slane %v1487_v32, 4 }
 0x153   : > { %v1141_v28 = vor.u32 %v1139_v18, %v1138_v17  ;;  %v601_v29 = vmax.f32 %v553_v20, 0.0  ;;  %v1142_v60 = vrot.slane %v1138_v17, 4  ;;  %v1502_v17 = vrot.slane %v1500_v47, 5  ;;  %v1407_v20 = vld [vmem:[#allocation2 + $0x18] sm:$0xf] }
 0x154   : > { %5832 = vmatmul.msk.bf16.gmra.mxu2 %vm736_vm11, %v1884_v21  ;;  %v1704_v39 = vrot.slane %v1703_v34, 4 }
 0x155   : > { %v1362_v16 = vsel %vm6696_vm4, %v1141_v28, %v1361_v52  ;;  %v633_v19 = vpack.c.bf16 %v601_v29, %v601_v29  ;;  %v6292_v30 = vld [vmem:[#allocation2 + $0x78] sm:$0xff]  ;;  %v1493_v52 = vsel %vm6840_vm15, %v1488_v2, %v7011_v25  ;;  %v1503_v58 = vsel %vm6840_vm15, %v1498_v57, %v1502_v17 }
 0x156   : > { %v1424_v31 = vld [vmem:[#allocation2 + $0x7c] sm:$0xf]  ;;  %1363 = vst [vmem:[#allocation2 + $0x84] sm:$0xf] %v1362_v16  ;;  %v1447_v37 = vld [vmem:[#allocation2 + $0x80] sm:$0x1]  ;;  %5917 = vmatmul.msk.bf16.gmra.mxu3 %vm736_vm11, %v6292_v30 }
 0x157   : > { %v1706_v35 = vshll.u32 %v1424_v31, 16  ;;  %v1710_v7 = vshrl.u32 %v1424_v31, 16  ;;  %v1144_v11 = vshrl.u32 %v633_v19, 16  ;;  %v703_v33 = vunpack.c.l.b16 %v633_v19 }
 0x158   : > { %v555_v41 = vpop.f32.mrf.mxu0  ;;  %v1716_v45 = vshll.u32 %v1447_v37, 16  ;;  %v1147_v51 = vshll.u32 %v633_v19, 16  ;;  %v1505_v16 = vshrl.u32 %v1407_v20, 16  ;;  %v1508_v19 = vshll.u32 %v1407_v20, 16  ;;  %v1372_v20 = vld [vmem:[#allocation2 + $0x98] sm:$0x1] }
 0x159   : > { %v1708_v43 = vrot.slane %v1706_v35, 5  ;;  %v1712_v44 = vrot.slane %v1710_v7, 4  ;;  %v1146_v49 = vrot.slane %v1144_v11, 7  ;;  %v556_v48 = vadd.f32 %v6973_v50, %v555_v41  ;;  %v1368_v35 = vld [vmem:[#allocation2 + $0x90] sm:$0xf] }
 0x15a   : > { %v724_v14 = vpack.c.b16 %v703_v33, %v702_v59  ;;  %v1718_v1 = vrot.slane %v1716_v45, 5  ;;  %v1514_v30 = vshll.u32 %v6873_v3, 16  ;;  %v1518_v31 = vshrl.u32 %v6873_v3, 16 }
 0x15b   : > { %v1713_v55 = vor.u32 %v1712_v44, %v1708_v43  ;;  %v1149_v63 = vor.u32 %v1147_v51, %v1146_v49  ;;  %v1151_v53 = vrot.slane %v1146_v49, 4  ;;  %v602_v0 = vmax.f32 %v556_v48, 0.0  ;;  %5823 = vmatmul.msk.bf16.vlgmr.msra.gmra.mxu0 %vm736_vm11, %v1875_v40 }
 0x15c   : > { %5811 = vmatmul.msk.bf16.gmra.mxu1 %vm736_vm11, %v724_v14  ;;  %v1709_v12 = vsel %vm6840_vm15, %v1704_v39, %v1708_v43  ;;  %v1846_v33 = vunpack.c.l.b16 %v1503_v58  ;;  %v1845_v40 = vunpack.c.l.b16 %v1493_v52  ;;  %v7040_v41 = vrot.slane %v1514_v30, 5 }
 0x15d   : > { %v1714_v56 = vrot.slane %v1713_v55, 4  ;;  %v1150_v4 = vsel %vm6718_vm7, %v1142_v60, %v1149_v63  ;;  %v1366_v10 = vsel %vm6727_vm8, %v1151_v53, %v1365_v54  ;;  %v634_v6 = vpack.c.bf16 %v602_v0, %v602_v0  ;;  %v1425_v18 = vld [vmem:[#allocation2 + $0x84] sm:$0xf] }
 0x15e   : > { %1364 = vst.msk [vmem:[#allocation2 + $0x88] sm:$0xf] %vm906_vm1, %v1150_v4  ;;  %v1721_v22 = vshrl.u32 %v1425_v18, 16  ;;  %v1724_v24 = vshll.u32 %v1425_v18, 16  ;;  %v1863_v28 = vunpack.c.l.b16 %v1709_v12  ;;  %v1520_v43 = vrot.slane %v1518_v31, 4 }
 0x15f   : > { %v1719_v21 = vsel %vm6840_vm15, %v1714_v56, %v1718_v1  ;;  %1367 = vst [vmem:[#allocation2 + $0x8c] sm:$0x1] %v1366_v10  ;;  %v1153_v27 = vshrl.u32 %v634_v6, 16  ;;  %v1156_v37 = vshll.u32 %v634_v6, 16  ;;  %v1507_v49 = vrot.slane %v1505_v16, 4 }
 0x160   : > { %v1864_v29 = vunpack.c.l.b16 %v1719_v21  ;;  %v557_v15 = vpop.f32.mrf.mxu0  ;;  %v1723_v7 = vrot.slane %v1721_v22, 4  ;;  %v1726_v36 = vrot.slane %v1724_v24, 5  ;;  %v1510_v51 = vrot.slane %v1508_v19, 5 }
 0x161   : > { %v1155_v32 = vrot.slane %v1153_v27, 7  ;;  %v558_v25 = vadd.f32 %v6973_v50, %v557_v15  ;;  %v704_v57 = vunpack.c.l.b16 %v634_v6  ;;  %v1876_v63 = vpack.c.b16 %v1846_v33, %v1845_v40 }
 0x162   : > { %v1885_v34 = vpack.c.b16 %v1864_v29, %v1863_v28  ;;  %v1727_v14 = vor.u32 %v1726_v36, %v1723_v7  ;;  %v1521_v2 = vor.u32 %v1520_v43, %v7040_v41  ;;  %v1511_v6 = vor.u32 %v1510_v51, %v1507_v49  ;;  %v1375_v51 = vld [vmem:[#allocation2 + $0x9c] sm:$0xf] }
 0x163   : > { %v1158_v11 = vor.u32 %v1156_v37, %v1155_v32  ;;  %v603_v59 = vmax.f32 %v558_v25, 0.0  ;;  %v1524_v24 = vshll.u32 %v6876_v13, 16  ;;  %v1159_v27 = vrot.slane %v1155_v32, 4 }
 0x164   : > { %5833 = vmatmul.msk.bf16.gmra.mxu2 %vm736_vm11, %v1885_v34  ;;  %v1728_v52 = vrot.slane %v1727_v14, 4  ;;  %v1522_v30 = vrot.slane %v1521_v2, 4  ;;  %v1512_v43 = vrot.slane %v1511_v6, 4 }
 0x165   : > { %v1369_v3 = vsel %vm6696_vm4, %v1158_v11, %v1368_v35  ;;  %v635_v44 = vpack.c.bf16 %v603_v59, %v603_v59  ;;  %v6293_v45 = vld [vmem:[#allocation2 + $0x84] sm:$0xff]  ;;  %v1526_v34 = vrot.slane %v1524_v24, 5 }
 0x166   : > { %v1426_v47 = vld [vmem:[#allocation2 + $0x88] sm:$0xf]  ;;  %1370 = vst [vmem:[#allocation2 + $0x90] sm:$0xf] %v1369_v3  ;;  %v1448_v48 = vld [vmem:[#allocation2 + $0x8c] sm:$0x1]  ;;  %5918 = vmatmul.msk.bf16.gmra.mxu3 %vm736_vm11, %v6293_v45 }
 0x167   : > { %v1730_v54 = vshll.u32 %v1426_v47, 16  ;;  %v1734_v39 = vshrl.u32 %v1426_v47, 16  ;;  %v1161_v55 = vshrl.u32 %v635_v44, 16  ;;  %v705_v60 = vunpack.c.l.b16 %v635_v44 }
 0x168   : > { %v560_v53 = vpop.f32.mrf.mxu0  ;;  %v1740_v1 = vshll.u32 %v1448_v48, 16  ;;  %v1164_v10 = vshll.u32 %v635_v44, 16  ;;  %v1527_v3 = vsel %vm6840_vm15, %v1522_v30, %v1526_v34 }
 0x169   : > { %v7045_v0 = vpop.f32.mrf.mxu1  ;;  %v1732_v12 = vrot.slane %v1730_v54, 5  ;;  %v1736_v56 = vrot.slane %v1734_v39, 4  ;;  %v1163_v4 = vrot.slane %v1161_v55, 7  ;;  %v561_v17 = vadd.f32 %v6973_v50, %v560_v53  ;;  %v2192_v21 = vpop.f32.mrf.mxu3 }
 0x16a   : > { %8313 = vst [vmem:[#allocation6_spill] sm:$0xff] %v7045_v0  ;;  %v725_v18 = vpack.c.b16 %v705_v60, %v704_v57  ;;  %v1742_v19 = vrot.slane %v1740_v1, 5  ;;  %v1517_v57 = vsel %vm6840_vm15, %v1512_v43, %v7040_v41  ;;  %v1848_v60 = vunpack.c.l.b16 %v1527_v3 }
 0x16b   : > { %v1737_v22 = vor.u32 %v1736_v56, %v1732_v12  ;;  %v1166_v28 = vor.u32 %v1164_v10, %v1163_v4  ;;  %v1168_v29 = vrot.slane %v1163_v4, 4  ;;  %v604_v58 = vmax.f32 %v561_v17, 0.0  ;;  %5824 = vmatmul.msk.bf16.gmra.mxu0 %vm736_vm11, %v1876_v63 }
 0x16c   : > { %5812 = vmatmul.msk.bf16.gmra.mxu1 %vm736_vm11, %v725_v18  ;;  %v1733_v15 = vsel %vm6840_vm15, %v1728_v52, %v1732_v12  ;;  %v1847_v2 = vunpack.c.l.b16 %v1517_v57 }
 0x16d   : > { %v1738_v16 = vrot.slane %v1737_v22, 4  ;;  %v1167_v31 = vsel %vm6718_vm7, %v1159_v27, %v1166_v28  ;;  %v1373_v13 = vsel %vm6727_vm8, %v1168_v29, %v1372_v20  ;;  %v636_v32 = vpack.c.bf16 %v604_v58, %v604_v58  ;;  %v1427_v37 = vld [vmem:[#allocation2 + $0x90] sm:$0xf] }
 0x16e   : > { %1371 = vst.msk [vmem:[#allocation2 + $0x94] sm:$0xf] %vm906_vm1, %v1167_v31  ;;  %v1745_v35 = vshrl.u32 %v1427_v37, 16  ;;  %v1748_v7 = vshll.u32 %v1427_v37, 16  ;;  %v1865_v11 = vunpack.c.l.b16 %v1733_v15  ;;  %v1877_v27 = vpack.c.b16 %v1848_v60, %v1847_v2  ;;  %v1379_v31 = vld [vmem:[#allocation2 + $0xa4] sm:$0x1] }
 0x16f   : > { %v1743_v25 = vsel %vm6840_vm15, %v1738_v16, %v1742_v19  ;;  %1374 = vst [vmem:[#allocation2 + $0x98] sm:$0x1] %v1373_v13  ;;  %v1170_v36 = vshrl.u32 %v636_v32, 16  ;;  %v1173_v45 = vshll.u32 %v636_v32, 16  ;;  %v706_v41 = vunpack.c.l.b16 %v636_v32  ;;  %v1382_v2 = vld [vmem:[#allocation2 + $0xa8] sm:$0xf] }
 0x170   : > { %v1866_v59 = vunpack.c.l.b16 %v1743_v25  ;;  %v562_v33 = vpop.f32.mrf.mxu0  ;;  %v1747_v14 = vrot.slane %v1745_v35, 4  ;;  %v1750_v54 = vrot.slane %v1748_v7, 5 }
 0x171   : > { %v7061_v40 = vpop.f32.mrf.mxu1  ;;  %v1172_v44 = vrot.slane %v1170_v36, 7  ;;  %v563_v47 = vadd.f32 %v6973_v50, %v562_v33  ;;  %v2194_v48 = vpop.f32.mrf.mxu3 }
 0x172   : > { %8314 = vst [vmem:[#allocation7_spill] sm:$0xff] %v7061_v40  ;;  %v1886_v49 = vpack.c.b16 %v1866_v59, %v1865_v11  ;;  %v1751_v10 = vor.u32 %v1750_v54, %v1747_v14 }
 0x173   : > { %v1175_v39 = vor.u32 %v1173_v45, %v1172_v44  ;;  %v605_v55 = vmax.f32 %v563_v47, 0.0  ;;  %v1176_v25 = vrot.slane %v1172_v44, 4 }
 0x174   : > { %5834 = vmatmul.msk.bf16.gmra.mxu2 %vm736_vm11, %v1886_v49 }
 0x175   : > { %v1376_v63 = vsel %vm6696_vm4, %v1175_v39, %v1375_v51  ;;  %v637_v53 = vpack.c.bf16 %v605_v55, %v605_v55  ;;  %v6294_v12 = vld [vmem:[#allocation2 + $0x90] sm:$0xff] }
 0x176   : > { %v1428_v56 = vld [vmem:[#allocation2 + $0x94] sm:$0xf]  ;;  %1377 = vst [vmem:[#allocation2 + $0x9c] sm:$0xf] %v1376_v63  ;;  %v1449_v4 = vld [vmem:[#allocation2 + $0x98] sm:$0x1]  ;;  %5919 = vmatmul.msk.bf16.gmra.mxu3 %vm736_vm11, %v6294_v12 }
 0x177   : > { %v1969_v1 = vpop.f32.mrf.mxu2  ;;  %v1754_v17 = vshll.u32 %v1428_v56, 16  ;;  %v1758_v18 = vshrl.u32 %v1428_v56, 16  ;;  %v1178_v20 = vshrl.u32 %v637_v53, 16  ;;  %v707_v22 = vunpack.c.l.b16 %v637_v53 }
 0x178   : > { %v7072_v52 = vadd.f32 %v2192_v21, %v1969_v1  ;;  %v565_v6 = vpop.f32.mrf.mxu0  ;;  %v1764_v58 = vshll.u32 %v1449_v4, 16  ;;  %v1181_v16 = vshll.u32 %v637_v53, 16  ;;  %v1752_v21 = vrot.slane %v1751_v10, 4 }
 0x179   : > { %v7075_v24 = vpop.f32.mrf.mxu1  ;;  %v1756_v28 = vrot.slane %v1754_v17, 5  ;;  %v1760_v29 = vrot.slane %v1758_v18, 4  ;;  %v1180_v15 = vrot.slane %v1178_v20, 7  ;;  %v566_v19 = vadd.f32 %v6973_v50, %v565_v6  ;;  %v2197_v13 = vpop.f32.mrf.mxu3 }
 0x17a   : > { %8315 = vst [vmem:[#allocation8_spill] sm:$0xff] %v7075_v24  ;;  %v726_v30 = vpack.c.b16 %v707_v22, %v706_v41  ;;  %v1766_v11 = vrot.slane %v1764_v58, 5  ;;  %v6306_v24 = vld [vmem:[#allocation2 + $0x48] sm:$0xff] }
 0x17b   : > { %v1761_v37 = vor.u32 %v1760_v29, %v1756_v28  ;;  %v1183_v34 = vor.u32 %v1181_v16, %v1180_v15  ;;  %v1185_v32 = vrot.slane %v1180_v15, 4  ;;  %v606_v35 = vmax.f32 %v566_v19, 0.0  ;;  %5825 = vmatmul.msk.bf16.gmra.mxu0 %vm736_vm11, %v1877_v27 }
 0x17c   : > { %5813 = vmatmul.msk.bf16.gmra.mxu1 %vm736_vm11, %v726_v30  ;;  %v1757_v7 = vsel %vm6840_vm15, %v1752_v21, %v1756_v28  ;;  %v6282_v30 = vld [vmem:[#allocation2] sm:$0xff] }
 0x17d   : > { %v1762_v36 = vrot.slane %v1761_v37, 4  ;;  %v1184_v59 = vsel %vm6718_vm7, %v1176_v25, %v1183_v34  ;;  %v1380_v33 = vsel %vm6727_vm8, %v1185_v32, %v1379_v31  ;;  %v638_v43 = vpack.c.bf16 %v606_v35, %v606_v35  ;;  %v1429_v3 = vld [vmem:[#allocation2 + $0x9c] sm:$0xf] }
 0x17e   : > { %1378 = vst.msk [vmem:[#allocation2 + $0xa0] sm:$0xf] %vm906_vm1, %v1184_v59  ;;  %v1769_v47 = vshrl.u32 %v1429_v3, 16  ;;  %v1772_v49 = vshll.u32 %v1429_v3, 16  ;;  %v1867_v54 = vunpack.c.l.b16 %v1757_v7 }
 0x17f   : > { %v1971_v44 = vpop.f32.mrf.mxu2  ;;  %v1767_v45 = vsel %vm6840_vm15, %v1762_v36, %v1766_v11  ;;  %1381 = vst [vmem:[#allocation2 + $0xa4] sm:$0x1] %v1380_v33  ;;  %v1187_v51 = vshrl.u32 %v638_v43, 16  ;;  %v1190_v12 = vshll.u32 %v638_v43, 16  ;;  %v708_v16 = vunpack.c.l.b16 %v638_v43 }
 0x180   : > { %v7089_v14 = vadd.f32 %v2194_v48, %v1971_v44  ;;  %v1868_v39 = vunpack.c.l.b16 %v1767_v45  ;;  %v567_v55 = vpop.f32.mrf.mxu0  ;;  %v1771_v60 = vrot.slane %v1769_v47, 4  ;;  %v1774_v63 = vrot.slane %v1772_v49, 5 }
 0x181   : > { %v7091_v57 = vpop.f32.mrf.mxu1  ;;  %v1189_v53 = vrot.slane %v1187_v51, 7  ;;  %v568_v56 = vadd.f32 %v6973_v50, %v567_v55  ;;  %v2199_v4 = vpop.f32.mrf.mxu3 }
 0x182   : > { %8316 = vst [vmem:[#allocation9_spill] sm:$0xff] %v7091_v57  ;;  %v1887_v1 = vpack.c.b16 %v1868_v39, %v1867_v54  ;;  %v1775_v48 = vor.u32 %v1774_v63, %v1771_v60 }
 0x183   : > { %v1192_v10 = vor.u32 %v1190_v12, %v1189_v53  ;;  %v607_v17 = vmax.f32 %v568_v56, 0.0  ;;  %v1193_v59 = vrot.slane %v1189_v53, 4 }
 0x184   : > { %5835 = vmatmul.msk.bf16.gmra.mxu2 %vm736_vm11, %v1887_v1  ;;  %v1776_v37 = vrot.slane %v1775_v48, 4 }
 0x185   : > { %v1383_v18 = vsel %vm6696_vm4, %v1192_v10, %v1382_v2  ;;  %v639_v20 = vpack.c.bf16 %v607_v17, %v607_v17  ;;  %v6295_v41 = vld [vmem:[#allocation2 + $0x9c] sm:$0xff] }
 0x186   : > { %v1430_v22 = vld [vmem:[#allocation2 + $0xa0] sm:$0xf]  ;;  %1384 = vst [vmem:[#allocation2 + $0xa8] sm:$0xf] %v1383_v18  ;;  %v1450_v27 = vld [vmem:[#allocation2 + $0xa4] sm:$0x1]  ;;  %5920 = vmatmul.msk.bf16.gmra.mxu3 %vm736_vm11, %v6295_v41 }
 0x187   : > { %v1974_v6 = vpop.f32.mrf.mxu2  ;;  %v1778_v28 = vshll.u32 %v1430_v22, 16  ;;  %v1782_v29 = vshrl.u32 %v1430_v22, 16  ;;  %v1195_v58 = vshrl.u32 %v639_v20, 16  ;;  %v709_v19 = vunpack.c.l.b16 %v639_v20 }
 0x188   : > { %v7097_v15 = vadd.f32 %v2197_v13, %v1974_v6  ;;  %v570_v31 = vpop.f32.mrf.mxu0  ;;  %v1788_v32 = vshll.u32 %v1450_v27, 16  ;;  %v1198_v7 = vshll.u32 %v639_v20, 16  ;;  %v1386_v13 = vld [vmem:[#allocation2 + $0xb0] sm:$0x1]  ;;  %v1389_v27 = vld [vmem:[#allocation2 + $0xb4] sm:$0xf] }
 0x189   : > { %v7100_v21 = vpop.f32.mrf.mxu1  ;;  %v1780_v25 = vrot.slane %v1778_v28, 5  ;;  %v1784_v34 = vrot.slane %v1782_v29, 4  ;;  %v1197_v35 = vrot.slane %v1195_v58, 7  ;;  %v571_v36 = vadd.f32 %v6973_v50, %v570_v31  ;;  %v2202_v33 = vpop.f32.mrf.mxu3 }
 0x18a   : > { %8317 = vst [vmem:[#allocation10_spill] sm:$0xff] %v7100_v21  ;;  %v727_v11 = vpack.c.b16 %v709_v19, %v708_v16  ;;  %v1790_v51 = vrot.slane %v1788_v32, 5 }
 0x18b   : > { %v1785_v3 = vor.u32 %v1784_v34, %v1780_v25  ;;  %v1200_v44 = vor.u32 %v1198_v7, %v1197_v35  ;;  %v1202_v43 = vrot.slane %v1197_v35, 4  ;;  %v608_v45 = vmax.f32 %v571_v36, 0.0  ;;  %5907 = vmatmul.msk.bf16.vlgmr.msrb.gmra.mxu0 %vm736_vm11, %v6282_v30 }
 0x18c   : > { %5814 = vmatmul.msk.bf16.gmra.mxu1 %vm736_vm11, %v727_v11  ;;  %v1781_v47 = vsel %vm6840_vm15, %v1776_v37, %v1780_v25 }
 0x18d   : > { %v1786_v49 = vrot.slane %v1785_v3, 4  ;;  %v1201_v54 = vsel %vm6718_vm7, %v1193_v59, %v1200_v44  ;;  %v1387_v39 = vsel %vm6727_vm8, %v1202_v43, %v1386_v13  ;;  %v640_v55 = vpack.c.bf16 %v608_v45, %v608_v45  ;;  %v1431_v60 = vld [vmem:[#allocation2 + $0xa8] sm:$0xf]  ;;  %v2936_v3 = vld [vmem:[#allocation2 + $0xc] sm:$0xf] }
 0x18e   : > { %1385 = vst.msk [vmem:[#allocation2 + $0xac] sm:$0xf] %vm906_vm1, %v1201_v54  ;;  %v1869_v12 = vunpack.c.l.b16 %v1781_v47  ;;  %v1793_v56 = vshrl.u32 %v1431_v60, 16  ;;  %v1796_v17 = vshll.u32 %v1431_v60, 16  ;;  %v6283_v60 = vld [vmem:[#allocation2 + $0xc] sm:$0xff] }
 0x18f   : > { %v1976_v63 = vpop.f32.mrf.mxu2  ;;  %v1791_v53 = vsel %vm6840_vm15, %v1786_v49, %v1790_v51  ;;  %1388 = vst [vmem:[#allocation2 + $0xb0] sm:$0x1] %v1387_v39  ;;  %v1204_v1 = vshrl.u32 %v640_v55, 16  ;;  %v1207_v41 = vshll.u32 %v640_v55, 16  ;;  %v710_v34 = vunpack.c.l.b16 %v640_v55 }
 0x190   : > { %v7114_v2 = vadd.f32 %v2199_v4, %v1976_v63  ;;  %v1870_v10 = vunpack.c.l.b16 %v1791_v53  ;;  %v572_v48 = vpop.f32.mrf.mxu0  ;;  %v1795_v16 = vrot.slane %v1793_v56, 4  ;;  %v1798_v4 = vrot.slane %v1796_v17, 5  ;;  %v7130_v63 = vld [vmem:[#allocation2 + $0x10] sm:$0xf]  ;;  %v1393_v53 = vld [vmem:[#allocation2 + $0xbc] sm:$0x1] }
 0x191   : > { %v7116_v18 = vpop.f32.mrf.mxu1  ;;  %v1206_v20 = vrot.slane %v1204_v1, 7  ;;  %v573_v22 = vadd.f32 %v6973_v50, %v572_v48  ;;  %v7119_v28 = vpop.f32.mrf.mxu3  ;;  %v2985_v1 = vshrl.u32 %v2936_v3, 16 }
 0x192   : > { %8318 = vst [vmem:[#allocation11_spill] sm:$0xff] %v7116_v18  ;;  %v1888_v6 = vpack.c.b16 %v1870_v10, %v1869_v12  ;;  %v1799_v13 = vor.u32 %v1798_v4, %v1795_v16 }
 0x193   : > { %v1209_v29 = vor.u32 %v1207_v41, %v1206_v20  ;;  %v609_v58 = vmax.f32 %v573_v22, 0.0  ;;  %v6319_v22 = vld [vmem:[%s8298_s5 + $0x28] sm:$0xff] }
 0x194   : > { %5836 = vmatmul.msk.bf16.gmra.mxu2 %vm736_vm11, %v1888_v6  ;;  %v1800_v41 = vrot.slane %v1799_v13, 4  ;;  %3882 = vmatpush.bf16.msra.mxu0 %v6319_v22 }
 0x195   : > { %v1390_v19 = vsel %vm6696_vm4, %v1209_v29, %v1389_v27  ;;  %v641_v30 = vpack.c.bf16 %v609_v58, %v609_v58  ;;  %v6296_v31 = vld [vmem:[#allocation2 + $0xa8] sm:$0xff]  ;;  %v2994_v29 = vshll.u32 %v7130_v63, 16 }
 0x196   : > { %v1432_v37 = vld [vmem:[#allocation2 + $0xac] sm:$0xf]  ;;  %1391 = vst [vmem:[#allocation2 + $0xb4] sm:$0xf] %v1390_v19  ;;  %v1451_v32 = vld [vmem:[#allocation2 + $0xb0] sm:$0x1]  ;;  %5921 = vmatmul.msk.bf16.gmra.mxu3 %vm736_vm11, %v6296_v31 }
 0x197   : > { %v1979_v25 = vpop.f32.mrf.mxu2  ;;  %v1802_v35 = vshll.u32 %v1432_v37, 16  ;;  %v1806_v7 = vshrl.u32 %v1432_v37, 16  ;;  %v1212_v36 = vshrl.u32 %v641_v30, 16  ;;  %v711_v59 = vunpack.c.l.b16 %v641_v30 }
 0x198   : > { %v7124_v11 = vadd.f32 %v2202_v33, %v1979_v25  ;;  %v575_v44 = vpop.f32.mrf.mxu0  ;;  %v1812_v49 = vshll.u32 %v1451_v32, 16  ;;  %v1215_v54 = vshll.u32 %v641_v30, 16  ;;  %v1210_v33 = vrot.slane %v1206_v20, 4 }
 0x199   : > { %v7127_v43 = vpop.f32.mrf.mxu1  ;;  %v1804_v45 = vrot.slane %v1802_v35, 5  ;;  %v1808_v47 = vrot.slane %v1806_v7, 4  ;;  %v1214_v51 = vrot.slane %v1212_v36, 7  ;;  %v576_v39 = vadd.f32 %v6973_v50, %v575_v44  ;;  %v7132_v12 = vpop.f32.mrf.mxu3 }
 0x19a   : > { %8319 = vst [vmem:[#allocation12_spill] sm:$0xff] %v7127_v43  ;;  %v728_v55 = vpack.c.b16 %v711_v59, %v710_v34  ;;  %v1814_v27 = vrot.slane %v1812_v49, 5  ;;  %v2988_v20 = vshll.u32 %v2936_v3, 16  ;;  %v2998_v32 = vshrl.u32 %v7130_v63, 16  ;;  %v6304_v43 = vld [vmem:[#allocation2 + $0x30] sm:$0xff] }
 0x19b   : > { %v1809_v56 = vor.u32 %v1808_v47, %v1804_v45  ;;  %v1217_v10 = vor.u32 %v1215_v54, %v1214_v51  ;;  %v1219_v17 = vrot.slane %v1214_v51, 4  ;;  %v610_v48 = vmax.f32 %v576_v39, 0.0  ;;  %5908 = vmatmul.msk.bf16.gmra.mxu0 %vm736_vm11, %v6283_v60  ;;  %v7166_v54 = vld [vmem:[#allocation2 + $0x14] sm:$0x1] }
 0x19c   : > { %5815 = vmatmul.msk.bf16.gmra.mxu1 %vm736_vm11, %v728_v55  ;;  %v1805_v19 = vsel %vm6840_vm15, %v1800_v41, %v1804_v45  ;;  %v7159_v45 = vrot.slane %v2985_v1, 4  ;;  %v7161_v47 = vrot.slane %v2988_v20, 5  ;;  %v7168_v39 = vrot.slane %v2994_v29, 5  ;;  %v1396_v55 = vld [vmem:[#allocation2 + $0xc0] sm:$0xf] }
 0x19d   : > { %v1810_v6 = vrot.slane %v1809_v56, 4  ;;  %v1218_v58 = vsel %vm6718_vm7, %v1210_v33, %v1217_v10  ;;  %v1394_v16 = vsel %vm6727_vm8, %v1219_v17, %v1393_v53  ;;  %v7144_v4 = vpack.c.bf16 %v610_v48, %v610_v48  ;;  %v1433_v30 = vld [vmem:[#allocation2 + $0xb4] sm:$0xf]  ;;  %v6338_v48 = vld [vmem:[%s8298_s5 + $0x40] sm:$0xff] }
 0x19e   : > { %1392 = vst.msk [vmem:[#allocation2 + $0xb8] sm:$0xf] %vm906_vm1, %v1218_v58  ;;  %v1817_v25 = vshrl.u32 %v1433_v30, 16  ;;  %v1820_v34 = vshll.u32 %v1433_v30, 16  ;;  %v1871_v3 = vunpack.c.l.b16 %v1805_v19  ;;  %v3000_v56 = vrot.slane %v2998_v32, 4  ;;  %5233 = vmatpush.bf16.msra.mxu3 %v6338_v48  ;;  %v6336_v32 = vld [vmem:[%s8298_s5 + $0x30] sm:$0xff] }
 0x19f   : > { %v1981_v31 = vpop.f32.mrf.mxu2  ;;  %v1815_v37 = vsel %vm6840_vm15, %v1810_v6, %v1814_v27  ;;  %1395 = vst [vmem:[#allocation2 + $0xbc] sm:$0x1] %v1394_v16  ;;  %v1221_v35 = vshrl.u32 %v7144_v4, 16  ;;  %v1224_v7 = vshll.u32 %v7144_v4, 16  ;;  %v2991_v17 = vor.u32 %v7161_v47, %v7159_v45  ;;  %v2257_v45 = vld [vmem:[#allocation2] sm:$0xe]  ;;  %4173 = vmatpush.bf16.msra.mxu1 %v6336_v32 }
 0x1a0   : > { %v7155_v36 = vadd.f32 %v7119_v28, %v1981_v31  ;;  %v577_v59 = vpop.f32.mrf.mxu0  ;;  %v1872_v44 = vunpack.c.l.b16 %v1815_v37  ;;  %v1819_v33 = vrot.slane %v1817_v25, 4  ;;  %v1822_v53 = vrot.slane %v1820_v34, 5  ;;  %v3594_v32 = vld [vmem:[#allocation2 + $0xc] sm:$0xe] }
 0x1a1   : > { %v7157_v13 = vpop.f32.mrf.mxu1  ;;  %v7163_v49 = vrot.slane %v1221_v35, 7  ;;  %v578_v51 = vadd.f32 %v6973_v50, %v577_v59  ;;  %v7170_v60 = vpop.f32.mrf.mxu3  ;;  %v6337_v50 = vld [vmem:[%s8298_s5 + $0x38] sm:$0xff]  ;;  %v712_v41 = vunpack.c.l.b16 %v7144_v4  ;;  %v3004_v29 = vshll.u32 %v7166_v54, 16 }
 0x1a2   : > { %8320 = vst [vmem:[#allocation13_spill] sm:$0xff] %v7157_v13  ;;  %v1889_v28 = vpack.c.b16 %v1872_v44, %v1871_v3  ;;  %v1823_v19 = vor.u32 %v1822_v53, %v1819_v33  ;;  %v3001_v37 = vor.u32 %v3000_v56, %v7168_v39  ;;  %4831 = vmatpush.bf16.msra.mxu2 %v6337_v50  ;;  %v2310_v47 = vrot.slane %v6954_v23, 5  ;;  %v1400_v53 = vld [vmem:[#allocation2 + $0xc8] sm:$0x1] }
 0x1a3   : > { %v1226_v1 = vor.u32 %v1224_v7, %v7163_v49  ;;  %v611_v10 = vmax.f32 %v578_v51, 0.0  ;;  %v1227_v51 = vrot.slane %v7163_v49, 4  ;;  %v3660_v33 = vrot.slane %v7130_v63, 5 }
 0x1a4   : > { %5837 = vmatmul.msk.bf16.gmra.mxu2 %vm736_vm11, %v1889_v28  ;;  %v6284_v28 = vld [vmem:[#allocation2 + $0x18] sm:$0xff]  ;;  %v3002_v50 = vrot.slane %v3001_v37, 4  ;;  %v3006_v48 = vrot.slane %v3004_v29, 5  ;;  %v5923_v23 = vrot.slane %v2257_v45, 9  ;;  %v2313_v49 = vrot.slane %v6983_v8, 5 }
 0x1a5   : > { %v1397_v22 = vsel %vm6696_vm4, %v1226_v1, %v1396_v55  ;;  %v643_v6 = vpack.c.bf16 %v611_v10, %v611_v10  ;;  %v6297_v27 = vld [vmem:[#allocation2 + $0xb4] sm:$0xff]  ;;  %v1824_v1 = vrot.slane %v1823_v19, 4  ;;  %v2992_v19 = vrot.slane %v2991_v17, 4 }
 0x1a6   : > { %v1434_v20 = vld [vmem:[#allocation2 + $0xb8] sm:$0xf]  ;;  %1398 = vst [vmem:[#allocation2 + $0xc0] sm:$0xf] %v1397_v22  ;;  %v1452_v16 = vld [vmem:[#allocation2 + $0xbc] sm:$0x1]  ;;  %5922 = vmatmul.msk.bf16.gmra.mxu3 %vm736_vm11, %v6297_v27  ;;  %v3007_v37 = vsel %vm6840_vm15, %v3002_v50, %v3006_v48 }
 0x1a7   : > { %v1984_v58 = vpop.f32.mrf.mxu2  ;;  %v1826_v30 = vshll.u32 %v1434_v20, 16  ;;  %v1830_v31 = vshrl.u32 %v1434_v20, 16  ;;  %v713_v25 = vunpack.c.l.b16 %v643_v6  ;;  %v1229_v4 = vshrl.u32 %v643_v6, 16 }
 0x1a8   : > { %v1232_v34 = vshll.u32 %v643_v6, 16  ;;  %v7188_v26 = vadd.f32 %v7132_v12, %v1984_v58  ;;  %v7194_v35 = vpop.f32.mrf.mxu0  ;;  %v1836_v44 = vshll.u32 %v1452_v16, 16  ;;  %v2312_v58 = vrot.slane %v2310_v47, 4 }
 0x1a9   : > { %8321 = vst [vmem:[#allocation14_spill] sm:$0xff] %v7194_v35  ;;  %v7196_v7 = vpop.f32.mrf.mxu1  ;;  %v1828_v59 = vrot.slane %v1826_v30, 5  ;;  %v1832_v3 = vrot.slane %v1830_v31, 4  ;;  %v1231_v12 = vrot.slane %v1229_v4, 7  ;;  %v729_v55 = vpack.c.b16 %v713_v25, %v712_v41  ;;  %v2212_v56 = vpop.f32.mrf.mxu3  ;;  %v7204_v41 = vld [vmem:[#allocation2 + $0x1c] sm:$0xf] }
 0x1aa   : > { %8322 = vst [vmem:[#allocation15_spill] sm:$0xff] %v7196_v7  ;;  %v1838_v20 = vrot.slane %v1836_v44, 5  ;;  %v3662_v30 = vrot.slane %v3660_v33, 4  ;;  %v2939_v25 = vld [vmem:[#allocation2 + $0x18] sm:$0xf]  ;;  %v3018_v4 = vshll.u32 %v7204_v41, 16  ;;  %v2997_v44 = vsel %vm6840_vm15, %v2992_v19, %v7168_v39 }
 0x1ab   : > { %v1833_v10 = vor.u32 %v1832_v3, %v1828_v59  ;;  %v1234_v22 = vor.u32 %v1232_v34, %v1231_v12  ;;  %v1236_v6 = vrot.slane %v1231_v12, 4  ;;  %5909 = vmatmul.msk.bf16.gmra.mxu0 %vm736_vm11, %v6284_v28  ;;  %v1829_v63 = vsel %vm6840_vm15, %v1824_v1, %v1828_v59 }
 0x1ac   : > { %5816 = vmatmul.msk.bf16.gmra.mxu1 %vm736_vm11, %v729_v55  ;;  %v3022_v38 = vshrl.u32 %v7204_v41, 16  ;;  %v1873_v17 = vunpack.c.l.b16 %v1829_v63  ;;  %v3663_v45 = vrot.slane %v7166_v54, 5  ;;  %v3372_v55 = vunpack.c.l.b16 %v3007_v37  ;;  %v2941_v63 = vld [vmem:[#allocation2 + $0x20] sm:$0x1] }
 0x1ad   : > { %v1834_v27 = vrot.slane %v1833_v10, 4  ;;  %v1235_v29 = vsel %vm6718_vm7, %v1227_v51, %v1234_v22  ;;  %v1401_v16 = vsel %vm6727_vm8, %v1236_v6, %v1400_v53  ;;  %v2311_v51 = vsel %vm6812_vm14, %v5923_v23, %v2310_v47 }
 0x1ae   : > { %1399 = vst.msk [vmem:[#allocation2 + $0xc4] sm:$0xf] %vm906_vm1, %v1235_v29  ;;  %v3009_v28 = vshrl.u32 %v2939_v25, 16  ;;  %v3012_v53 = vshll.u32 %v2939_v25, 16  ;;  %v6069_v10 = vrot.slane %v3594_v32, 9  ;;  %v3664_v50 = vsel %vm6812_vm14, %v3662_v30, %v3663_v45 }
 0x1af   : > { %v1986_v31 = vpop.f32.mrf.mxu2  ;;  %v1839_v8 = vsel %vm6840_vm15, %v1834_v27, %v1838_v20  ;;  %1402 = vst [vmem:[#allocation2 + $0xc8] sm:$0x1] %v1401_v16  ;;  %v3020_v48 = vrot.slane %v3018_v4, 5  ;;  %v3024_v22 = vrot.slane %v3022_v38, 4  ;;  %v3371_v39 = vunpack.c.l.b16 %v2997_v44 }
 0x1b0   : > { %v7220_v42 = vadd.f32 %v7170_v60, %v1986_v31  ;;  %v1874_v34 = vunpack.c.l.b16 %v1839_v8  ;;  %v7222_v59 = vpop.f32.mrf.mxu0  ;;  %v2314_v60 = vsel %vm6812_vm14, %v2312_v58, %v2313_v49  ;;  %v2423_v6 = vunpack.c.l.b16 %v2311_v51 }
 0x1b1   : > { %8323 = vst [vmem:[#allocation16_spill] sm:$0xff] %v7222_v59  ;;  %v7224_v3 = vpop.f32.mrf.mxu1  ;;  %v2214_v1 = vpop.f32.mrf.mxu3  ;;  %v2424_v54 = vunpack.c.l.b16 %v2314_v60  ;;  %v3661_v47 = vsel %vm6812_vm14, %v6069_v10, %v3660_v33  ;;  %v3403_v23 = vpack.c.b16 %v3372_v55, %v3371_v39  ;;  %v3774_v49 = vunpack.c.l.b16 %v3664_v50  ;;  %v2942_v60 = vld [vmem:[#allocation2 + $0x24] sm:$0xf] }
 0x1b2   : > { %8324 = vst [vmem:[#allocation17_spill] sm:$0xff] %v7224_v3  ;;  %v1890_v12 = vpack.c.b16 %v1874_v34, %v1873_v17  ;;  %v3011_v27 = vrot.slane %v3009_v28, 4  ;;  %v3014_v20 = vrot.slane %v3012_v53, 5  ;;  %v3025_v29 = vor.u32 %v3024_v22, %v3020_v48 }
 0x1b3   : > { %v2455_v19 = vpack.c.b16 %v2424_v54, %v2423_v6  ;;  %v3773_v30 = vunpack.c.l.b16 %v3661_v47  ;;  %v3028_v37 = vshll.u32 %v2941_v63, 16  ;;  %v3667_v17 = vrot.slane %v7204_v41, 5  ;;  %v3595_v41 = vld [vmem:[#allocation2 + $0x18] sm:$0xe] }
 0x1b4   : > { %5838 = vmatmul.msk.bf16.gmra.mxu2 %vm736_vm11, %v1890_v12  ;;  %v3015_v33 = vor.u32 %v3014_v20, %v3011_v27  ;;  %v3026_v38 = vrot.slane %v3025_v29, 4  ;;  %v3670_v22 = vrot.slane %v2941_v63, 5  ;;  %v3033_v6 = vshrl.u32 %v2942_v60, 16  ;;  %v2944_v63 = vld [vmem:[#allocation2 + $0x2c] sm:$0x1] }
 0x1b5   : > { %v3805_v25 = vpack.c.b16 %v3774_v49, %v3773_v30  ;;  %v3030_v34 = vrot.slane %v3028_v37, 5  ;;  %v3669_v51 = vrot.slane %v3667_v17, 4  ;;  %v3036_v54 = vshll.u32 %v2942_v60, 16 }
 0x1b6   : > { %6053 = vmatmul.msk.bf16.vlgmr.msrb.gmra.mxu3 %vm736_vm11, %v3403_v23  ;;  %v3016_v32 = vrot.slane %v3015_v33, 4  ;;  %v6301_v23 = vld [vmem:[#allocation2 + $0xc] sm:$0xff]  ;;  %v6070_v49 = vrot.slane %v3595_v41, 9  ;;  %v3035_v30 = vrot.slane %v3033_v6, 4 }
 0x1b7   : > { %v1989_v58 = vpop.f32.mrf.mxu2  ;;  %v3031_v45 = vsel %vm6840_vm15, %v3026_v38, %v3030_v34  ;;  %v3671_v27 = vsel %vm6812_vm14, %v3669_v51, %v3670_v22  ;;  %v3038_v37 = vrot.slane %v3036_v54, 5  ;;  %v2945_v54 = vld [vmem:[#allocation2 + $0x30] sm:$0xf] }
 0x1b8   : > { %v7239_v16 = vadd.f32 %v2212_v56, %v1989_v58  ;;  %v7242_v31 = vpop.f32.mrf.mxu0  ;;  %v7249_v56 = vld [vmem:[#allocation2 + $0x28] sm:$0xf]  ;;  %v3021_v50 = vsel %vm6840_vm15, %v3016_v32, %v3020_v48  ;;  %v3374_v39 = vunpack.c.l.b16 %v3031_v45  ;;  %v3668_v29 = vsel %vm6812_vm14, %v6070_v49, %v3667_v17 }
 0x1b9   : > { %8325 = vst [vmem:[#allocation18_spill] sm:$0xff] %v7242_v31  ;;  %v7244_v8 = vpop.f32.mrf.mxu1  ;;  %v2217_v4 = vpop.f32.mrf.mxu3  ;;  %v3042_v12 = vshll.u32 %v7249_v56, 16  ;;  %v3046_v55 = vshrl.u32 %v7249_v56, 16  ;;  %v3373_v58 = vunpack.c.l.b16 %v3021_v50  ;;  %v3776_v48 = vunpack.c.l.b16 %v3671_v27  ;;  %v3596_v27 = vld [vmem:[#allocation2 + $0x24] sm:$0xe] }
 0x1ba   : > { %8326 = vst [vmem:[#allocation19_spill] sm:$0xff] %v7244_v8  ;;  %v3775_v34 = vunpack.c.l.b16 %v3668_v29  ;;  %v3052_v45 = vshll.u32 %v2944_v63, 16  ;;  %v3039_v60 = vor.u32 %v3038_v37, %v3035_v30  ;;  %v3677_v29 = vrot.slane %v2944_v63, 5  ;;  %v2947_v63 = vld [vmem:[#allocation2 + $0x38] sm:$0x1] }
 0x1bb   : > { %6091 = vmatmul.msk.bf16.vlgmr.msra.gmra.mxu0 %vm736_vm11, %v3805_v25  ;;  %v3048_v20 = vrot.slane %v3046_v55, 4  ;;  %v3674_v55 = vrot.slane %v7249_v56, 5  ;;  %v3060_v30 = vshll.u32 %v2945_v54, 16 }
 0x1bc   : > { %5945 = vmatmul.msk.bf16.vlgmr.msrb.gmra.mxu1 %vm736_vm11, %v2455_v19  ;;  %v3404_v19 = vpack.c.b16 %v3374_v39, %v3373_v58  ;;  %v3806_v51 = vpack.c.b16 %v3776_v48, %v3775_v34  ;;  %v3054_v41 = vrot.slane %v3052_v45, 5  ;;  %v3040_v50 = vrot.slane %v3039_v60, 4 }
 0x1bd   : > { %v3676_v6 = vrot.slane %v3674_v55, 4  ;;  %v3057_v48 = vshrl.u32 %v2945_v54, 16 }
 0x1bf   : > { %v1991_v44 = vpop.f32.mrf.mxu2  ;;  %v3678_v34 = vsel %vm6812_vm14, %v3676_v6, %v3677_v29 }
 0x1c0   : > { %v7255_v28 = vadd.f32 %v2214_v1, %v1991_v44  ;;  %v7257_v53 = vpop.f32.mrf.mxu0  ;;  %v3044_v1 = vrot.slane %v3042_v12, 5 }
 0x1c1   : > { %8327 = vst [vmem:[#allocation20_spill] sm:$0xff] %v7257_v53  ;;  %v7259_v10 = vpop.f32.mrf.mxu1  ;;  %v2219_v47 = vpop.f32.mrf.mxu3 }
 0x1c2   : > { %8328 = vst [vmem:[#allocation21_spill] sm:$0xff] %v7259_v10  ;;  %v3049_v33 = vor.u32 %v3048_v20, %v3044_v1  ;;  %v3045_v58 = vsel %vm6840_vm15, %v3040_v50, %v3044_v1  ;;  %v3778_v1 = vunpack.c.l.b16 %v3678_v34  ;;  %v3062_v50 = vrot.slane %v3060_v30, 5 }
 0x1c4   : > { %6031 = vmatmul.msk.bf16.vlgmr.msrb.gmra.mxu2 %vm736_vm11, %v6301_v23  ;;  %v3050_v12 = vrot.slane %v3049_v33, 4  ;;  %v6071_v33 = vrot.slane %v3596_v27, 9  ;;  %v3076_v27 = vshll.u32 %v2947_v63, 16 }
 0x1c6   : > { %6054 = vmatmul.msk.bf16.gmra.mxu3 %vm736_vm11, %v3404_v19  ;;  %v3055_v39 = vsel %vm6840_vm15, %v3050_v12, %v3054_v41  ;;  %v3675_v60 = vsel %vm6812_vm14, %v6071_v33, %v3674_v55  ;;  %v3059_v41 = vrot.slane %v3057_v48, 4  ;;  %v3078_v48 = vrot.slane %v3076_v27, 5 }
 0x1c7   : > { %v1994_v25 = vpop.f32.mrf.mxu2  ;;  %v3376_v19 = vunpack.c.l.b16 %v3055_v39  ;;  %v3777_v6 = vunpack.c.l.b16 %v3675_v60 }
 0x1c8   : > { %v7268_v38 = vadd.f32 %v2217_v4, %v1994_v25  ;;  %v7271_v32 = vpop.f32.mrf.mxu0  ;;  %v7279_v4 = vld [vmem:[#allocation2 + $0x34] sm:$0xf]  ;;  %v6302_v25 = vld [vmem:[#allocation2 + $0x18] sm:$0xff]  ;;  %v3063_v29 = vor.u32 %v3062_v50, %v3059_v41 }
 0x1c9   : > { %8329 = vst [vmem:[#allocation22_spill] sm:$0xff] %v7271_v32  ;;  %v7273_v44 = vpop.f32.mrf.mxu1  ;;  %v2222_v17 = vpop.f32.mrf.mxu3  ;;  %v3066_v23 = vshll.u32 %v7279_v4, 16  ;;  %v3070_v49 = vshrl.u32 %v7279_v4, 16 }
 0x1ca   : > { %8330 = vst [vmem:[#allocation23_spill] sm:$0xff] %v7273_v44  ;;  %v3064_v30 = vrot.slane %v3063_v29, 4  ;;  %v6303_v29 = vld [vmem:[#allocation2 + $0x24] sm:$0xff] }
 0x1cb   : > { %6092 = vmatmul.msk.bf16.gmra.mxu0 %vm736_vm11, %v3806_v51  ;;  %v3072_v45 = vrot.slane %v3070_v49, 4  ;;  %v3375_v51 = vunpack.c.l.b16 %v3045_v58  ;;  %v3807_v58 = vpack.c.b16 %v3778_v1, %v3777_v6  ;;  %v3597_v1 = vld [vmem:[#allocation2 + $0x30] sm:$0xe] }
 0x1cc   : > { %5946 = vmatmul.msk.bf16.gmra.mxu1 %vm736_vm11, %v6853_v61 }
 0x1cd   : > { %v3405_v12 = vpack.c.b16 %v3376_v19, %v3375_v51  ;;  %v2948_v51 = vld [vmem:[#allocation2 + $0x3c] sm:$0xf] }
 0x1ce   : > { %v3081_v6 = vshrl.u32 %v2948_v51, 16  ;;  %v3084_v27 = vshll.u32 %v2948_v51, 16 }
 0x1cf   : > { %v1996_v22 = vpop.f32.mrf.mxu2 }
 0x1d0   : > { %v7285_v56 = vadd.f32 %v2219_v47, %v1996_v22  ;;  %v7287_v61 = vpop.f32.mrf.mxu0  ;;  %v3068_v47 = vrot.slane %v3066_v23, 5 }
 0x1d1   : > { %8331 = vst [vmem:[#allocation24_spill] sm:$0xff] %v7287_v61  ;;  %v7289_v20 = vpop.f32.mrf.mxu1  ;;  %v2224_v37 = vpop.f32.mrf.mxu3 }
 0x1d2   : > { %8332 = vst [vmem:[#allocation25_spill] sm:$0xff] %v7289_v20  ;;  %v3073_v39 = vor.u32 %v3072_v45, %v3068_v47  ;;  %v3069_v50 = vsel %vm6840_vm15, %v3064_v30, %v3068_v47  ;;  %v3083_v30 = vrot.slane %v3081_v6, 4 }
 0x1d3   : > { %v3377_v20 = vunpack.c.l.b16 %v3069_v50 }
 0x1d4   : > { %6032 = vmatmul.msk.bf16.gmra.mxu2 %vm736_vm11, %v6302_v25  ;;  %v3074_v19 = vrot.slane %v3073_v39, 4  ;;  %v3681_v25 = vrot.slane %v7279_v4, 5 }
 0x1d6   : > { %6055 = vmatmul.msk.bf16.gmra.mxu3 %vm736_vm11, %v3405_v12  ;;  %v3079_v34 = vsel %vm6840_vm15, %v3074_v19, %v3078_v48  ;;  %v3683_v45 = vrot.slane %v3681_v25, 4  ;;  %v6072_v19 = vrot.slane %v3597_v1, 9 }
 0x1d7   : > { %v1999_v22 = vpop.f32.mrf.mxu2  ;;  %v3378_v39 = vunpack.c.l.b16 %v3079_v34  ;;  %v3086_v34 = vrot.slane %v3084_v27, 5  ;;  %v2261_v27 = vld [vmem:[#allocation2 + $0x30] sm:$0xe] }
 0x1d8   : > { %v7298_v54 = vadd.f32 %v2222_v17, %v1999_v22  ;;  %v7303_v49 = vpop.f32.mrf.mxu0  ;;  %v7309_v17 = vld [vmem:[#allocation2 + $0x40] sm:$0xf]  ;;  %v3684_v22 = vrot.slane %v2947_v63, 5  ;;  %v2950_v63 = vld [vmem:[#allocation2 + $0x44] sm:$0x1] }
 0x1d9   : > { %v7301_v23 = vpop.f32.mrf.mxu1  ;;  %v2227_v55 = vpop.f32.mrf.mxu3  ;;  %v3090_v60 = vshll.u32 %v7309_v17, 16  ;;  %v3094_v12 = vshrl.u32 %v7309_v17, 16  ;;  %v3406_v44 = vpack.c.b16 %v3378_v39, %v3377_v20  ;;  %v3100_v1 = vshll.u32 %v2950_v63, 16 }
 0x1da   : > { %8333 = vst [vmem:[#allocation26_spill] sm:$0xff] %v7301_v23  ;;  %v3685_v48 = vsel %vm6812_vm14, %v3683_v45, %v3684_v22  ;;  %v3087_v22 = vor.u32 %v3086_v34, %v3083_v30  ;;  %v3688_v6 = vrot.slane %v7309_v17, 5 }
 0x1db   : > { %6093 = vmatmul.msk.bf16.gmra.mxu0 %vm736_vm11, %v3807_v58  ;;  %v3780_v47 = vunpack.c.l.b16 %v3685_v48  ;;  %v3598_v48 = vld [vmem:[#allocation2 + $0x3c] sm:$0xe] }
 0x1dc   : > { %5947 = vmatmul.msk.bf16.gmra.mxu1 %vm736_vm11, %v6890_v62  ;;  %v3690_v30 = vrot.slane %v3688_v6, 4  ;;  %v6073_v3 = vrot.slane %v3598_v48, 9  ;;  %v2953_v48 = vld [vmem:[#allocation2 + $0x50] sm:$0x1] }
 0x1df   : > { %v2001_v33 = vpop.f32.mrf.mxu2 }
 0x1e0   : > { %v7315_v4 = vadd.f32 %v2224_v37, %v2001_v33  ;;  %v7319_v41 = vpop.f32.mrf.mxu0  ;;  %v3092_v37 = vrot.slane %v3090_v60, 5  ;;  %v3096_v33 = vrot.slane %v3094_v12, 4 }
 0x1e1   : > { %v7317_v62 = vpop.f32.mrf.mxu1  ;;  %v2229_v58 = vpop.f32.mrf.mxu3 }
 0x1e2   : > { %8334 = vst [vmem:[#allocation27_spill] sm:$0xff] %v7317_v62  ;;  %v3682_v62 = vsel %vm6812_vm14, %v6072_v19, %v3681_v25  ;;  %v3097_v23 = vor.u32 %v3096_v33, %v3092_v37  ;;  %v6390_v25 = vld [vmem:[#allocation2 + $0x34] sm:$0xf] }
 0x1e3   : > { %v3779_v45 = vunpack.c.l.b16 %v3682_v62  ;;  %v2338_v20 = vrot.slane %v6390_v25, 5  ;;  %v3088_v62 = vrot.slane %v3087_v22, 4  ;;  %v5927_v25 = vrot.slane %v2261_v27, 9 }
 0x1e4   : > { %6033 = vmatmul.msk.bf16.gmra.mxu2 %vm736_vm11, %v6303_v29  ;;  %v3098_v29 = vrot.slane %v3097_v23, 4  ;;  %v2951_v23 = vld [vmem:[#allocation2 + $0x48] sm:$0xf] }
 0x1e5   : > { %v3808_v50 = vpack.c.b16 %v3780_v47, %v3779_v45  ;;  %v2340_v19 = vrot.slane %v2338_v20, 4  ;;  %v3093_v22 = vsel %vm6840_vm15, %v3088_v62, %v3092_v37  ;;  %v3105_v10 = vshrl.u32 %v2951_v23, 16 }
 0x1e6   : > { %6056 = vmatmul.msk.bf16.gmra.mxu3 %vm736_vm11, %v3406_v44  ;;  %v7339_v44 = vld [vmem:[#allocation2 + $0x4c] sm:$0xf]  ;;  %v3379_v7 = vunpack.c.l.b16 %v3093_v22  ;;  %v2339_v37 = vsel %vm6812_vm14, %v5927_v25, %v2338_v20 }
 0x1e7   : > { %v2004_v51 = vpop.f32.mrf.mxu2  ;;  %v3114_v17 = vshll.u32 %v7339_v44, 16  ;;  %v3118_v34 = vshrl.u32 %v7339_v44, 16 }
 0x1e8   : > { %v7328_v8 = vadd.f32 %v2227_v55, %v2004_v51  ;;  %v7333_v12 = vpop.f32.mrf.mxu0  ;;  %v3102_v55 = vrot.slane %v3100_v1, 5 }
 0x1e9   : > { %v7331_v60 = vpop.f32.mrf.mxu1  ;;  %v2232_v39 = vpop.f32.mrf.mxu3 }
 0x1ea   : > { %8335 = vst [vmem:[#allocation28_spill] sm:$0xff] %v7331_v60  ;;  %v3103_v47 = vsel %vm6840_vm15, %v3098_v29, %v3102_v55  ;;  %v3691_v60 = vrot.slane %v2950_v63, 5  ;;  %v3689_v63 = vsel %vm6812_vm14, %v6073_v3, %v3688_v6 }
 0x1eb   : > { %6094 = vmatmul.msk.bf16.gmra.mxu0 %vm736_vm11, %v3808_v50  ;;  %v3380_v29 = vunpack.c.l.b16 %v3103_v47 }
 0x1ec   : > { %5948 = vmatmul.msk.bf16.gmra.mxu1 %vm736_vm11, %v6932_v9  ;;  %v6391_v9 = vld [vmem:[#allocation2 + $0x38] sm:$0x1] }
 0x1ed   : > { %v2341_v51 = vrot.slane %v6391_v9, 5  ;;  %v3116_v9 = vrot.slane %v3114_v17, 5  ;;  %v3407_v62 = vpack.c.b16 %v3380_v29, %v3379_v7  ;;  %v6392_v29 = vld [vmem:[#allocation2 + $0x40] sm:$0xf] }
 0x1ef   : > { %v2006_v33 = vpop.f32.mrf.mxu2  ;;  %v2342_v55 = vsel %vm6812_vm14, %v2340_v19, %v2341_v51  ;;  %v3107_v51 = vrot.slane %v3105_v10, 4  ;;  %v2345_v10 = vrot.slane %v6392_v29, 5  ;;  %v3698_v29 = vrot.slane %v2953_v48, 5 }
 0x1f0   : > { %v7345_v45 = vadd.f32 %v2229_v58, %v2006_v33  ;;  %v7349_v1 = vpop.f32.mrf.mxu0  ;;  %v3692_v58 = vsel %vm6812_vm14, %v3690_v30, %v3691_v60  ;;  %v3108_v33 = vshll.u32 %v2951_v23, 16  ;;  %v2432_v27 = vunpack.c.l.b16 %v2342_v55 }
 0x1f1   : > { %v7347_v50 = vpop.f32.mrf.mxu1  ;;  %v2234_v13 = vpop.f32.mrf.mxu3  ;;  %v3782_v19 = vunpack.c.l.b16 %v3692_v58  ;;  %v2431_v23 = vunpack.c.l.b16 %v2339_v37  ;;  %v2954_v58 = vld [vmem:[#allocation2 + $0x54] sm:$0xf] }
 0x1f2   : > { %8336 = vst [vmem:[#allocation29_spill] sm:$0xff] %v7347_v50  ;;  %v3120_v50 = vrot.slane %v3118_v34, 4  ;;  %v3110_v21 = vrot.slane %v3108_v33, 5  ;;  %v3124_v34 = vshll.u32 %v2953_v48, 16 }
 0x1f3   : > { %v2459_v3 = vpack.c.b16 %v2432_v27, %v2431_v23  ;;  %v2262_v27 = vld [vmem:[#allocation2 + $0x3c] sm:$0xe]  ;;  %v3132_v23 = vshll.u32 %v2954_v58, 16 }
 0x1f4   : > { %6034 = vmatmul.msk.bf16.gmra.mxu2 %vm736_vm11, %v6304_v43  ;;  %v3121_v60 = vor.u32 %v3120_v50, %v3116_v9  ;;  %v3781_v43 = vunpack.c.l.b16 %v3689_v63  ;;  %v3111_v22 = vor.u32 %v3110_v21, %v3107_v51  ;;  %v3695_v50 = vrot.slane %v7339_v44, 5  ;;  %v3599_v51 = vld [vmem:[#allocation2 + $0x48] sm:$0xe] }
 0x1f5   : > { %v3126_v55 = vrot.slane %v3124_v34, 5 }
 0x1f6   : > { %6057 = vmatmul.msk.bf16.gmra.mxu3 %vm736_vm11, %v3407_v62  ;;  %v3809_v7 = vpack.c.b16 %v3782_v19, %v3781_v43  ;;  %v3122_v25 = vrot.slane %v3121_v60, 4  ;;  %v3112_v62 = vrot.slane %v3111_v22, 4  ;;  %v2347_v19 = vrot.slane %v2345_v10, 4  ;;  %v6393_v43 = vld [vmem:[#allocation2 + $0x44] sm:$0x1] }
 0x1f7   : > { %v2009_v47 = vpop.f32.mrf.mxu2  ;;  %v3697_v44 = vrot.slane %v3695_v50, 4  ;;  %v3129_v60 = vshrl.u32 %v2954_v58, 16  ;;  %v2348_v34 = vrot.slane %v6393_v43, 5  ;;  %v6074_v58 = vrot.slane %v3599_v51, 9 }
 0x1f8   : > { %v7362_v30 = vadd.f32 %v2232_v39, %v2009_v47  ;;  %v7367_v20 = vpop.f32.mrf.mxu0  ;;  %v7370_v39 = vld [vmem:[#allocation2 + $0x58] sm:$0xf]  ;;  %v3127_v21 = vsel %vm6840_vm15, %v3122_v25, %v3126_v55  ;;  %v3117_v22 = vsel %vm6840_vm15, %v3112_v62, %v3116_v9  ;;  %v5928_v25 = vrot.slane %v2262_v27, 9 }
 0x1f9   : > { %v7365_v17 = vpop.f32.mrf.mxu1  ;;  %v2237_v6 = vpop.f32.mrf.mxu3  ;;  %v3138_v33 = vshll.u32 %v7370_v39, 16  ;;  %v3142_v37 = vshrl.u32 %v7370_v39, 16  ;;  %v3699_v43 = vsel %vm6812_vm14, %v3697_v44, %v3698_v29  ;;  %v3131_v0 = vrot.slane %v3129_v60, 4 }
 0x1fa   : > { %8337 = vst [vmem:[#allocation30_spill] sm:$0xff] %v7365_v17  ;;  %v3382_v17 = vunpack.c.l.b16 %v3127_v21  ;;  %v2346_v40 = vsel %vm6812_vm14, %v5928_v25, %v2345_v10  ;;  %v3134_v9 = vrot.slane %v3132_v23, 5  ;;  %v3696_v48 = vsel %vm6812_vm14, %v6074_v58, %v3695_v50 }
 0x1fb   : > { %6095 = vmatmul.msk.bf16.gmra.mxu0 %vm736_vm11, %v3809_v7  ;;  %v3140_v55 = vrot.slane %v3138_v33, 5  ;;  %v3144_v57 = vrot.slane %v3142_v37, 4  ;;  %v2956_v33 = vld [vmem:[#allocation2 + $0x5c] sm:$0x1]  ;;  %v3784_v21 = vunpack.c.l.b16 %v3699_v43  ;;  %v2433_v51 = vunpack.c.l.b16 %v2346_v40  ;;  %v2263_v43 = vld [vmem:[#allocation2 + $0x48] sm:$0xe] }
 0x1fc   : > { %5949 = vmatmul.msk.bf16.gmra.mxu1 %vm736_vm11, %v2459_v3  ;;  %v3783_v44 = vunpack.c.l.b16 %v3696_v48  ;;  %v3135_v10 = vor.u32 %v3134_v9, %v3131_v0  ;;  %v3148_v60 = vshll.u32 %v2956_v33, 16  ;;  %v3702_v40 = vrot.slane %v7370_v39, 5  ;;  %v3600_v9 = vld [vmem:[#allocation2 + $0x54] sm:$0xe]  ;;  %v2957_v39 = vld [vmem:[#allocation2 + $0x60] sm:$0xf] }
 0x1fd   : > { %v3145_v27 = vor.u32 %v3144_v57, %v3140_v55  ;;  %v6394_v57 = vld [vmem:[#allocation2 + $0x4c] sm:$0xf] }
 0x1fe   : > { %v3136_v0 = vrot.slane %v3135_v10, 4 }
 0x1ff   : > { %v2011_v63 = vpop.f32.mrf.mxu2 }
 0x200   : > { %v7378_v47 = vadd.f32 %v2234_v13, %v2011_v63  ;;  %v7382_v7 = vpop.f32.mrf.mxu0  ;;  %v6305_v13 = vld [vmem:[#allocation2 + $0x3c] sm:$0xff]  ;;  %v2349_v63 = vsel %vm6812_vm14, %v2347_v19, %v2348_v34 }
 0x201   : > { %v7380_v3 = vpop.f32.mrf.mxu1  ;;  %v2239_v18 = vpop.f32.mrf.mxu3  ;;  %v2434_v62 = vunpack.c.l.b16 %v2349_v63  ;;  %v7406_v63 = vld [vmem:[#allocation2 + $0x64] sm:$0xf] }
 0x202   : > { %8338 = vst [vmem:[#allocation31_spill] sm:$0xff] %v7380_v3  ;;  %v3381_v3 = vunpack.c.l.b16 %v3117_v22 }
 0x203   : > { %v2460_v50 = vpack.c.b16 %v2434_v62, %v2433_v51  ;;  %v3704_v62 = vrot.slane %v3702_v40, 4 }
 0x204   : > { %6035 = vmatmul.msk.bf16.gmra.mxu2 %vm736_vm11, %v6305_v13  ;;  %v3408_v37 = vpack.c.b16 %v3382_v17, %v3381_v3  ;;  %v3810_v17 = vpack.c.b16 %v3784_v21, %v3783_v44  ;;  %v3146_v3 = vrot.slane %v3145_v27, 4  ;;  %v2352_v13 = vrot.slane %v6394_v57, 5 }
 0x205   : > { %v3162_v21 = vshll.u32 %v7406_v63, 16  ;;  %v3166_v27 = vshrl.u32 %v7406_v63, 16  ;;  %v6075_v57 = vrot.slane %v3600_v9, 9  ;;  %v2959_v9 = vld [vmem:[#allocation2 + $0x68] sm:$0x1] }
 0x206   : > { %6058 = vmatmul.msk.bf16.gmra.mxu3 %vm736_vm11, %v3408_v37  ;;  %v2354_v37 = vrot.slane %v2352_v13, 4 }
 0x207   : > { %v2014_v19 = vpop.f32.mrf.mxu2 }
 0x208   : > { %v7395_v34 = vadd.f32 %v2237_v6, %v2014_v19  ;;  %v2177_v22 = vpop.f32.mrf.mxu0  ;;  %v3150_v6 = vrot.slane %v3148_v60, 5  ;;  %v6395_v19 = vld [vmem:[#allocation2 + $0x50] sm:$0x1] }
 0x209   : > { %v7398_v23 = vpop.f32.mrf.mxu1  ;;  %v7401_v29 = vadd.f32 %v2177_v22, %v7303_v49  ;;  %v2242_v25 = vpop.f32.mrf.mxu3  ;;  %v3141_v49 = vsel %vm6840_vm15, %v3136_v0, %v3140_v55  ;;  %v2355_v51 = vrot.slane %v6395_v19, 5  ;;  %v3153_v0 = vshrl.u32 %v2957_v39, 16 }
 0x20a   : > { %8339 = vst [vmem:[#allocation32_spill] sm:$0xff] %v7398_v23  ;;  %v3151_v58 = vsel %vm6840_vm15, %v3146_v3, %v3150_v6  ;;  %v3383_v60 = vunpack.c.l.b16 %v3141_v49  ;;  %v3156_v6 = vshll.u32 %v2957_v39, 16 }
 0x20b   : > { %6096 = vmatmul.msk.bf16.gmra.mxu0 %vm736_vm11, %v3810_v17  ;;  %v3384_v22 = vunpack.c.l.b16 %v3151_v58  ;;  %v3705_v17 = vrot.slane %v2956_v33, 5  ;;  %v2356_v19 = vsel %vm6812_vm14, %v2354_v37, %v2355_v51  ;;  %v3703_v33 = vsel %vm6812_vm14, %v6075_v57, %v3702_v40 }
 0x20c   : > { %5950 = vmatmul.msk.bf16.gmra.mxu1 %vm736_vm11, %v2460_v50  ;;  %v5929_v50 = vrot.slane %v2263_v43, 9  ;;  %v2436_v58 = vunpack.c.l.b16 %v2356_v19  ;;  %v3155_v39 = vrot.slane %v3153_v0, 4 }
 0x20d   : > { %v3409_v49 = vpack.c.b16 %v3384_v22, %v3383_v60  ;;  %v6396_v60 = vld [vmem:[#allocation2 + $0x58] sm:$0xf] }
 0x20e   : > { %v2359_v22 = vrot.slane %v6396_v60, 5 }
 0x20f   : > { %v2016_v48 = vpop.f32.mrf.mxu2 }
 0x210   : > { %v7414_v44 = vadd.f32 %v2239_v18, %v2016_v48  ;;  %v2179_v55 = vpop.f32.mrf.mxu0  ;;  %v3706_v18 = vsel %vm6812_vm14, %v3704_v62, %v3705_v17  ;;  %v3164_v48 = vrot.slane %v3162_v21, 5 }
 0x211   : > { %v7416_v10 = vpop.f32.mrf.mxu1  ;;  %v7419_v3 = vadd.f32 %v2179_v55, %v7319_v41  ;;  %v2244_v23 = vpop.f32.mrf.mxu3  ;;  %v2353_v41 = vsel %vm6812_vm14, %v5929_v50, %v2352_v13  ;;  %v3786_v43 = vunpack.c.l.b16 %v3706_v18  ;;  %v3158_v55 = vrot.slane %v3156_v6, 5  ;;  %v7441_v6 = vld [vmem:[#allocation2 + $0x70] sm:$0xf] }
 0x212   : > { %8340 = vst [vmem:[#allocation33_spill] sm:$0xff] %v7416_v10  ;;  %v3168_v10 = vrot.slane %v3166_v27, 4  ;;  %v2435_v62 = vunpack.c.l.b16 %v2353_v41  ;;  %v3172_v13 = vshll.u32 %v2959_v9, 16  ;;  %v2361_v18 = vrot.slane %v2359_v22, 4 }
 0x213   : > { %v3159_v57 = vor.u32 %v3158_v55, %v3155_v39  ;;  %v2960_v39 = vld [vmem:[#allocation2 + $0x6c] sm:$0xf]  ;;  %v3190_v55 = vshrl.u32 %v7441_v6, 16 }
 0x214   : > { %6036 = vmatmul.msk.bf16.gmra.mxu2 %vm736_vm11, %v6306_v24  ;;  %v3169_v51 = vor.u32 %v3168_v10, %v3164_v48  ;;  %v3785_v24 = vunpack.c.l.b16 %v3703_v33  ;;  %v2461_v50 = vpack.c.b16 %v2436_v58, %v2435_v62  ;;  %v3174_v19 = vrot.slane %v3172_v13, 5  ;;  %v3601_v62 = vld [vmem:[#allocation2 + $0x60] sm:$0xe] }
 0x215   : > { %v3160_v33 = vrot.slane %v3159_v57, 4 }
 0x216   : > { %6059 = vmatmul.msk.bf16.gmra.mxu3 %vm736_vm11, %v3409_v49  ;;  %v3811_v17 = vpack.c.b16 %v3786_v43, %v3785_v24  ;;  %v3170_v10 = vrot.slane %v3169_v51, 4  ;;  %v6397_v49 = vld [vmem:[#allocation2 + $0x5c] sm:$0x1] }
 0x217   : > { %v2019_v37 = vpop.f32.mrf.mxu2  ;;  %v2362_v41 = vrot.slane %v6397_v49, 5  ;;  %v3165_v13 = vsel %vm6840_vm15, %v3160_v33, %v3164_v48  ;;  %v3180_v49 = vshll.u32 %v2960_v39, 16  ;;  %v3192_v48 = vrot.slane %v3190_v55, 4 }
 0x218   : > { %v7430_v53 = vadd.f32 %v2242_v25, %v2019_v37  ;;  %v2182_v27 = vpop.f32.mrf.mxu0  ;;  %v3709_v25 = vrot.slane %v7406_v63, 5  ;;  %v3175_v58 = vsel %vm6840_vm15, %v3170_v10, %v3174_v19  ;;  %v3186_v63 = vshll.u32 %v7441_v6, 16 }
 0x219   : > { %v7433_v21 = vpop.f32.mrf.mxu1  ;;  %v7436_v40 = vadd.f32 %v2182_v27, %v7333_v12  ;;  %v2247_v0 = vpop.f32.mrf.mxu3  ;;  %v2264_v12 = vld [vmem:[#allocation2 + $0x54] sm:$0xe]  ;;  %v3386_v10 = vunpack.c.l.b16 %v3175_v58  ;;  %v3177_v19 = vshrl.u32 %v2960_v39, 16  ;;  %v3385_v33 = vunpack.c.l.b16 %v3165_v13  ;;  %v2962_v58 = vld [vmem:[#allocation2 + $0x74] sm:$0x1] }
 0x21a   : > { %8341 = vst [vmem:[#allocation34_spill] sm:$0xff] %v7433_v21  ;;  %v3711_v43 = vrot.slane %v3709_v25, 4  ;;  %v5930_v60 = vrot.slane %v2264_v12, 9  ;;  %v6076_v21 = vrot.slane %v3601_v62, 9  ;;  %v7460_v61 = vrot.slane %v3186_v63, 5 }
 0x21b   : > { %6097 = vmatmul.msk.bf16.gmra.mxu0 %vm736_vm11, %v3811_v17  ;;  %v3712_v17 = vrot.slane %v2959_v9, 5  ;;  %v3179_v39 = vrot.slane %v3177_v19, 4  ;;  %v3182_v62 = vrot.slane %v3180_v49, 5 }
 0x21c   : > { %5951 = vmatmul.msk.bf16.gmra.mxu1 %vm736_vm11, %v2461_v50  ;;  %v2363_v50 = vsel %vm6812_vm14, %v2361_v18, %v2362_v41  ;;  %v2360_v9 = vsel %vm6812_vm14, %v5930_v60, %v2359_v22  ;;  %v3710_v18 = vsel %vm6812_vm14, %v6076_v21, %v3709_v25  ;;  %v3410_v41 = vpack.c.b16 %v3386_v10, %v3385_v33 }
 0x21d   : > { %v2437_v55 = vunpack.c.l.b16 %v2360_v9  ;;  %v3196_v60 = vshll.u32 %v2962_v58, 16  ;;  %v3183_v19 = vor.u32 %v3182_v62, %v3179_v39  ;;  %v2265_v9 = vld [vmem:[#allocation2 + $0x60] sm:$0xe]  ;;  %v2963_v39 = vld [vmem:[#allocation2 + $0x78] sm:$0xf] }
 0x21f   : > { %v2021_v37 = vpop.f32.mrf.mxu2  ;;  %v3198_v33 = vrot.slane %v3196_v60, 5 }
 0x220   : > { %v7447_v51 = vadd.f32 %v2244_v23, %v2021_v37  ;;  %v2184_v27 = vpop.f32.mrf.mxu0  ;;  %v6307_v37 = vld [vmem:[#allocation2 + $0x54] sm:$0xff] }
 0x221   : > { %v7449_v24 = vpop.f32.mrf.mxu1  ;;  %v7456_v57 = vadd.f32 %v2184_v27, %v7349_v1  ;;  %v2249_v23 = vpop.f32.mrf.mxu3  ;;  %v2438_v1 = vunpack.c.l.b16 %v2363_v50  ;;  %v3787_v27 = vunpack.c.l.b16 %v3710_v18  ;;  %v6398_v50 = vld [vmem:[#allocation2 + $0x64] sm:$0xf] }
 0x222   : > { %8342 = vst [vmem:[#allocation35_spill] sm:$0xff] %v7449_v24  ;;  %v3713_v24 = vsel %vm6812_vm14, %v3711_v43, %v3712_v17  ;;  %v3193_v43 = vor.u32 %v3192_v48, %v7460_v61  ;;  %v2366_v21 = vrot.slane %v6398_v50, 5  ;;  %v3716_v48 = vrot.slane %v7441_v6, 5 }
 0x223   : > { %v3788_v12 = vunpack.c.l.b16 %v3713_v24  ;;  %v2462_v24 = vpack.c.b16 %v2438_v1, %v2437_v55  ;;  %v5931_v55 = vrot.slane %v2265_v9, 9  ;;  %v3204_v9 = vshll.u32 %v2963_v39, 16 }
 0x224   : > { %6037 = vmatmul.msk.bf16.gmra.mxu2 %vm736_vm11, %v6307_v37  ;;  %v3194_v37 = vrot.slane %v3193_v43, 4  ;;  %v2368_v18 = vrot.slane %v2366_v21, 4 }
 0x225   : > { %v3812_v10 = vpack.c.b16 %v3788_v12, %v3787_v27  ;;  %v3718_v12 = vrot.slane %v3716_v48, 4  ;;  %v3602_v27 = vld [vmem:[#allocation2 + $0x6c] sm:$0xe] }
 0x226   : > { %6060 = vmatmul.msk.bf16.gmra.mxu3 %vm736_vm11, %v3410_v41  ;;  %v6399_v41 = vld [vmem:[#allocation2 + $0x68] sm:$0x1]  ;;  %v3199_v1 = vsel %vm6840_vm15, %v3194_v37, %v3198_v33 }
 0x227   : > { %v2024_v63 = vpop.f32.mrf.mxu2  ;;  %v3388_v33 = vunpack.c.l.b16 %v3199_v1 }
 0x228   : > { %v7469_v13 = vadd.f32 %v2247_v0, %v2024_v63  ;;  %v2187_v22 = vpop.f32.mrf.mxu0  ;;  %v7479_v0 = vld [vmem:[#allocation2 + $0x7c] sm:$0xf]  ;;  %v2369_v63 = vrot.slane %v6399_v41, 5  ;;  %v3201_v41 = vshrl.u32 %v2963_v39, 16  ;;  %v3206_v39 = vrot.slane %v3204_v9, 5 }
 0x229   : > { %v7471_v17 = vpop.f32.mrf.mxu1  ;;  %v7474_v25 = vadd.f32 %v2187_v22, %v7367_v20  ;;  %v2252_v49 = vpop.f32.mrf.mxu3  ;;  %v3184_v20 = vrot.slane %v3183_v19, 4  ;;  %v3210_v62 = vshll.u32 %v7479_v0, 16  ;;  %v3214_v6 = vshrl.u32 %v7479_v0, 16  ;;  %v7511_v9 = vld [vmem:[#allocation2 + $0x88] sm:$0xf] }
 0x22a   : > { %8343 = vst [vmem:[#allocation36_spill] sm:$0xff] %v7471_v17  ;;  %v3719_v19 = vrot.slane %v2962_v58, 5  ;;  %v3203_v1 = vrot.slane %v3201_v41, 4 }
 0x22b   : > { %6098 = vmatmul.msk.bf16.gmra.mxu0 %vm736_vm11, %v3812_v10  ;;  %v2370_v10 = vsel %vm6812_vm14, %v2368_v18, %v2369_v63  ;;  %v3212_v31 = vrot.slane %v3210_v62, 5  ;;  %v3216_v32 = vrot.slane %v3214_v6, 4 }
 0x22c   : > { %5952 = vmatmul.msk.bf16.gmra.mxu1 %vm736_vm11, %v2462_v24  ;;  %v3189_v24 = vsel %vm6840_vm15, %v3184_v20, %v7460_v61  ;;  %v2367_v61 = vsel %vm6812_vm14, %v5931_v55, %v2366_v21  ;;  %v2440_v58 = vunpack.c.l.b16 %v2370_v10  ;;  %v2965_v20 = vld [vmem:[#allocation2 + $0x80] sm:$0x1]  ;;  %v6400_v21 = vld [vmem:[#allocation2 + $0x70] sm:$0xf] }
 0x22d   : > { %v3387_v59 = vunpack.c.l.b16 %v3189_v24  ;;  %v2373_v55 = vrot.slane %v6400_v21, 5  ;;  %v3726_v21 = vrot.slane %v2965_v20, 5 }
 0x22f   : > { %v2026_v43 = vpop.f32.mrf.mxu2  ;;  %v3411_v18 = vpack.c.b16 %v3388_v33, %v3387_v59 }
 0x230   : > { %v7485_v22 = vadd.f32 %v2249_v23, %v2026_v43  ;;  %v2189_v50 = vpop.f32.mrf.mxu0  ;;  %v6308_v23 = vld [vmem:[#allocation2 + $0x60] sm:$0xff]  ;;  %v6077_v43 = vrot.slane %v3602_v27, 9  ;;  %v3217_v27 = vor.u32 %v3216_v32, %v3212_v31  ;;  %v3723_v32 = vrot.slane %v7479_v0, 5 }
 0x231   : > { %v7487_v60 = vpop.f32.mrf.mxu1  ;;  %v7495_v37 = vadd.f32 %v2189_v50, %v7382_v7  ;;  %v2254_v17 = vpop.f32.mrf.mxu3  ;;  %v3238_v0 = vshrl.u32 %v7511_v9, 16 }
 0x232   : > { %8344 = vst [vmem:[#allocation37_spill] sm:$0xff] %v7487_v60  ;;  %v3720_v60 = vsel %vm6812_vm14, %v3718_v12, %v3719_v19  ;;  %v3717_v7 = vsel %vm6812_vm14, %v6077_v43, %v3716_v48  ;;  %v2439_v12 = vunpack.c.l.b16 %v2367_v61  ;;  %v3220_v19 = vshll.u32 %v2965_v20, 16  ;;  %v6401_v61 = vld [vmem:[#allocation2 + $0x74] sm:$0x1] }
 0x233   : > { %v3790_v63 = vunpack.c.l.b16 %v3720_v60  ;;  %v3789_v62 = vunpack.c.l.b16 %v3717_v7  ;;  %v3207_v60 = vor.u32 %v3206_v39, %v3203_v1  ;;  %v3218_v41 = vrot.slane %v3217_v27, 4 }
 0x234   : > { %6038 = vmatmul.msk.bf16.gmra.mxu2 %vm736_vm11, %v6308_v23  ;;  %v2463_v48 = vpack.c.b16 %v2440_v58, %v2439_v12  ;;  %v2266_v23 = vld [vmem:[#allocation2 + $0x6c] sm:$0xe]  ;;  %v2375_v43 = vrot.slane %v2373_v55, 4  ;;  %v2376_v7 = vrot.slane %v6401_v61, 5  ;;  %v3725_v58 = vrot.slane %v3723_v32, 4 }
 0x235   : > { %v3813_v59 = vpack.c.b16 %v3790_v63, %v3789_v62  ;;  %v2966_v63 = vld [vmem:[#allocation2 + $0x84] sm:$0xf]  ;;  %v3234_v1 = vshll.u32 %v7511_v9, 16  ;;  %v5932_v27 = vrot.slane %v2266_v23, 9 }
 0x236   : > { %6061 = vmatmul.msk.bf16.gmra.mxu3 %vm736_vm11, %v3411_v18  ;;  %v3208_v18 = vrot.slane %v3207_v60, 4  ;;  %v3225_v60 = vshrl.u32 %v2966_v63, 16 }
 0x237   : > { %v2029_v50 = vpop.f32.mrf.mxu2  ;;  %v7526_v23 = vrot.slane %v3234_v1, 5 }
 0x238   : > { %v7505_v6 = vadd.f32 %v2252_v49, %v2029_v50  ;;  %v3222_v49 = vrot.slane %v3220_v19, 5  ;;  %v3603_v50 = vld [vmem:[#allocation2 + $0x78] sm:$0xe]  ;;  %v2377_v19 = vsel %vm6812_vm14, %v2375_v43, %v2376_v7 }
 0x239   : > { %v2534_v24 = vpop.f32.mrf.mxu1  ;;  %v3482_v33 = vpop.f32.mrf.mxu3  ;;  %v6078_v35 = vrot.slane %v3603_v50, 9  ;;  %v2442_v20 = vunpack.c.l.b16 %v2377_v19 }
 0x23a   : > { %v2614_v10 = vadd.f32 %v2534_v24, %v7401_v29  ;;  %v3223_v29 = vsel %vm6840_vm15, %v3218_v41, %v3222_v49  ;;  %v3213_v24 = vsel %vm6840_vm15, %v3208_v18, %v3212_v31  ;;  %v3228_v41 = vshll.u32 %v2966_v63, 16  ;;  %v6309_v49 = vld [vmem:[#allocation2 + $0x6c] sm:$0xff] }
 0x23b   : > { %6099 = vmatmul.msk.bf16.gmra.mxu0 %vm736_vm11, %v3813_v59  ;;  %v3390_v59 = vunpack.c.l.b16 %v3223_v29  ;;  %v2374_v31 = vsel %vm6812_vm14, %v5932_v27, %v2373_v55  ;;  %v2968_v18 = vld [vmem:[#allocation2 + $0x8c] sm:$0x1]  ;;  %v3227_v29 = vrot.slane %v3225_v60, 4  ;;  %v6402_v55 = vld [vmem:[#allocation2 + $0x7c] sm:$0xf] }
 0x23c   : > { %5953 = vmatmul.msk.bf16.gmra.mxu1 %vm736_vm11, %v2463_v48  ;;  %v3230_v63 = vrot.slane %v3228_v41, 5  ;;  %v2380_v27 = vrot.slane %v6402_v55, 5  ;;  %v3733_v55 = vrot.slane %v2968_v18, 5 }
 0x23f   : > { %v2031_v39 = vpop.f32.mrf.mxu2 }
 0x240   : > { %v7517_v12 = vadd.f32 %v2254_v17, %v2031_v39  ;;  %v3727_v17 = vsel %vm6812_vm14, %v3725_v58, %v3726_v21  ;;  %v3240_v39 = vrot.slane %v3238_v0, 4  ;;  %v2441_v0 = vunpack.c.l.b16 %v2374_v31 }
 0x241   : > { %v2536_v62 = vpop.f32.mrf.mxu1  ;;  %v3484_v61 = vpop.f32.mrf.mxu3  ;;  %v3792_v7 = vunpack.c.l.b16 %v3727_v17  ;;  %v3244_v21 = vshll.u32 %v2968_v18, 16  ;;  %v2382_v31 = vrot.slane %v2380_v27, 4 }
 0x242   : > { %8345 = vst [vmem:[#allocation38_spill] sm:$0xff] %v7517_v12  ;;  %v2615_v48 = vadd.f32 %v2536_v62, %v7419_v3  ;;  %v3389_v12 = vunpack.c.l.b16 %v3213_v24  ;;  %v3724_v3 = vsel %vm6812_vm14, %v6078_v35, %v3723_v32  ;;  %v3241_v58 = vor.u32 %v3240_v39, %v7526_v23  ;;  %v2267_v39 = vld [vmem:[#allocation2 + $0x78] sm:$0xe] }
 0x243   : > { %v3791_v50 = vunpack.c.l.b16 %v3724_v3  ;;  %v2464_v35 = vpack.c.b16 %v2442_v20, %v2441_v0  ;;  %v3246_v17 = vrot.slane %v3244_v21, 5  ;;  %v3604_v3 = vld [vmem:[#allocation2 + $0x84] sm:$0xe] }
 0x244   : > { %6039 = vmatmul.msk.bf16.gmra.mxu2 %vm736_vm11, %v6309_v49  ;;  %v3412_v43 = vpack.c.b16 %v3390_v59, %v3389_v12  ;;  %v3231_v12 = vor.u32 %v3230_v63, %v3227_v29  ;;  %v3242_v41 = vrot.slane %v3241_v58, 4  ;;  %v3730_v49 = vrot.slane %v7511_v9, 5  ;;  %v2969_v29 = vld [vmem:[#allocation2 + $0x90] sm:$0xf] }
 0x245   : > { %v3814_v32 = vpack.c.b16 %v3792_v7, %v3791_v50  ;;  %v6079_v0 = vrot.slane %v3604_v3, 9 }
 0x246   : > { %6062 = vmatmul.msk.bf16.gmra.mxu3 %vm736_vm11, %v3412_v43  ;;  %v3232_v43 = vrot.slane %v3231_v12, 4  ;;  %v3732_v7 = vrot.slane %v3730_v49, 4  ;;  %v3249_v12 = vshrl.u32 %v2969_v29, 16 }
 0x247   : > { %v2824_v1 = vpop.f32.mrf.mxu2 }
 0x248   : > { %v2904_v62 = vadd.f32 %v2824_v1, %v2614_v10  ;;  %v7541_v10 = vld [vmem:[#allocation2 + $0x94] sm:$0xf]  ;;  %v5933_v1 = vrot.slane %v2267_v39, 9 }
 0x249   : > { %v2539_v24 = vpop.f32.mrf.mxu1  ;;  %v3487_v60 = vpop.f32.mrf.mxu3  ;;  %v3258_v9 = vshll.u32 %v7541_v10, 16  ;;  %v3262_v63 = vshrl.u32 %v7541_v10, 16 }
 0x24a   : > { %v2616_v19 = vadd.f32 %v2539_v24, %v7436_v40  ;;  %v7536_v59 = vadd.f32 %v3482_v33, %v2904_v62  ;;  %v6403_v40 = vld [vmem:[#allocation2 + $0x80] sm:$0x1]  ;;  %v3247_v33 = vsel %vm6840_vm15, %v3242_v41, %v3246_v17  ;;  %v3237_v24 = vsel %vm6840_vm15, %v3232_v43, %v7526_v23  ;;  %v2971_v43 = vld [vmem:[#allocation2 + $0x98] sm:$0x1] }
 0x24b   : > { %6100 = vmatmul.msk.bf16.gmra.mxu0 %vm736_vm11, %v3814_v32  ;;  %v2383_v20 = vrot.slane %v6403_v40, 5  ;;  %v3392_v32 = vunpack.c.l.b16 %v3247_v33  ;;  %v3252_v41 = vshll.u32 %v2969_v29, 16  ;;  %v6310_v40 = vld [vmem:[#allocation2 + $0x78] sm:$0xff]  ;;  %v7557_v3 = vrot.slane %v3258_v9, 5 }
 0x24c   : > { %5954 = vmatmul.msk.bf16.gmra.mxu1 %vm736_vm11, %v2464_v35  ;;  %v3391_v23 = vunpack.c.l.b16 %v3237_v24  ;;  %v2381_v18 = vsel %vm6812_vm14, %v5933_v1, %v2380_v27  ;;  %v3251_v33 = vrot.slane %v3249_v12, 4  ;;  %v3268_v1 = vshll.u32 %v2971_v43, 16 }
 0x24d   : > { %v2384_v21 = vsel %vm6812_vm14, %v2382_v31, %v2383_v20  ;;  %v3731_v31 = vsel %vm6812_vm14, %v6079_v0, %v3730_v49  ;;  %v3254_v29 = vrot.slane %v3252_v41, 5 }
 0x24f   : > { %v2826_v58 = vpop.f32.mrf.mxu2 }
 0x250   : > { %v2905_v50 = vadd.f32 %v2826_v58, %v2615_v48  ;;  %v3734_v48 = vsel %vm6812_vm14, %v3732_v7, %v3733_v55  ;;  %v3264_v58 = vrot.slane %v3262_v63, 4  ;;  %v2443_v63 = vunpack.c.l.b16 %v2381_v18  ;;  %v2268_v18 = vld [vmem:[#allocation2 + $0x84] sm:$0xe] }
 0x251   : > { %v2541_v62 = vpop.f32.mrf.mxu1  ;;  %v3489_v39 = vpop.f32.mrf.mxu3  ;;  %v3794_v20 = vunpack.c.l.b16 %v3734_v48  ;;  %v3737_v48 = vrot.slane %v7541_v10, 5 }
 0x252   : > { %v2617_v35 = vadd.f32 %v2541_v62, %v7456_v57  ;;  %v7553_v17 = vadd.f32 %v3484_v61, %v2905_v50  ;;  %v2444_v57 = vunpack.c.l.b16 %v2384_v21  ;;  %v3413_v61 = vpack.c.b16 %v3392_v32, %v3391_v23  ;;  %v6404_v62 = vld [vmem:[#allocation2 + $0x88] sm:$0xf]  ;;  %v7572_v23 = vld [vmem:[#allocation2 + $0xa0] sm:$0xf] }
 0x253   : > { %v3265_v7 = vor.u32 %v3264_v58, %v7557_v3  ;;  %v3793_v50 = vunpack.c.l.b16 %v3731_v31  ;;  %v2387_v24 = vrot.slane %v6404_v62, 5  ;;  %v3255_v32 = vor.u32 %v3254_v29, %v3251_v33  ;;  %v6405_v31 = vld [vmem:[#allocation2 + $0x8c] sm:$0x1]  ;;  %v2972_v33 = vld [vmem:[#allocation2 + $0x9c] sm:$0xf] }
 0x254   : > { %6040 = vmatmul.msk.bf16.gmra.mxu2 %vm736_vm11, %v6310_v40  ;;  %v2465_v49 = vpack.c.b16 %v2444_v57, %v2443_v63  ;;  %v3282_v10 = vshll.u32 %v7572_v23, 16  ;;  %v3286_v29 = vshrl.u32 %v7572_v23, 16 }
 0x255   : > { %v3815_v0 = vpack.c.b16 %v3794_v20, %v3793_v50  ;;  %v3266_v41 = vrot.slane %v3265_v7, 4  ;;  %v2389_v58 = vrot.slane %v2387_v24, 4  ;;  %v3256_v57 = vrot.slane %v3255_v32, 4 }
 0x256   : > { %6063 = vmatmul.msk.bf16.gmra.mxu3 %vm736_vm11, %v3413_v61  ;;  %v3605_v61 = vld [vmem:[#allocation2 + $0x90] sm:$0xe]  ;;  %v3739_v20 = vrot.slane %v3737_v48, 4  ;;  %v3273_v32 = vshrl.u32 %v2972_v33, 16 }
 0x257   : > { %v2829_v9 = vpop.f32.mrf.mxu2 }
 0x258   : > { %v2906_v55 = vadd.f32 %v2829_v9, %v2616_v19  ;;  %v3270_v19 = vrot.slane %v3268_v1, 5  ;;  %v5934_v9 = vrot.slane %v2268_v18, 9  ;;  %v3740_v1 = vrot.slane %v2971_v43, 5 }
 0x259   : > { %v2544_v27 = vpop.f32.mrf.mxu1  ;;  %v3492_v12 = vpop.f32.mrf.mxu3 }
 0x25a   : > { %v2618_v21 = vadd.f32 %v2544_v27, %v7474_v25  ;;  %v7567_v40 = vadd.f32 %v3487_v60, %v2906_v55  ;;  %v2390_v25 = vrot.slane %v6405_v31, 5  ;;  %v3271_v60 = vsel %vm6840_vm15, %v3266_v41, %v3270_v19  ;;  %v6311_v31 = vld [vmem:[#allocation2 + $0x84] sm:$0xff] }
 0x25b   : > { %6101 = vmatmul.msk.bf16.gmra.mxu0 %vm736_vm11, %v3815_v0  ;;  %v3261_v55 = vsel %vm6840_vm15, %v3256_v57, %v7557_v3  ;;  %v6080_v27 = vrot.slane %v3605_v61, 9  ;;  %v3394_v0 = vunpack.c.l.b16 %v3271_v60  ;;  %v3276_v41 = vshll.u32 %v2972_v33, 16  ;;  %v2974_v60 = vld [vmem:[#allocation2 + $0xa4] sm:$0x1] }
 0x25c   : > { %5955 = vmatmul.msk.bf16.gmra.mxu1 %vm736_vm11, %v2465_v49  ;;  %v2391_v63 = vsel %vm6812_vm14, %v2389_v58, %v2390_v25  ;;  %v3741_v58 = vsel %vm6812_vm14, %v3739_v20, %v3740_v1  ;;  %v3288_v25 = vrot.slane %v3286_v29, 4  ;;  %v2388_v3 = vsel %vm6812_vm14, %v5934_v9, %v2387_v24 }
 0x25d   : > { %v3738_v43 = vsel %vm6812_vm14, %v6080_v27, %v3737_v48  ;;  %v3796_v61 = vunpack.c.l.b16 %v3741_v58  ;;  %v3275_v33 = vrot.slane %v3273_v32, 4  ;;  %v3278_v20 = vrot.slane %v3276_v41, 5 }
 0x25e   : > { %v3292_v1 = vshll.u32 %v2974_v60, 16 }
 0x25f   : > { %v2831_v7 = vpop.f32.mrf.mxu2 }
 0x260   : > { %v2907_v50 = vadd.f32 %v2831_v7, %v2617_v35  ;;  %v7588_v35 = vrot.slane %v3282_v10, 5  ;;  %v3393_v7 = vunpack.c.l.b16 %v3261_v55  ;;  %v6406_v55 = vld [vmem:[#allocation2 + $0x94] sm:$0xf] }
 0x261   : > { %v2546_v62 = vpop.f32.mrf.mxu1  ;;  %v3494_v18 = vpop.f32.mrf.mxu3  ;;  %v2394_v24 = vrot.slane %v6406_v55, 5 }
 0x262   : > { %v2619_v49 = vadd.f32 %v2546_v62, %v7495_v37  ;;  %v7584_v19 = vadd.f32 %v3489_v39, %v2907_v50  ;;  %v2446_v37 = vunpack.c.l.b16 %v2391_v63  ;;  %v7595_v39 = vpop.f32.mrf.mxu0  ;;  %v3414_v57 = vpack.c.b16 %v3394_v0, %v3393_v7 }
 0x263   : > { %v3289_v10 = vor.u32 %v3288_v25, %v7588_v35  ;;  %v2445_v50 = vunpack.c.l.b16 %v2388_v3  ;;  %v3795_v62 = vunpack.c.l.b16 %v3738_v43  ;;  %v3744_v25 = vrot.slane %v7572_v23, 5  ;;  %v7605_v3 = vld [vmem:[#allocation2 + $0xac] sm:$0xf]  ;;  %v2269_v43 = vld [vmem:[#allocation2 + $0x90] sm:$0xe] }
 0x264   : > { %8346 = vst [vmem:[#allocation39_spill] sm:$0xff] %v7584_v19  ;;  %6041 = vmatmul.msk.bf16.gmra.mxu2 %vm736_vm11, %v6311_v31  ;;  %v3279_v31 = vor.u32 %v3278_v20, %v3275_v33  ;;  %v2396_v7 = vrot.slane %v2394_v24, 4  ;;  %v2975_v20 = vld [vmem:[#allocation2 + $0xa8] sm:$0xf]  ;;  %v3306_v23 = vshll.u32 %v7605_v3, 16  ;;  %v6312_v19 = vld [vmem:[#allocation2 + $0x90] sm:$0xff] }
 0x265   : > { %v2466_v27 = vpack.c.b16 %v2446_v37, %v2445_v50  ;;  %v3816_v0 = vpack.c.b16 %v3796_v61, %v3795_v62  ;;  %v3290_v41 = vrot.slane %v3289_v10, 4  ;;  %v3606_v61 = vld [vmem:[#allocation2 + $0x9c] sm:$0xe]  ;;  %v3746_v33 = vrot.slane %v3744_v25, 4 }
 0x266   : > { %6064 = vmatmul.msk.bf16.gmra.mxu3 %vm736_vm11, %v3414_v57  ;;  %v6407_v57 = vld [vmem:[#allocation2 + $0x98] sm:$0x1]  ;;  %v3280_v37 = vrot.slane %v3279_v31, 4  ;;  %v3310_v10 = vshrl.u32 %v7605_v3, 16  ;;  %v5935_v62 = vrot.slane %v2269_v43, 9 }
 0x267   : > { %v2834_v29 = vpop.f32.mrf.mxu2 }
 0x268   : > { %v2908_v9 = vadd.f32 %v2834_v29, %v2618_v21  ;;  %v3294_v21 = vrot.slane %v3292_v1, 5  ;;  %v3285_v1 = vsel %vm6840_vm15, %v3280_v37, %v7588_v35  ;;  %v2395_v35 = vsel %vm6812_vm14, %v5935_v62, %v2394_v24 }
 0x269   : > { %v2549_v63 = vpop.f32.mrf.mxu1  ;;  %v3497_v32 = vpop.f32.mrf.mxu3 }
 0x26a   : > { %v2620_v48 = vadd.f32 %v2549_v63, %v7072_v52  ;;  %v7600_v58 = vadd.f32 %v3492_v12, %v2908_v9  ;;  %v2397_v52 = vrot.slane %v6407_v57, 5  ;;  %v3295_v12 = vsel %vm6840_vm15, %v3290_v41, %v3294_v21  ;;  %v7611_v29 = vpop.f32.mrf.mxu0 }
 0x26b   : > { %6102 = vmatmul.msk.bf16.gmra.mxu0 %vm736_vm11, %v3816_v0  ;;  %v3747_v0 = vrot.slane %v2974_v60, 5  ;;  %v3396_v41 = vunpack.c.l.b16 %v3295_v12  ;;  %v3297_v21 = vshrl.u32 %v2975_v20, 16  ;;  %v3300_v57 = vshll.u32 %v2975_v20, 16 }
 0x26c   : > { %8347 = vst [vmem:[#allocation40_spill] sm:$0xff] %v7600_v58  ;;  %5956 = vmatmul.msk.bf16.gmra.mxu1 %vm736_vm11, %v2466_v27  ;;  %v2398_v55 = vsel %vm6812_vm14, %v2396_v7, %v2397_v52  ;;  %v6081_v27 = vrot.slane %v3606_v61, 9  ;;  %v3312_v52 = vrot.slane %v3310_v10, 4  ;;  %v2977_v61 = vld [vmem:[#allocation2 + $0xb0] sm:$0x1]  ;;  %v2447_v10 = vunpack.c.l.b16 %v2395_v35 }
 0x26d   : > { %v3748_v7 = vsel %vm6812_vm14, %v3746_v33, %v3747_v0  ;;  %v3299_v12 = vrot.slane %v3297_v21, 4  ;;  %v3302_v20 = vrot.slane %v3300_v57, 5  ;;  %v3316_v62 = vshll.u32 %v2977_v61, 16 }
 0x26e   : > { %v3745_v60 = vsel %vm6812_vm14, %v6081_v27, %v3744_v25  ;;  %v3798_v37 = vunpack.c.l.b16 %v3748_v7 }
 0x26f   : > { %v2836_v50 = vpop.f32.mrf.mxu2  ;;  %v3318_v35 = vrot.slane %v3316_v62, 5 }
 0x270   : > { %v2909_v9 = vadd.f32 %v2836_v50, %v2619_v49  ;;  %v7623_v49 = vrot.slane %v3306_v23, 5  ;;  %v3395_v50 = vunpack.c.l.b16 %v3285_v1 }
 0x271   : > { %v2551_v63 = vpop.f32.mrf.mxu1  ;;  %v3499_v43 = vpop.f32.mrf.mxu3 }
 0x272   : > { %v2621_v31 = vadd.f32 %v2551_v63, %v7089_v14  ;;  %v7619_v58 = vadd.f32 %v3494_v18, %v2909_v9  ;;  %v2448_v14 = vunpack.c.l.b16 %v2398_v55  ;;  %v3415_v18 = vpack.c.b16 %v3396_v41, %v3395_v50  ;;  %v7632_v55 = vpop.f32.mrf.mxu0  ;;  %v7640_v50 = vld [vmem:[#allocation2 + $0xb8] sm:$0xf] }
 0x273   : > { %v3313_v33 = vor.u32 %v3312_v52, %v7623_v49  ;;  %v3797_v9 = vunpack.c.l.b16 %v3745_v60  ;;  %v3303_v41 = vor.u32 %v3302_v20, %v3299_v12  ;;  %v3751_v52 = vrot.slane %v7605_v3, 5  ;;  %v2270_v60 = vld [vmem:[#allocation2 + $0x9c] sm:$0xe]  ;;  %v2978_v20 = vld [vmem:[#allocation2 + $0xb4] sm:$0xf] }
 0x274   : > { %8348 = vst [vmem:[#allocation41_spill] sm:$0xff] %v7619_v58  ;;  %6042 = vmatmul.msk.bf16.gmra.mxu2 %vm736_vm11, %v6312_v19  ;;  %v6408_v19 = vld [vmem:[#allocation2 + $0xa0] sm:$0xf]  ;;  %v2467_v27 = vpack.c.b16 %v2448_v14, %v2447_v10  ;;  %v3330_v3 = vshll.u32 %v7640_v50, 16  ;;  %v5936_v10 = vrot.slane %v2270_v60, 9 }
 0x275   : > { %v2401_v63 = vrot.slane %v6408_v19, 5  ;;  %v3817_v0 = vpack.c.b16 %v3798_v37, %v3797_v9  ;;  %v3314_v7 = vrot.slane %v3313_v33, 4  ;;  %v3304_v14 = vrot.slane %v3303_v41, 4  ;;  %v3607_v37 = vld [vmem:[#allocation2 + $0xa8] sm:$0xe] }
 0x276   : > { %6065 = vmatmul.msk.bf16.gmra.mxu3 %vm736_vm11, %v3415_v18  ;;  %v6409_v18 = vld [vmem:[#allocation2 + $0xa4] sm:$0x1]  ;;  %v3753_v12 = vrot.slane %v3751_v52, 4  ;;  %v3334_v33 = vshrl.u32 %v7640_v50, 16  ;;  %v6082_v62 = vrot.slane %v3607_v37, 9 }
 0x277   : > { %v2839_v23 = vpop.f32.mrf.mxu2 }
 0x278   : > { %v2910_v1 = vadd.f32 %v2839_v23, %v2620_v48  ;;  %v2403_v48 = vrot.slane %v2401_v63, 4 }
 0x279   : > { %v2554_v24 = vpop.f32.mrf.mxu1  ;;  %v3502_v57 = vpop.f32.mrf.mxu3 }
 0x27a   : > { %v2622_v25 = vadd.f32 %v2554_v24, %v7097_v15  ;;  %v7635_v21 = vadd.f32 %v3497_v32, %v2910_v1  ;;  %v2404_v15 = vrot.slane %v6409_v18, 5  ;;  %v3319_v32 = vsel %vm6840_vm15, %v3314_v7, %v3318_v35 }
 0x27b   : > { %6103 = vmatmul.msk.bf16.gmra.mxu0 %vm736_vm11, %v3817_v0  ;;  %v3309_v24 = vsel %vm6840_vm15, %v3304_v14, %v7623_v49  ;;  %v3398_v41 = vunpack.c.l.b16 %v3319_v32  ;;  %v3321_v7 = vshrl.u32 %v2978_v20, 16  ;;  %v3324_v35 = vshll.u32 %v2978_v20, 16  ;;  %v2980_v32 = vld [vmem:[#allocation2 + $0xbc] sm:$0x1] }
 0x27c   : > { %8349 = vst [vmem:[#allocation42_spill] sm:$0xff] %v7635_v21  ;;  %5957 = vmatmul.msk.bf16.gmra.mxu1 %vm736_vm11, %v2467_v27  ;;  %v2405_v9 = vsel %vm6812_vm14, %v2403_v48, %v2404_v15  ;;  %v3754_v27 = vrot.slane %v2977_v61, 5  ;;  %v6313_v21 = vld [vmem:[#allocation2 + $0x9c] sm:$0xff]  ;;  %v3336_v15 = vrot.slane %v3334_v33, 4  ;;  %v3397_v49 = vunpack.c.l.b16 %v3309_v24 }
 0x27d   : > { %v2402_v61 = vsel %vm6812_vm14, %v5936_v10, %v2401_v63  ;;  %v3323_v20 = vrot.slane %v3321_v7, 4 }
 0x27e   : > { %v3755_v48 = vsel %vm6812_vm14, %v3753_v12, %v3754_v27  ;;  %v3416_v14 = vpack.c.b16 %v3398_v41, %v3397_v49  ;;  %v3326_v12 = vrot.slane %v3324_v35, 5 }
 0x27f   : > { %v2841_v23 = vpop.f32.mrf.mxu2  ;;  %v3800_v37 = vunpack.c.l.b16 %v3755_v48 }
 0x280   : > { %v2911_v19 = vadd.f32 %v2841_v23, %v2621_v31  ;;  %v7656_v31 = vrot.slane %v3330_v3, 5  ;;  %v7658_v23 = vpop.f32.mrf.mxu0  ;;  %v2449_v3 = vunpack.c.l.b16 %v2402_v61  ;;  %v2271_v61 = vld [vmem:[#allocation2 + $0xa8] sm:$0xe] }
 0x281   : > { %v2556_v1 = vpop.f32.mrf.mxu1  ;;  %v3504_v60 = vpop.f32.mrf.mxu3 }
 0x282   : > { %v2623_v0 = vadd.f32 %v2556_v1, %v7114_v2  ;;  %v7652_v18 = vadd.f32 %v3499_v43, %v2911_v19  ;;  %v2450_v2 = vunpack.c.l.b16 %v2405_v9  ;;  %v3752_v43 = vsel %vm6812_vm14, %v6082_v62, %v3751_v52  ;;  %v6410_v62 = vld [vmem:[#allocation2 + $0xac] sm:$0xf] }
 0x283   : > { %v3337_v33 = vor.u32 %v3336_v15, %v7656_v31  ;;  %v3799_v1 = vunpack.c.l.b16 %v3752_v43  ;;  %v3327_v52 = vor.u32 %v3326_v12, %v3323_v20  ;;  %v2408_v41 = vrot.slane %v6410_v62, 5 }
 0x284   : > { %8350 = vst [vmem:[#allocation43_spill] sm:$0xff] %v7652_v18  ;;  %6043 = vmatmul.msk.bf16.gmra.mxu2 %vm736_vm11, %v6313_v21  ;;  %v2468_v10 = vpack.c.b16 %v2450_v2, %v2449_v3  ;;  %v3340_v21 = vshll.u32 %v2980_v32, 16  ;;  %v3758_v15 = vrot.slane %v7640_v50, 5  ;;  %v6411_v3 = vld [vmem:[#allocation2 + $0xb0] sm:$0x1] }
 0x285   : > { %v3818_v27 = vpack.c.b16 %v3800_v37, %v3799_v1  ;;  %v3338_v35 = vrot.slane %v3337_v33, 4  ;;  %v2410_v43 = vrot.slane %v2408_v41, 4  ;;  %v3608_v37 = vld [vmem:[#allocation2 + $0xb4] sm:$0xe]  ;;  %v2411_v33 = vrot.slane %v6411_v3, 5  ;;  %v6314_v3 = vld [vmem:[#allocation2 + $0xa8] sm:$0xff] }
 0x286   : > { %6066 = vmatmul.msk.bf16.gmra.mxu3 %vm736_vm11, %v3416_v14  ;;  %v3342_v49 = vrot.slane %v3340_v21, 5  ;;  %v2981_v14 = vld [vmem:[#allocation2 + $0xc0] sm:$0xf]  ;;  %v3760_v20 = vrot.slane %v3758_v15, 4  ;;  %v5937_v1 = vrot.slane %v2271_v61, 9 }
 0x287   : > { %v2844_v19 = vpop.f32.mrf.mxu2 }
 0x288   : > { %v2912_v24 = vadd.f32 %v2844_v19, %v2622_v25  ;;  %v7673_v25 = vld [vmem:[#allocation2 + $0xc4] sm:$0xf]  ;;  %v7675_v2 = vpop.f32.mrf.mxu0 }
 0x289   : > { %v2559_v63 = vpop.f32.mrf.mxu1  ;;  %v3507_v7 = vpop.f32.mrf.mxu3  ;;  %v3354_v50 = vshll.u32 %v7673_v25, 16  ;;  %v3358_v12 = vshrl.u32 %v7673_v25, 16 }
 0x28a   : > { %v2624_v9 = vadd.f32 %v2559_v63, %v7124_v11  ;;  %v7668_v48 = vadd.f32 %v3502_v57, %v2912_v24  ;;  %v3328_v11 = vrot.slane %v3327_v52, 4  ;;  %v3343_v57 = vsel %vm6840_vm15, %v3338_v35, %v3342_v49 }
 0x28b   : > { %6104 = vmatmul.msk.bf16.gmra.mxu0 %vm736_vm11, %v3818_v27  ;;  %v3761_v24 = vrot.slane %v2980_v32, 5  ;;  %v3345_v27 = vshrl.u32 %v2981_v14, 16  ;;  %v3348_v52 = vshll.u32 %v2981_v14, 16  ;;  %v3400_v35 = vunpack.c.l.b16 %v3343_v57 }
 0x28c   : > { %8351 = vst [vmem:[#allocation44_spill] sm:$0xff] %v7668_v48  ;;  %5958 = vmatmul.msk.bf16.gmra.mxu1 %vm736_vm11, %v2468_v10  ;;  %v3333_v21 = vsel %vm6840_vm15, %v3328_v11, %v7656_v31  ;;  %v2412_v49 = vsel %vm6812_vm14, %v2410_v43, %v2411_v33  ;;  %v6083_v48 = vrot.slane %v3608_v37, 9  ;;  %v3356_v32 = vrot.slane %v3354_v50, 5  ;;  %v2983_v37 = vld [vmem:[#allocation2 + $0xc8] sm:$0x1] }
 0x28d   : > { %v3399_v58 = vunpack.c.l.b16 %v3333_v21  ;;  %v3347_v11 = vrot.slane %v3345_v27, 4  ;;  %v3350_v43 = vrot.slane %v3348_v52, 5  ;;  %v2452_v14 = vunpack.c.l.b16 %v2412_v49 }
 0x28e   : > { %v3759_v31 = vsel %vm6812_vm14, %v6083_v48, %v3758_v15 }
 0x28f   : > { %v2846_v19 = vpop.f32.mrf.mxu2 }
 0x290   : > { %v2913_v63 = vadd.f32 %v2846_v19, %v2623_v0  ;;  %v3762_v0 = vsel %vm6812_vm14, %v3760_v20, %v3761_v24  ;;  %v3360_v19 = vrot.slane %v3358_v12, 4  ;;  %v7696_v20 = vpop.f32.mrf.mxu0  ;;  %v3801_v24 = vunpack.c.l.b16 %v3759_v31  ;;  %v2272_v31 = vld [vmem:[#allocation2 + $0xb4] sm:$0xe] }
 0x291   : > { %v2561_v10 = vpop.f32.mrf.mxu1  ;;  %v3509_v61 = vpop.f32.mrf.mxu3  ;;  %v3802_v57 = vunpack.c.l.b16 %v3762_v0  ;;  %v3765_v0 = vrot.slane %v7673_v25, 5 }
 0x292   : > { %v2625_v62 = vadd.f32 %v2561_v10, %v7155_v36  ;;  %v7687_v18 = vadd.f32 %v3504_v60, %v2913_v63  ;;  %v2409_v36 = vsel %vm6812_vm14, %v5937_v1, %v2408_v41  ;;  %v3417_v60 = vpack.c.b16 %v3400_v35, %v3399_v58  ;;  %v6412_v58 = vld [vmem:[#allocation2 + $0xb8] sm:$0xf] }
 0x293   : > { %v3361_v33 = vor.u32 %v3360_v19, %v3356_v32  ;;  %v3364_v63 = vshll.u32 %v2983_v37, 16  ;;  %v2451_v12 = vunpack.c.l.b16 %v2409_v36  ;;  %v3351_v1 = vor.u32 %v3350_v43, %v3347_v11 }
 0x294   : > { %6044 = vmatmul.msk.bf16.gmra.mxu2 %vm736_vm11, %v6314_v3  ;;  %v3819_v21 = vpack.c.b16 %v3802_v57, %v3801_v24  ;;  %v2415_v27 = vrot.slane %v6412_v58, 5  ;;  %v3767_v43 = vrot.slane %v3765_v0, 4  ;;  %v4288_v58 = vld [vmem:[#allocation2 + $0x1c] sm:$0xf] }
 0x295   : > { %v2469_v15 = vpack.c.b16 %v2452_v14, %v2451_v12  ;;  %v3362_v49 = vrot.slane %v3361_v33, 4  ;;  %v3366_v3 = vrot.slane %v3364_v63, 5  ;;  %v3352_v19 = vrot.slane %v3351_v1, 4  ;;  %v6413_v33 = vld [vmem:[#allocation2 + $0xbc] sm:$0x1]  ;;  %v6315_v1 = vld [vmem:[#allocation2 + $0xb4] sm:$0xff] }
 0x296   : > { %6067 = vmatmul.msk.bf16.gmra.mxu3 %vm736_vm11, %v3417_v60  ;;  %v2417_v36 = vrot.slane %v2415_v27, 4  ;;  %v2418_v63 = vrot.slane %v6413_v33, 5  ;;  %v4945_v33 = vld [vmem:[#allocation2 + $0x18] sm:$0xe] }
 0x297   : > { %v2849_v50 = vpop.f32.mrf.mxu2  ;;  %v3357_v25 = vsel %vm6840_vm15, %v3352_v19, %v3356_v32  ;;  %v5011_v19 = vrot.slane %v4288_v58, 5 }
 0x298   : > { %v2914_v10 = vadd.f32 %v2849_v50, %v2624_v9  ;;  %v3609_v9 = vld [vmem:[#allocation2 + $0xc0] sm:$0xe]  ;;  %v7709_v50 = vpop.f32.mrf.mxu0 }
 0x299   : > { %v2564_v41 = vpop.f32.mrf.mxu1  ;;  %v3512_v35 = vpop.f32.mrf.mxu3  ;;  %v6084_v11 = vrot.slane %v3609_v9, 9 }
 0x29a   : > { %v2626_v48 = vadd.f32 %v2564_v41, %v7188_v26  ;;  %v7700_v52 = vadd.f32 %v3507_v7, %v2914_v10  ;;  %v3367_v26 = vsel %vm6840_vm15, %v3362_v49, %v3366_v3  ;;  %v3768_v7 = vrot.slane %v2983_v37, 5 }
 0x29b   : > { %6105 = vmatmul.msk.bf16.gmra.mxu0 %vm736_vm11, %v3819_v21  ;;  %v3402_v24 = vunpack.c.l.b16 %v3367_v26  ;;  %v5938_v10 = vrot.slane %v2272_v31, 9  ;;  %v2419_v37 = vsel %vm6812_vm14, %v2417_v36, %v2418_v63  ;;  %v3401_v21 = vunpack.c.l.b16 %v3357_v25 }
 0x29c   : > { %5959 = vmatmul.msk.bf16.gmra.mxu1 %vm736_vm11, %v2469_v15  ;;  %v3769_v32 = vsel %vm6812_vm14, %v3767_v43, %v3768_v7  ;;  %v2454_v49 = vunpack.c.l.b16 %v2419_v37  ;;  %v4345_v63 = vshll.u32 %v4288_v58, 16 }
 0x29d   : > { %v3804_v9 = vunpack.c.l.b16 %v3769_v32 }
 0x29e   : > { %v4347_v32 = vrot.slane %v4345_v63, 5 }
 0x29f   : > { %v2851_v60 = vpop.f32.mrf.mxu2 }
 0x2a0   : > { %v2915_v14 = vadd.f32 %v2851_v60, %v2625_v62  ;;  %v3766_v62 = vsel %vm6812_vm14, %v6084_v11, %v3765_v0  ;;  %v4289_v60 = vld [vmem:[#allocation2 + $0x20] sm:$0x1]  ;;  %v7727_v25 = vpop.f32.mrf.mxu0 }
 0x2a1   : > { %v2566_v57 = vpop.f32.mrf.mxu1  ;;  %v3514_v15 = vpop.f32.mrf.mxu3  ;;  %v3803_v3 = vunpack.c.l.b16 %v3766_v62 }
 0x2a2   : > { %v2627_v12 = vadd.f32 %v2566_v57, %v7220_v42  ;;  %v7712_v41 = vadd.f32 %v3509_v61, %v2915_v14  ;;  %v2416_v42 = vsel %vm6812_vm14, %v5938_v10, %v2415_v27  ;;  %v3418_v61 = vpack.c.b16 %v3402_v24, %v3401_v21  ;;  %v4287_v10 = vld [vmem:[#allocation2 + $0x18] sm:$0xf] }
 0x2a3   : > { %v2453_v36 = vunpack.c.l.b16 %v2416_v42  ;;  %v3820_v7 = vpack.c.b16 %v3804_v9, %v3803_v3  ;;  %v5013_v27 = vrot.slane %v5011_v19, 4  ;;  %v4349_v24 = vshrl.u32 %v4288_v58, 16 }
 0x2a4   : > { %6045 = vmatmul.msk.bf16.gmra.mxu2 %vm736_vm11, %v6315_v1  ;;  %v6215_v1 = vrot.slane %v4945_v33, 9  ;;  %v4339_v62 = vshll.u32 %v4287_v10, 16 }
 0x2a5   : > { %v2470_v43 = vpack.c.b16 %v2454_v49, %v2453_v36  ;;  %v4351_v21 = vrot.slane %v4349_v24, 4 }
 0x2a6   : > { %6068 = vmatmul.msk.bf16.gmra.mxu3 %vm736_vm11, %v3418_v61  ;;  %v5012_v49 = vsel %vm6812_vm14, %v6215_v1, %v5011_v19  ;;  %v6320_v1 = vld [vmem:[#allocation2 + $0x18] sm:$0xff] }
 0x2a7   : > { %v2854_v26 = vpop.f32.mrf.mxu2 }
 0x2a8   : > { %v2916_v0 = vadd.f32 %v2854_v26, %v2626_v48  ;;  %v5014_v48 = vrot.slane %v4289_v60, 5  ;;  %v6316_v26 = vld [vmem:[#allocation2 + $0xc0] sm:$0xff] }
 0x2a9   : > { %v2569_v31 = vpop.f32.mrf.mxu1  ;;  %v3517_v57 = vpop.f32.mrf.mxu3 }
 0x2aa   : > { %v2628_v11 = vadd.f32 %v2569_v31, %v7239_v16  ;;  %v7725_v14 = vadd.f32 %v3512_v35, %v2916_v0  ;;  %v5015_v16 = vsel %vm6812_vm14, %v5013_v27, %v5014_v48  ;;  %v4336_v35 = vshrl.u32 %v4287_v10, 16  ;;  %v4291_v27 = vld [vmem:[#allocation2 + $0x28] sm:$0xf] }
 0x2ab   : > { %6106 = vmatmul.msk.bf16.gmra.mxu0 %vm736_vm11, %v3820_v7  ;;  %v5125_v9 = vunpack.c.l.b16 %v5015_v16  ;;  %v5124_v0 = vunpack.c.l.b16 %v5012_v49  ;;  %v4352_v7 = vor.u32 %v4351_v21, %v4347_v32  ;;  %v5018_v63 = vrot.slane %v4291_v27, 5 }
 0x2ac   : > { %5960 = vmatmul.msk.bf16.gmra.mxu1 %vm736_vm11, %v2470_v43  ;;  %v4338_v31 = vrot.slane %v4336_v35, 4  ;;  %v4341_v43 = vrot.slane %v4339_v62, 5  ;;  %v4369_v49 = vshll.u32 %v4291_v27, 16 }
 0x2ad   : > { %v5156_v33 = vpack.c.b16 %v5125_v9, %v5124_v0  ;;  %v5020_v21 = vrot.slane %v5018_v63, 4  ;;  %v4373_v9 = vshrl.u32 %v4291_v27, 16 }
 0x2ae   : > { %v4342_v19 = vor.u32 %v4341_v43, %v4338_v31 }
 0x2af   : > { %v2856_v37 = vpop.f32.mrf.mxu2 }
 0x2b0   : > { %v2917_v42 = vadd.f32 %v2856_v37, %v2627_v12  ;;  %v4355_v12 = vshll.u32 %v4289_v60, 16  ;;  %v4292_v37 = vld [vmem:[#allocation2 + $0x2c] sm:$0x1]  ;;  %v4343_v60 = vrot.slane %v4342_v19, 4 }
 0x2b1   : > { %v2571_v61 = vpop.f32.mrf.mxu1  ;;  %v3519_v36 = vpop.f32.mrf.mxu3 }
 0x2b2   : > { %v2629_v3 = vadd.f32 %v2571_v61, %v7255_v28  ;;  %v7736_v58 = vadd.f32 %v3514_v15, %v2917_v42  ;;  %v4353_v28 = vrot.slane %v4352_v7, 4  ;;  %v4357_v16 = vrot.slane %v4355_v12, 5  ;;  %v4946_v61 = vld [vmem:[#allocation2 + $0x24] sm:$0xe] }
 0x2b3   : > { %v6216_v31 = vrot.slane %v4946_v61, 9  ;;  %v4371_v12 = vrot.slane %v4369_v49, 5  ;;  %v4379_v49 = vshll.u32 %v4292_v37, 16 }
 0x2b4   : > { %6046 = vmatmul.msk.bf16.gmra.mxu2 %vm736_vm11, %v6316_v26  ;;  %v4358_v42 = vsel %vm6840_vm15, %v4353_v28, %v4357_v16  ;;  %v4290_v26 = vld [vmem:[#allocation2 + $0x24] sm:$0xf] }
 0x2b5   : > { %v4723_v0 = vunpack.c.l.b16 %v4358_v42  ;;  %v4360_v7 = vshrl.u32 %v4290_v26, 16  ;;  %v5019_v27 = vsel %vm6812_vm14, %v6216_v31, %v5018_v63 }
 0x2b6   : > { %6237 = vmatmul.msk.bf16.vlgmr.msra.gmra.mxu3 %vm736_vm11, %v5156_v33  ;;  %v4363_v33 = vshll.u32 %v4290_v26, 16  ;;  %v5126_v42 = vunpack.c.l.b16 %v5019_v27  ;;  %v4294_v26 = vld [vmem:[#allocation2 + $0x34] sm:$0xf] }
 0x2b7   : > { %v2859_v24 = vpop.f32.mrf.mxu2  ;;  %v4393_v27 = vshll.u32 %v4294_v26, 16 }
 0x2b8   : > { %v2918_v48 = vadd.f32 %v2859_v24, %v2628_v11  ;;  %v5021_v11 = vrot.slane %v4292_v37, 5  ;;  %v4375_v24 = vrot.slane %v4373_v9, 4  ;;  %v4365_v61 = vrot.slane %v4363_v33, 5 }
 0x2b9   : > { %v2574_v15 = vpop.f32.mrf.mxu1  ;;  %v3522_v62 = vpop.f32.mrf.mxu3  ;;  %v5025_v9 = vrot.slane %v4294_v26, 5 }
 0x2ba   : > { %v2630_v10 = vadd.f32 %v2574_v15, %v7268_v38  ;;  %v7741_v35 = vadd.f32 %v3517_v57, %v2918_v48  ;;  %v4348_v38 = vsel %vm6840_vm15, %v4343_v60, %v4347_v32  ;;  %v5022_v57 = vsel %vm6812_vm14, %v5020_v21, %v5021_v11 }
 0x2bb   : > { %v4722_v48 = vunpack.c.l.b16 %v4348_v38  ;;  %v4362_v21 = vrot.slane %v4360_v7, 4  ;;  %v4376_v11 = vor.u32 %v4375_v24, %v4371_v12  ;;  %v4295_v7 = vld [vmem:[#allocation2 + $0x38] sm:$0x1] }
 0x2bc   : > { %6177 = vmatmul.msk.bf16.vlgmr.msra.gmra.mxu1 %vm736_vm11, %v6320_v1  ;;  %v5127_v1 = vunpack.c.l.b16 %v5022_v57 }
 0x2bd   : > { %v4754_v60 = vpack.c.b16 %v4723_v0, %v4722_v48  ;;  %v4366_v63 = vor.u32 %v4365_v61, %v4362_v21  ;;  %v6321_v0 = vld [vmem:[#allocation2 + $0x24] sm:$0xff]  ;;  %v4947_v48 = vld [vmem:[#allocation2 + $0x30] sm:$0xe] }
 0x2be   : > { %v6217_v21 = vrot.slane %v4947_v48, 9 }
 0x2bf   : > { %v2861_v43 = vpop.f32.mrf.mxu2  ;;  %v4367_v37 = vrot.slane %v4366_v63, 4 }
 0x2c0   : > { %v2919_v19 = vadd.f32 %v2861_v43, %v2629_v3  ;;  %v5157_v3 = vpack.c.b16 %v5127_v1, %v5126_v42  ;;  %v4381_v43 = vrot.slane %v4379_v49, 5  ;;  %v4397_v1 = vshrl.u32 %v4294_v26, 16 }
 0x2c1   : > { %v2576_v28 = vpop.f32.mrf.mxu1  ;;  %v3524_v16 = vpop.f32.mrf.mxu3  ;;  %v4395_v49 = vrot.slane %v4393_v27, 5  ;;  %v5026_v26 = vsel %vm6812_vm14, %v6217_v21, %v5025_v9  ;;  %v4403_v27 = vshll.u32 %v4295_v7, 16 }
 0x2c2   : > { %v2631_v15 = vadd.f32 %v2576_v28, %v7285_v56  ;;  %v7753_v32 = vadd.f32 %v3519_v36, %v2919_v19  ;;  %v4377_v56 = vrot.slane %v4376_v11, 4  ;;  %v5027_v19 = vrot.slane %v5025_v9, 4 }
 0x2c4   : > { %6199 = vmatmul.msk.bf16.vlgmr.msra.gmra.mxu2 %vm736_vm11, %v4754_v60  ;;  %v4382_v28 = vsel %vm6840_vm15, %v4377_v56, %v4381_v43  ;;  %v4293_v60 = vld [vmem:[#allocation2 + $0x30] sm:$0xf] }
 0x2c5   : > { %v4725_v42 = vunpack.c.l.b16 %v4382_v28  ;;  %v4384_v11 = vshrl.u32 %v4293_v60, 16  ;;  %v5128_v28 = vunpack.c.l.b16 %v5026_v26 }
 0x2c6   : > { %6238 = vmatmul.msk.bf16.gmra.mxu3 %vm736_vm11, %v5157_v3  ;;  %v4387_v3 = vshll.u32 %v4293_v60, 16  ;;  %v4297_v60 = vld [vmem:[#allocation2 + $0x40] sm:$0xf] }
 0x2c7   : > { %v2864_v38 = vpop.f32.mrf.mxu2  ;;  %v4417_v26 = vshll.u32 %v4297_v60, 16 }
 0x2c8   : > { %v2920_v31 = vadd.f32 %v2864_v38, %v2630_v10  ;;  %v5028_v10 = vrot.slane %v4295_v7, 5  ;;  %v4399_v38 = vrot.slane %v4397_v1, 4  ;;  %v4389_v48 = vrot.slane %v4387_v3, 5 }
 0x2c9   : > { %v2579_v36 = vpop.f32.mrf.mxu1  ;;  %v3527_v24 = vpop.f32.mrf.mxu3  ;;  %v5032_v1 = vrot.slane %v4297_v60, 5 }
 0x2ca   : > { %v2632_v57 = vadd.f32 %v2579_v36, %v7298_v54  ;;  %v7758_v33 = vadd.f32 %v3522_v62, %v2920_v31  ;;  %v4372_v54 = vsel %vm6840_vm15, %v4367_v37, %v4371_v12  ;;  %v5029_v62 = vsel %vm6812_vm14, %v5027_v19, %v5028_v10 }
 0x2cb   : > { %v4724_v31 = vunpack.c.l.b16 %v4372_v54  ;;  %v4386_v19 = vrot.slane %v4384_v11, 4  ;;  %v4400_v10 = vor.u32 %v4399_v38, %v4395_v49  ;;  %v4298_v11 = vld [vmem:[#allocation2 + $0x44] sm:$0x1] }
 0x2cc   : > { %6178 = vmatmul.msk.bf16.gmra.mxu1 %vm736_vm11, %v6321_v0  ;;  %v5129_v0 = vunpack.c.l.b16 %v5029_v62 }
 0x2cd   : > { %v4755_v37 = vpack.c.b16 %v4725_v42, %v4724_v31  ;;  %v4390_v9 = vor.u32 %v4389_v48, %v4386_v19  ;;  %v6322_v42 = vld [vmem:[#allocation2 + $0x30] sm:$0xff]  ;;  %v4948_v31 = vld [vmem:[#allocation2 + $0x3c] sm:$0xe] }
 0x2ce   : > { %v6218_v19 = vrot.slane %v4948_v31, 9 }
 0x2cf   : > { %v2866_v61 = vpop.f32.mrf.mxu2  ;;  %v4391_v7 = vrot.slane %v4390_v9, 4 }
 0x2d0   : > { %v2921_v63 = vadd.f32 %v2866_v61, %v2631_v15  ;;  %v5158_v15 = vpack.c.b16 %v5129_v0, %v5128_v28  ;;  %v4405_v61 = vrot.slane %v4403_v27, 5  ;;  %v4421_v0 = vshrl.u32 %v4297_v60, 16 }
 0x2d1   : > { %v2581_v56 = vpop.f32.mrf.mxu1  ;;  %v3529_v43 = vpop.f32.mrf.mxu3  ;;  %v4419_v27 = vrot.slane %v4417_v26, 5  ;;  %v5033_v60 = vsel %vm6812_vm14, %v6218_v19, %v5032_v1  ;;  %v4427_v26 = vshll.u32 %v4298_v11, 16 }
 0x2d2   : > { %v2633_v36 = vadd.f32 %v2581_v56, %v7315_v4  ;;  %v7770_v12 = vadd.f32 %v3524_v16, %v2921_v63  ;;  %v4401_v4 = vrot.slane %v4400_v10, 4  ;;  %v5034_v63 = vrot.slane %v5032_v1, 4 }
 0x2d4   : > { %6200 = vmatmul.msk.bf16.gmra.mxu2 %vm736_vm11, %v4755_v37  ;;  %v4406_v56 = vsel %vm6840_vm15, %v4401_v4, %v4405_v61  ;;  %v4296_v37 = vld [vmem:[#allocation2 + $0x3c] sm:$0xf] }
 0x2d5   : > { %v4727_v28 = vunpack.c.l.b16 %v4406_v56  ;;  %v4408_v10 = vshrl.u32 %v4296_v37, 16  ;;  %v5130_v56 = vunpack.c.l.b16 %v5033_v60 }
 0x2d6   : > { %6239 = vmatmul.msk.bf16.gmra.mxu3 %vm736_vm11, %v5158_v15  ;;  %v4411_v15 = vshll.u32 %v4296_v37, 16  ;;  %v4300_v37 = vld [vmem:[#allocation2 + $0x4c] sm:$0xf] }
 0x2d7   : > { %v2869_v54 = vpop.f32.mrf.mxu2  ;;  %v4441_v60 = vshll.u32 %v4300_v37, 16 }
 0x2d8   : > { %v2922_v21 = vadd.f32 %v2869_v54, %v2632_v57  ;;  %v5035_v57 = vrot.slane %v4298_v11, 5  ;;  %v4423_v54 = vrot.slane %v4421_v0, 4  ;;  %v4413_v31 = vrot.slane %v4411_v15, 5 }
 0x2d9   : > { %v2584_v16 = vpop.f32.mrf.mxu1  ;;  %v3532_v38 = vpop.f32.mrf.mxu3  ;;  %v5039_v0 = vrot.slane %v4300_v37, 5 }
 0x2da   : > { %v2634_v62 = vadd.f32 %v2584_v16, %v7328_v8  ;;  %v7775_v3 = vadd.f32 %v3527_v24, %v2922_v21  ;;  %v4396_v8 = vsel %vm6840_vm15, %v4391_v7, %v4395_v49  ;;  %v5036_v24 = vsel %vm6812_vm14, %v5034_v63, %v5035_v57 }
 0x2db   : > { %v4726_v21 = vunpack.c.l.b16 %v4396_v8  ;;  %v4410_v63 = vrot.slane %v4408_v10, 4  ;;  %v4424_v57 = vor.u32 %v4423_v54, %v4419_v27  ;;  %v4301_v10 = vld [vmem:[#allocation2 + $0x50] sm:$0x1] }
 0x2dc   : > { %6179 = vmatmul.msk.bf16.gmra.mxu1 %vm736_vm11, %v6322_v42  ;;  %v5131_v42 = vunpack.c.l.b16 %v5036_v24 }
 0x2dd   : > { %v4756_v7 = vpack.c.b16 %v4727_v28, %v4726_v21  ;;  %v4414_v1 = vor.u32 %v4413_v31, %v4410_v63  ;;  %v6323_v28 = vld [vmem:[#allocation2 + $0x3c] sm:$0xff]  ;;  %v4949_v21 = vld [vmem:[#allocation2 + $0x48] sm:$0xe] }
 0x2de   : > { %v6219_v63 = vrot.slane %v4949_v21, 9 }
 0x2df   : > { %v2871_v48 = vpop.f32.mrf.mxu2  ;;  %v4415_v11 = vrot.slane %v4414_v1, 4 }
 0x2e0   : > { %v2923_v9 = vadd.f32 %v2871_v48, %v2633_v36  ;;  %v5159_v36 = vpack.c.b16 %v5131_v42, %v5130_v56  ;;  %v4429_v48 = vrot.slane %v4427_v26, 5  ;;  %v4445_v42 = vshrl.u32 %v4300_v37, 16 }
 0x2e1   : > { %v2586_v4 = vpop.f32.mrf.mxu1  ;;  %v3534_v61 = vpop.f32.mrf.mxu3  ;;  %v4443_v26 = vrot.slane %v4441_v60, 5  ;;  %v5040_v37 = vsel %vm6812_vm14, %v6219_v63, %v5039_v0  ;;  %v4451_v60 = vshll.u32 %v4301_v10, 16 }
 0x2e2   : > { %v2635_v16 = vadd.f32 %v2586_v4, %v7345_v45  ;;  %v7787_v49 = vadd.f32 %v3529_v43, %v2923_v9  ;;  %v4425_v45 = vrot.slane %v4424_v57, 4  ;;  %v5041_v9 = vrot.slane %v5039_v0, 4 }
 0x2e4   : > { %6201 = vmatmul.msk.bf16.gmra.mxu2 %vm736_vm11, %v4756_v7  ;;  %v4430_v4 = vsel %vm6840_vm15, %v4425_v45, %v4429_v48  ;;  %v4299_v7 = vld [vmem:[#allocation2 + $0x48] sm:$0xf] }
 0x2e5   : > { %v4729_v56 = vunpack.c.l.b16 %v4430_v4  ;;  %v4432_v57 = vshrl.u32 %v4299_v7, 16  ;;  %v5132_v4 = vunpack.c.l.b16 %v5040_v37 }
 0x2e6   : > { %6240 = vmatmul.msk.bf16.gmra.mxu3 %vm736_vm11, %v5159_v36  ;;  %v4435_v36 = vshll.u32 %v4299_v7, 16  ;;  %v4303_v7 = vld [vmem:[#allocation2 + $0x58] sm:$0xf] }
 0x2e7   : > { %v2874_v8 = vpop.f32.mrf.mxu2  ;;  %v4465_v37 = vshll.u32 %v4303_v7, 16 }
 0x2e8   : > { %v2924_v19 = vadd.f32 %v2874_v8, %v2634_v62  ;;  %v5042_v62 = vrot.slane %v4301_v10, 5  ;;  %v4447_v8 = vrot.slane %v4445_v42, 4  ;;  %v4437_v21 = vrot.slane %v4435_v36, 5 }
 0x2e9   : > { %v2589_v43 = vpop.f32.mrf.mxu1  ;;  %v3537_v54 = vpop.f32.mrf.mxu3  ;;  %v5046_v42 = vrot.slane %v4303_v7, 5 }
 0x2ea   : > { %v2636_v24 = vadd.f32 %v2589_v43, %v7362_v30  ;;  %v7792_v15 = vadd.f32 %v3532_v38, %v2924_v19  ;;  %v4420_v30 = vsel %vm6840_vm15, %v4415_v11, %v4419_v27  ;;  %v5043_v38 = vsel %vm6812_vm14, %v5041_v9, %v5042_v62 }
 0x2eb   : > { %v4728_v19 = vunpack.c.l.b16 %v4420_v30  ;;  %v4434_v9 = vrot.slane %v4432_v57, 4  ;;  %v4448_v62 = vor.u32 %v4447_v8, %v4443_v26  ;;  %v4304_v57 = vld [vmem:[#allocation2 + $0x5c] sm:$0x1] }
 0x2ec   : > { %6180 = vmatmul.msk.bf16.gmra.mxu1 %vm736_vm11, %v6323_v28  ;;  %v5133_v28 = vunpack.c.l.b16 %v5043_v38 }
 0x2ed   : > { %v4757_v11 = vpack.c.b16 %v4729_v56, %v4728_v19  ;;  %v4438_v0 = vor.u32 %v4437_v21, %v4434_v9  ;;  %v6324_v56 = vld [vmem:[#allocation2 + $0x48] sm:$0xff]  ;;  %v4950_v19 = vld [vmem:[#allocation2 + $0x54] sm:$0xe] }
 0x2ee   : > { %v6220_v9 = vrot.slane %v4950_v19, 9 }
 0x2ef   : > { %v2876_v31 = vpop.f32.mrf.mxu2  ;;  %v4439_v10 = vrot.slane %v4438_v0, 4 }
 0x2f0   : > { %v2925_v1 = vadd.f32 %v2876_v31, %v2635_v16  ;;  %v5160_v16 = vpack.c.b16 %v5133_v28, %v5132_v4  ;;  %v4453_v31 = vrot.slane %v4451_v60, 5  ;;  %v4469_v28 = vshrl.u32 %v4303_v7, 16 }
 0x2f1   : > { %v2591_v45 = vpop.f32.mrf.mxu1  ;;  %v3539_v48 = vpop.f32.mrf.mxu3  ;;  %v4467_v60 = vrot.slane %v4465_v37, 5  ;;  %v5047_v7 = vsel %vm6812_vm14, %v6220_v9, %v5046_v42  ;;  %v4475_v37 = vshll.u32 %v4304_v57, 16 }
 0x2f2   : > { %v2637_v43 = vadd.f32 %v2591_v45, %v7378_v47  ;;  %v7804_v27 = vadd.f32 %v3534_v61, %v2925_v1  ;;  %v4449_v47 = vrot.slane %v4448_v62, 4  ;;  %v5048_v1 = vrot.slane %v5046_v42, 4 }
 0x2f4   : > { %6202 = vmatmul.msk.bf16.gmra.mxu2 %vm736_vm11, %v4757_v11  ;;  %v4454_v45 = vsel %vm6840_vm15, %v4449_v47, %v4453_v31  ;;  %v4302_v11 = vld [vmem:[#allocation2 + $0x54] sm:$0xf] }
 0x2f5   : > { %v4731_v4 = vunpack.c.l.b16 %v4454_v45  ;;  %v4456_v62 = vshrl.u32 %v4302_v11, 16  ;;  %v5134_v45 = vunpack.c.l.b16 %v5047_v7 }
 0x2f6   : > { %6241 = vmatmul.msk.bf16.gmra.mxu3 %vm736_vm11, %v5160_v16  ;;  %v4459_v16 = vshll.u32 %v4302_v11, 16  ;;  %v4306_v11 = vld [vmem:[#allocation2 + $0x64] sm:$0xf] }
 0x2f7   : > { %v2879_v30 = vpop.f32.mrf.mxu2  ;;  %v4489_v7 = vshll.u32 %v4306_v11, 16 }
 0x2f8   : > { %v2926_v63 = vadd.f32 %v2879_v30, %v2636_v24  ;;  %v5049_v24 = vrot.slane %v4304_v57, 5  ;;  %v4471_v30 = vrot.slane %v4469_v28, 4  ;;  %v4461_v19 = vrot.slane %v4459_v16, 5 }
 0x2f9   : > { %v2594_v61 = vpop.f32.mrf.mxu1  ;;  %v3542_v8 = vpop.f32.mrf.mxu3  ;;  %v5053_v28 = vrot.slane %v4306_v11, 5 }
 0x2fa   : > { %v2638_v38 = vadd.f32 %v2594_v61, %v7395_v34  ;;  %v7809_v36 = vadd.f32 %v3537_v54, %v2926_v63  ;;  %v4444_v34 = vsel %vm6840_vm15, %v4439_v10, %v4443_v26  ;;  %v5050_v54 = vsel %vm6812_vm14, %v5048_v1, %v5049_v24 }
 0x2fb   : > { %v4730_v63 = vunpack.c.l.b16 %v4444_v34  ;;  %v4458_v1 = vrot.slane %v4456_v62, 4  ;;  %v4472_v24 = vor.u32 %v4471_v30, %v4467_v60  ;;  %v4307_v62 = vld [vmem:[#allocation2 + $0x68] sm:$0x1] }
 0x2fc   : > { %6181 = vmatmul.msk.bf16.gmra.mxu1 %vm736_vm11, %v6324_v56  ;;  %v5135_v56 = vunpack.c.l.b16 %v5050_v54 }
 0x2fd   : > { %v4758_v10 = vpack.c.b16 %v4731_v4, %v4730_v63  ;;  %v4462_v42 = vor.u32 %v4461_v19, %v4458_v1  ;;  %v6325_v4 = vld [vmem:[#allocation2 + $0x54] sm:$0xff]  ;;  %v4951_v63 = vld [vmem:[#allocation2 + $0x60] sm:$0xe] }
 0x2fe   : > { %v6221_v1 = vrot.slane %v4951_v63, 9 }
 0x2ff   : > { %v2881_v21 = vpop.f32.mrf.mxu2  ;;  %v4463_v57 = vrot.slane %v4462_v42, 4 }
 0x300   : > { %v2927_v0 = vadd.f32 %v2881_v21, %v2637_v43  ;;  %v5161_v43 = vpack.c.b16 %v5135_v56, %v5134_v45  ;;  %v4477_v21 = vrot.slane %v4475_v37, 5  ;;  %v4493_v56 = vshrl.u32 %v4306_v11, 16 }
 0x301   : > { %v2596_v47 = vpop.f32.mrf.mxu1  ;;  %v3544_v31 = vpop.f32.mrf.mxu3  ;;  %v4491_v37 = vrot.slane %v4489_v7, 5  ;;  %v5054_v11 = vsel %vm6812_vm14, %v6221_v1, %v5053_v28  ;;  %v4499_v7 = vshll.u32 %v4307_v62, 16 }
 0x302   : > { %v2639_v61 = vadd.f32 %v2596_v47, %v7414_v44  ;;  %v7821_v26 = vadd.f32 %v3539_v48, %v2927_v0  ;;  %v4473_v44 = vrot.slane %v4472_v24, 4  ;;  %v5055_v0 = vrot.slane %v5053_v28, 4 }
 0x304   : > { %6203 = vmatmul.msk.bf16.gmra.mxu2 %vm736_vm11, %v4758_v10  ;;  %v4478_v47 = vsel %vm6840_vm15, %v4473_v44, %v4477_v21  ;;  %v4305_v10 = vld [vmem:[#allocation2 + $0x60] sm:$0xf] }
 0x305   : > { %v4733_v45 = vunpack.c.l.b16 %v4478_v47  ;;  %v4480_v24 = vshrl.u32 %v4305_v10, 16  ;;  %v5136_v47 = vunpack.c.l.b16 %v5054_v11 }
 0x306   : > { %6242 = vmatmul.msk.bf16.gmra.mxu3 %vm736_vm11, %v5161_v43  ;;  %v4483_v43 = vshll.u32 %v4305_v10, 16  ;;  %v4309_v10 = vld [vmem:[#allocation2 + $0x70] sm:$0xf] }
 0x307   : > { %v2884_v34 = vpop.f32.mrf.mxu2  ;;  %v4513_v11 = vshll.u32 %v4309_v10, 16 }
 0x308   : > { %v2928_v9 = vadd.f32 %v2884_v34, %v2638_v38  ;;  %v5056_v38 = vrot.slane %v4307_v62, 5  ;;  %v4495_v34 = vrot.slane %v4493_v56, 4  ;;  %v4485_v63 = vrot.slane %v4483_v43, 5 }
 0x309   : > { %v2599_v48 = vpop.f32.mrf.mxu1  ;;  %v3547_v30 = vpop.f32.mrf.mxu3  ;;  %v5060_v56 = vrot.slane %v4309_v10, 5 }
 0x30a   : > { %v2640_v54 = vadd.f32 %v2599_v48, %v7430_v53  ;;  %v7826_v16 = vadd.f32 %v3542_v8, %v2928_v9  ;;  %v4468_v53 = vsel %vm6840_vm15, %v4463_v57, %v4467_v60  ;;  %v5057_v8 = vsel %vm6812_vm14, %v5055_v0, %v5056_v38 }
 0x30b   : > { %v4732_v9 = vunpack.c.l.b16 %v4468_v53  ;;  %v4482_v0 = vrot.slane %v4480_v24, 4  ;;  %v4496_v38 = vor.u32 %v4495_v34, %v4491_v37  ;;  %v4310_v24 = vld [vmem:[#allocation2 + $0x74] sm:$0x1] }
 0x30c   : > { %6182 = vmatmul.msk.bf16.gmra.mxu1 %vm736_vm11, %v6325_v4  ;;  %v5137_v4 = vunpack.c.l.b16 %v5057_v8 }
 0x30d   : > { %v4759_v57 = vpack.c.b16 %v4733_v45, %v4732_v9  ;;  %v4486_v28 = vor.u32 %v4485_v63, %v4482_v0  ;;  %v6326_v45 = vld [vmem:[#allocation2 + $0x60] sm:$0xff]  ;;  %v4952_v9 = vld [vmem:[#allocation2 + $0x6c] sm:$0xe] }
 0x30e   : > { %v6222_v0 = vrot.slane %v4952_v9, 9 }
 0x30f   : > { %v2886_v19 = vpop.f32.mrf.mxu2  ;;  %v4487_v62 = vrot.slane %v4486_v28, 4 }
 0x310   : > { %v2929_v42 = vadd.f32 %v2886_v19, %v2639_v61  ;;  %v5162_v61 = vpack.c.b16 %v5137_v4, %v5136_v47  ;;  %v4501_v19 = vrot.slane %v4499_v7, 5  ;;  %v4517_v4 = vshrl.u32 %v4309_v10, 16 }
 0x311   : > { %v2601_v44 = vpop.f32.mrf.mxu1  ;;  %v3549_v21 = vpop.f32.mrf.mxu3  ;;  %v4515_v7 = vrot.slane %v4513_v11, 5  ;;  %v5061_v10 = vsel %vm6812_vm14, %v6222_v0, %v5060_v56  ;;  %v4523_v11 = vshll.u32 %v4310_v24, 16 }
 0x312   : > { %v2641_v48 = vadd.f32 %v2601_v44, %v7447_v51  ;;  %v7838_v60 = vadd.f32 %v3544_v31, %v2929_v42  ;;  %v4497_v51 = vrot.slane %v4496_v38, 4  ;;  %v5062_v42 = vrot.slane %v5060_v56, 4 }
 0x314   : > { %6204 = vmatmul.msk.bf16.gmra.mxu2 %vm736_vm11, %v4759_v57  ;;  %v4502_v44 = vsel %vm6840_vm15, %v4497_v51, %v4501_v19  ;;  %v4308_v57 = vld [vmem:[#allocation2 + $0x6c] sm:$0xf] }
 0x315   : > { %v4735_v47 = vunpack.c.l.b16 %v4502_v44  ;;  %v4504_v38 = vshrl.u32 %v4308_v57, 16  ;;  %v5138_v44 = vunpack.c.l.b16 %v5061_v10  ;;  %v4311_v10 = vld [vmem:[#allocation2 + $0x78] sm:$0xf] }
 0x316   : > { %6243 = vmatmul.msk.bf16.gmra.mxu3 %vm736_vm11, %v5162_v61  ;;  %v4507_v61 = vshll.u32 %v4308_v57, 16  ;;  %v4312_v57 = vld [vmem:[#allocation2 + $0x7c] sm:$0xf] }
 0x317   : > { %v2889_v53 = vpop.f32.mrf.mxu2 }
 0x318   : > { %v2930_v1 = vadd.f32 %v2889_v53, %v2640_v54  ;;  %v5063_v54 = vrot.slane %v4310_v24, 5  ;;  %v4519_v53 = vrot.slane %v4517_v4, 4  ;;  %v4509_v9 = vrot.slane %v4507_v61, 5 }
 0x319   : > { %v2604_v31 = vpop.f32.mrf.mxu1  ;;  %v3552_v34 = vpop.f32.mrf.mxu3  ;;  %v5067_v4 = vrot.slane %v4312_v57, 5 }
 0x31a   : > { %v2642_v8 = vadd.f32 %v2604_v31, %v7469_v13  ;;  %v7843_v43 = vadd.f32 %v3547_v30, %v2930_v1  ;;  %v4492_v13 = vsel %vm6840_vm15, %v4487_v62, %v4491_v37  ;;  %v5064_v30 = vsel %vm6812_vm14, %v5062_v42, %v5063_v54 }
 0x31b   : > { %v4734_v1 = vunpack.c.l.b16 %v4492_v13  ;;  %v4506_v42 = vrot.slane %v4504_v38, 4  ;;  %v4520_v54 = vor.u32 %v4519_v53, %v4515_v7  ;;  %v4313_v38 = vld [vmem:[#allocation2 + $0x80] sm:$0x1] }
 0x31c   : > { %6183 = vmatmul.msk.bf16.gmra.mxu1 %vm736_vm11, %v6326_v45  ;;  %v5139_v45 = vunpack.c.l.b16 %v5064_v30 }
 0x31d   : > { %v4760_v62 = vpack.c.b16 %v4735_v47, %v4734_v1  ;;  %v4510_v56 = vor.u32 %v4509_v9, %v4506_v42  ;;  %v6327_v47 = vld [vmem:[#allocation2 + $0x6c] sm:$0xff]  ;;  %v4528_v9 = vshrl.u32 %v4311_v10, 16 }
 0x31f   : > { %v2891_v63 = vpop.f32.mrf.mxu2  ;;  %v4511_v24 = vrot.slane %v4510_v56, 4 }
 0x320   : > { %v2931_v28 = vadd.f32 %v2891_v63, %v2641_v48  ;;  %v5163_v48 = vpack.c.b16 %v5139_v45, %v5138_v44  ;;  %v4525_v63 = vrot.slane %v4523_v11, 5  ;;  %v4537_v45 = vshll.u32 %v4312_v57, 16 }
 0x321   : > { %v2606_v51 = vpop.f32.mrf.mxu1  ;;  %v3554_v19 = vpop.f32.mrf.mxu3 }
 0x322   : > { %v2643_v31 = vadd.f32 %v2606_v51, %v7485_v22  ;;  %v7855_v37 = vadd.f32 %v3549_v21, %v2931_v28  ;;  %v4521_v22 = vrot.slane %v4520_v54, 4  ;;  %v4953_v28 = vld [vmem:[#allocation2 + $0x78] sm:$0xe]  ;;  %v5069_v51 = vrot.slane %v5067_v4, 4 }
 0x323   : > { %v6223_v44 = vrot.slane %v4953_v28, 9  ;;  %v4531_v54 = vshll.u32 %v4311_v10, 16  ;;  %v4539_v11 = vrot.slane %v4537_v45, 5  ;;  %v4547_v45 = vshll.u32 %v4313_v38, 16 }
 0x324   : > { %6205 = vmatmul.msk.bf16.gmra.mxu2 %vm736_vm11, %v4760_v62  ;;  %v4526_v1 = vsel %vm6840_vm15, %v4521_v22, %v4525_v63  ;;  %v5070_v62 = vrot.slane %v4313_v38, 5 }
 0x325   : > { %v4737_v42 = vunpack.c.l.b16 %v4526_v1  ;;  %v4530_v1 = vrot.slane %v4528_v9, 4  ;;  %v4314_v9 = vld [vmem:[#allocation2 + $0x84] sm:$0xf] }
 0x326   : > { %6244 = vmatmul.msk.bf16.gmra.mxu3 %vm736_vm11, %v5163_v48 }
 0x327   : > { %v2894_v13 = vpop.f32.mrf.mxu2 }
 0x328   : > { %v2932_v0 = vadd.f32 %v2894_v13, %v2642_v8  ;;  %v4541_v8 = vshrl.u32 %v4312_v57, 16  ;;  %v5068_v57 = vsel %vm6812_vm14, %v6223_v44, %v5067_v4 }
 0x329   : > { %v2609_v21 = vpop.f32.mrf.mxu1  ;;  %v3557_v53 = vpop.f32.mrf.mxu3 }
 0x32a   : > { %v2644_v30 = vadd.f32 %v2609_v21, %v7505_v6  ;;  %v7860_v61 = vadd.f32 %v3552_v34, %v2932_v0  ;;  %v4516_v6 = vsel %vm6840_vm15, %v4511_v24, %v4515_v7  ;;  %v5071_v34 = vsel %vm6812_vm14, %v5069_v51, %v5070_v62  ;;  %v8353_v21 = vld [vmem:[#allocation38_spill] sm:$0xff] }
 0x32b   : > { %v4543_v13 = vrot.slane %v4541_v8, 4  ;;  %v4736_v22 = vunpack.c.l.b16 %v4516_v6  ;;  %v5141_v63 = vunpack.c.l.b16 %v5071_v34  ;;  %v4533_v51 = vrot.slane %v4531_v54, 5  ;;  %v6328_v34 = vld [vmem:[#allocation2 + $0x78] sm:$0xff] }
 0x32c   : > { %8352 = vst [vmem:[#allocation45_spill] sm:$0xff] %v7860_v61  ;;  %6184 = vmatmul.msk.bf16.gmra.mxu1 %vm736_vm11, %v6327_v47  ;;  %v5140_v62 = vunpack.c.l.b16 %v5068_v57  ;;  %v4315_v61 = vld [vmem:[#allocation2 + $0x88] sm:$0xf]  ;;  %v4954_v57 = vld [vmem:[#allocation2 + $0x84] sm:$0xe] }
 0x32d   : > { %v4761_v24 = vpack.c.b16 %v4737_v42, %v4736_v22  ;;  %v4544_v10 = vor.u32 %v4543_v13, %v4539_v11  ;;  %v4534_v8 = vor.u32 %v4533_v51, %v4530_v1  ;;  %v5074_v6 = vrot.slane %v4315_v61, 5  ;;  %v4316_v42 = vld [vmem:[#allocation2 + $0x8c] sm:$0x1] }
 0x32e   : > { %v4552_v1 = vshrl.u32 %v4314_v9, 16  ;;  %v4555_v51 = vshll.u32 %v4314_v9, 16 }
 0x32f   : > { %v2896_v48 = vpop.f32.mrf.mxu2  ;;  %v4545_v4 = vrot.slane %v4544_v10, 4  ;;  %v5076_v22 = vrot.slane %v5074_v6, 4 }
 0x330   : > { %v2933_v56 = vadd.f32 %v2896_v48, %v2643_v31  ;;  %v5164_v31 = vpack.c.b16 %v5141_v63, %v5140_v62  ;;  %v4565_v63 = vshrl.u32 %v4315_v61, 16 }
 0x331   : > { %v2611_v0 = vpop.f32.mrf.mxu1  ;;  %v3559_v28 = vpop.f32.mrf.mxu3 }
 0x332   : > { %v2645_v47 = vadd.f32 %v2611_v0, %v8353_v21  ;;  %v7872_v7 = vadd.f32 %v3554_v19, %v2933_v56  ;;  %v4549_v56 = vrot.slane %v4547_v45, 5  ;;  %v4535_v0 = vrot.slane %v4534_v8, 4 }
 0x333   : > { %v4561_v21 = vshll.u32 %v4315_v61, 16 }
 0x334   : > { %8354 = vst [vmem:[#allocation38_spill] sm:$0xff] %v7872_v7  ;;  %6206 = vmatmul.msk.bf16.gmra.mxu2 %vm736_vm11, %v4761_v24  ;;  %v4550_v38 = vsel %vm6840_vm15, %v4545_v4, %v4549_v56  ;;  %v5077_v24 = vrot.slane %v4316_v42, 5  ;;  %v4557_v56 = vrot.slane %v4555_v51, 5  ;;  %v4318_v7 = vld [vmem:[#allocation2 + $0x94] sm:$0xf] }
 0x335   : > { %v4739_v62 = vunpack.c.l.b16 %v4550_v38  ;;  %v4563_v8 = vrot.slane %v4561_v21, 5 }
 0x336   : > { %6245 = vmatmul.msk.bf16.gmra.mxu3 %vm736_vm11, %v5164_v31  ;;  %v5078_v10 = vsel %vm6812_vm14, %v5076_v22, %v5077_v24  ;;  %v3964_v22 = vadd.f32 %v7595_v39, %v7536_v59  ;;  %v4317_v59 = vld [vmem:[#allocation2 + $0x90] sm:$0xf]  ;;  %v6329_v39 = vld [vmem:[#allocation2 + $0x84] sm:$0xff] }
 0x337   : > { %v2899_v48 = vpop.f32.mrf.mxu2 }
 0x338   : > { %v2934_v44 = vadd.f32 %v2899_v48, %v2644_v30  ;;  %v4540_v30 = vsel %vm6840_vm15, %v4535_v0, %v4539_v11  ;;  %v4567_v48 = vrot.slane %v4565_v63, 4  ;;  %v5143_v11 = vunpack.c.l.b16 %v5078_v10 }
 0x339   : > { %v4175_v19 = vpop.f32.mrf.mxu1  ;;  %v5235_v13 = vpop.f32.mrf.mxu3  ;;  %v4738_v45 = vunpack.c.l.b16 %v4540_v30  ;;  %v4571_v63 = vshll.u32 %v4316_v42, 16 }
 0x33a   : > { %v7876_v54 = vadd.f32 %v3557_v53, %v2934_v44  ;;  %v6224_v53 = vrot.slane %v4954_v57, 9  ;;  %v4255_v30 = vadd.f32 %v4175_v19, %v3964_v22 }
 0x33b   : > { %v4762_v9 = vpack.c.b16 %v4739_v62, %v4738_v45  ;;  %v7896_v62 = vld [vmem:[%s8299_s6] ss:$0 sm:$0xff]  ;;  %v4573_v10 = vrot.slane %v4571_v63, 5 }
 0x33c   : > { %8355 = vst [vmem:[#allocation46_spill] sm:$0xff] %v7876_v54  ;;  %6185 = vmatmul.msk.bf16.gmra.mxu1 %vm736_vm11, %v6328_v34  ;;  %v5075_v61 = vsel %vm6812_vm14, %v6224_v53, %v5074_v6  ;;  %v4554_v34 = vrot.slane %v4552_v1, 4  ;;  %v4568_v54 = vor.u32 %v4567_v48, %v4563_v8  ;;  %v5081_v6 = vrot.slane %v4318_v7, 5  ;;  %v4955_v48 = vld [vmem:[#allocation2 + $0x90] sm:$0xe] }
 0x33d   : > { %v5142_v57 = vunpack.c.l.b16 %v5075_v61  ;;  %v4576_v61 = vshrl.u32 %v4317_v59, 16  ;;  %v6225_v22 = vrot.slane %v4955_v48, 9  ;;  %v7911_v48 = vpop.f32.mrf.mxu0 }
 0x33f   : > { %v2901_v31 = vpop.f32.mrf.mxu2  ;;  %v5165_v21 = vpack.c.b16 %v5143_v11, %v5142_v57  ;;  %v3965_v11 = vadd.f32 %v7611_v29, %v7553_v17  ;;  %v4579_v57 = vshll.u32 %v4317_v59, 16  ;;  %v5082_v29 = vsel %vm6812_vm14, %v6225_v22, %v5081_v6 }
 0x340   : > { %v2935_v44 = vadd.f32 %v2901_v31, %v2645_v47  ;;  %v4558_v47 = vor.u32 %v4557_v56, %v4554_v34  ;;  %v4319_v31 = vld [vmem:[#allocation2 + $0x98] sm:$0x1]  ;;  %v4585_v34 = vshll.u32 %v4318_v7, 16  ;;  %v4589_v56 = vshrl.u32 %v4318_v7, 16 }
 0x341   : > { %v4177_v4 = vpop.f32.mrf.mxu1  ;;  %v5237_v38 = vpop.f32.mrf.mxu3  ;;  %v4578_v7 = vrot.slane %v4576_v61, 4  ;;  %v4581_v59 = vrot.slane %v4579_v57, 5  ;;  %v4595_v61 = vshll.u32 %v4319_v31, 16 }
 0x342   : > { %v7887_v0 = vadd.f32 %v3559_v28, %v2935_v44  ;;  %v4569_v28 = vrot.slane %v4568_v54, 4  ;;  %v4559_v53 = vrot.slane %v4558_v47, 4  ;;  %v5083_v44 = vrot.slane %v5081_v6, 4 }
 0x343   : > { %v4256_v47 = vadd.f32 %v4177_v4, %v3965_v11  ;;  %v4582_v11 = vor.u32 %v4581_v59, %v4578_v7 }
 0x344   : > { %6207 = vmatmul.msk.bf16.gmra.mxu2 %vm736_vm11, %v4762_v9  ;;  %v4564_v19 = vsel %vm6840_vm15, %v4559_v53, %v4563_v8  ;;  %v4574_v54 = vsel %vm6840_vm15, %v4569_v28, %v4573_v10  ;;  %v4587_v28 = vrot.slane %v4585_v34, 5  ;;  %v3966_v34 = vadd.f32 %v7632_v55, %v7567_v40  ;;  %v4320_v40 = vld [vmem:[#allocation2 + $0x9c] sm:$0xf]  ;;  %v6330_v55 = vld [vmem:[#allocation2 + $0x90] sm:$0xff] }
 0x345   : > { %v4600_v7 = vshrl.u32 %v4320_v40, 16 }
 0x346   : > { %6246 = vmatmul.msk.bf16.gmra.mxu3 %vm736_vm11, %v5165_v21  ;;  %v4741_v21 = vunpack.c.l.b16 %v4574_v54  ;;  %v4321_v54 = vld [vmem:[#allocation2 + $0xa0] sm:$0xf] }
 0x347   : > { %v4833_v24 = vpop.f32.mrf.mxu2  ;;  %v4609_v59 = vshll.u32 %v4321_v54, 16 }
 0x348   : > { %v4913_v1 = vadd.f32 %v4833_v24, %v4255_v30  ;;  %v4740_v24 = vunpack.c.l.b16 %v4564_v19 }
 0x349   : > { %v4180_v51 = vpop.f32.mrf.mxu1  ;;  %v5240_v42 = vpop.f32.mrf.mxu3 }
 0x34a   : > { %v5315_v45 = vadd.f32 %v5235_v13, %v4913_v1  ;;  %v5084_v13 = vrot.slane %v4319_v31, 5  ;;  %v4591_v1 = vrot.slane %v4589_v56, 4  ;;  %v4763_v10 = vpack.c.b16 %v4741_v21, %v4740_v24  ;;  %v4956_v31 = vld [vmem:[#allocation2 + $0x9c] sm:$0xe] }
 0x34b   : > { %v4583_v21 = vrot.slane %v4582_v11, 4 }
 0x34c   : > { %6186 = vmatmul.msk.bf16.gmra.mxu1 %vm736_vm11, %v6329_v39  ;;  %v5351_v9 = vadd.f32 %v7896_v62, %v5315_v45  ;;  %v5085_v63 = vsel %vm6812_vm14, %v5083_v44, %v5084_v13  ;;  %v5144_v44 = vunpack.c.l.b16 %v5082_v29  ;;  %v4592_v19 = vor.u32 %v4591_v1, %v4587_v28 }
 0x34d   : > { %v5145_v4 = vunpack.c.l.b16 %v5085_v63  ;;  %v4597_v63 = vrot.slane %v4595_v61, 5 }
 0x34e   : > { %v5383_v8 = vmax.f32 %v5351_v9, 0.0  ;;  %v4257_v9 = vadd.f32 %v4180_v51, %v3966_v34  ;;  %v4593_v22 = vrot.slane %v4592_v19, 4  ;;  %v4588_v51 = vsel %vm6840_vm15, %v4583_v21, %v4587_v28  ;;  %v7927_v34 = vpop.f32.mrf.mxu0 }
 0x34f   : > { %v4835_v30 = vpop.f32.mrf.mxu2  ;;  %v5166_v6 = vpack.c.b16 %v5145_v4, %v5144_v44  ;;  %v4613_v4 = vshrl.u32 %v4321_v54, 16  ;;  %v4603_v19 = vshll.u32 %v4320_v40, 16  ;;  %v6226_v28 = vrot.slane %v4956_v31, 9 }
 0x350   : > { %v4914_v53 = vadd.f32 %v4835_v30, %v4256_v47  ;;  %5447 = vrot.lane.b32.xlu0 %v5383_v8, %s6480_s14  ;;  %v4322_v30 = vld [vmem:[#allocation2 + $0xa4] sm:$0x1]  ;;  %v4598_v29 = vsel %vm6840_vm15, %v4593_v22, %v4597_v63  ;;  %v4602_v21 = vrot.slane %v4600_v7, 4 }
 0x351   : > { %v4182_v17 = vpop.f32.mrf.mxu1  ;;  %v5242_v45 = vpop.f32.mrf.mxu3  ;;  %v4605_v40 = vrot.slane %v4603_v19, 5 }
 0x352   : > { %v5316_v39 = vadd.f32 %v5237_v38, %v4914_v53  ;;  %v5088_v38 = vrot.slane %v4321_v54, 5  ;;  %v4615_v54 = vrot.slane %v4613_v4, 4 }
 0x353   : > { %v4606_v4 = vor.u32 %v4605_v40, %v4602_v21 }
 0x354   : > { %6208 = vmatmul.msk.bf16.gmra.mxu2 %vm736_vm11, %v4763_v10  ;;  %v5352_v56 = vadd.f32 %v7896_v62, %v5316_v39  ;;  %v5090_v53 = vrot.slane %v5088_v38, 4  ;;  %v8356_v39 = vld [vmem:[#allocation39_spill] sm:$0xff] }
 0x355   : > { %v3967_v10 = vadd.f32 %v7658_v23, %v8356_v39  ;;  %v8357_v39 = vld [vmem:[#allocation40_spill] sm:$0xff] }
 0x356   : > { %v5384_v13 = vmax.f32 %v5352_v56, 0.0  ;;  %6247 = vmatmul.msk.bf16.gmra.mxu3 %vm736_vm11, %v5166_v6  ;;  %v4743_v6 = vunpack.c.l.b16 %v4598_v29  ;;  %v7938_v19 = vpop.f32.mrf.mxu0 }
 0x357   : > { %v4838_v57 = vpop.f32.mrf.mxu2  ;;  %v4258_v56 = vadd.f32 %v4182_v17, %v3967_v10 }
 0x358   : > { %v4915_v47 = vadd.f32 %v4838_v57, %v4257_v9  ;;  %5449 = vrot.lane.b32.xlu0 %v5384_v13, %s6480_s14  ;;  %v4742_v13 = vunpack.c.l.b16 %v4588_v51  ;;  %v4611_v57 = vrot.slane %v4609_v59, 5  ;;  %v3968_v51 = vadd.f32 %v7675_v2, %v8357_v39 }
 0x359   : > { %v4185_v8 = vpop.f32.mrf.mxu1  ;;  %v5245_v1 = vpop.f32.mrf.mxu3 }
 0x35a   : > { %v5317_v24 = vadd.f32 %v5240_v42, %v4915_v47  ;;  %v5091_v42 = vrot.slane %v4322_v30, 5  ;;  %v5089_v47 = vsel %vm6812_vm14, %v6226_v28, %v5088_v38  ;;  %v4764_v63 = vpack.c.b16 %v4743_v6, %v4742_v13  ;;  %v4323_v6 = vld [vmem:[#allocation2 + $0xa8] sm:$0xf]  ;;  %v4325_v13 = vld [vmem:[#allocation2 + $0xb0] sm:$0x1] }
 0x35b   : > { %v5146_v31 = vunpack.c.l.b16 %v5089_v47  ;;  %v4616_v29 = vor.u32 %v4615_v54, %v4611_v57  ;;  %v4259_v38 = vadd.f32 %v4185_v8, %v3968_v51  ;;  %v4624_v40 = vshrl.u32 %v4323_v6, 16 }
 0x35c   : > { %6187 = vmatmul.msk.bf16.gmra.mxu1 %vm736_vm11, %v6330_v55  ;;  %v5353_v44 = vadd.f32 %v7896_v62, %v5317_v24  ;;  %v5092_v61 = vsel %vm6812_vm14, %v5090_v53, %v5091_v42  ;;  %v4324_v53 = vld [vmem:[#allocation2 + $0xac] sm:$0xf]  ;;  %v4627_v39 = vshll.u32 %v4323_v6, 16 }
 0x35d   : > { %v5147_v55 = vunpack.c.l.b16 %v5092_v61  ;;  %v5095_v42 = vrot.slane %v4324_v53, 5  ;;  %v4617_v28 = vrot.slane %v4616_v29, 4  ;;  %v6331_v61 = vld [vmem:[#allocation2 + $0x9c] sm:$0xff] }
 0x35e   : > { %v5385_v11 = vmax.f32 %v5353_v44, 0.0  ;;  %v4619_v44 = vshll.u32 %v4322_v30, 16  ;;  %v7955_v6 = vpop.f32.mrf.mxu0 }
 0x35f   : > { %v4840_v9 = vpop.f32.mrf.mxu2  ;;  %v5167_v10 = vpack.c.b16 %v5147_v55, %v5146_v31  ;;  %v5097_v47 = vrot.slane %v5095_v42, 4  ;;  %v4633_v55 = vshll.u32 %v4324_v53, 16 }
 0x360   : > { %v4916_v22 = vadd.f32 %v4840_v9, %v4258_v56  ;;  %5451 = vrot.lane.b32.xlu1 %v5385_v11, %s6480_s14  ;;  %v4607_v11 = vrot.slane %v4606_v4, 4  ;;  %v4621_v9 = vrot.slane %v4619_v44, 5 }
 0x361   : > { %v4187_v23 = vpop.f32.mrf.mxu1  ;;  %v5247_v24 = vpop.f32.mrf.mxu3 }
 0x362   : > { %v5318_v17 = vadd.f32 %v5242_v45, %v4916_v22  ;;  %v4612_v8 = vsel %vm6840_vm15, %v4607_v11, %v4611_v57  ;;  %v4957_v22 = vld [vmem:[#allocation2 + $0xa8] sm:$0xe]  ;;  %v4622_v21 = vsel %vm6840_vm15, %v4617_v28, %v4621_v9  ;;  %v4629_v11 = vrot.slane %v4627_v39, 5 }
 0x363   : > { %v6227_v51 = vrot.slane %v4957_v22, 9  ;;  %v4745_v4 = vunpack.c.l.b16 %v4622_v21  ;;  %v8359_v21 = vld [vmem:[#allocation42_spill] sm:$0xff] }
 0x364   : > { %6209 = vmatmul.msk.bf16.gmra.mxu2 %vm736_vm11, %v4764_v63  ;;  %v5354_v59 = vadd.f32 %v7896_v62, %v5318_v17  ;;  %v4637_v17 = vshrl.u32 %v4324_v53, 16  ;;  %v8358_v63 = vld [vmem:[#allocation41_spill] sm:$0xff] }
 0x365   : > { %v3969_v31 = vadd.f32 %v7696_v20, %v8358_v63  ;;  %v5096_v20 = vsel %vm6812_vm14, %v6227_v51, %v5095_v42  ;;  %v4643_v42 = vshll.u32 %v4325_v13, 16 }
 0x366   : > { %v5386_v7 = vmax.f32 %v5354_v59, 0.0  ;;  %6248 = vmatmul.msk.bf16.gmra.mxu3 %vm736_vm11, %v5167_v10  ;;  %v5148_v22 = vunpack.c.l.b16 %v5096_v20  ;;  %v4326_v20 = vld [vmem:[#allocation2 + $0xb4] sm:$0xf] }
 0x367   : > { %v4843_v45 = vpop.f32.mrf.mxu2  ;;  %v4260_v59 = vadd.f32 %v4187_v23, %v3969_v31 }
 0x368   : > { %v4917_v56 = vadd.f32 %v4843_v45, %v4259_v38  ;;  %5453 = vrot.lane.b32.xlu1 %v5386_v7, %s6480_s14  ;;  %v4744_v38 = vunpack.c.l.b16 %v4612_v8  ;;  %v4635_v7 = vrot.slane %v4633_v55, 5  ;;  %v4639_v45 = vrot.slane %v4637_v17, 4  ;;  %v4327_v8 = vld [vmem:[#allocation2 + $0xb8] sm:$0xf] }
 0x369   : > { %v4190_v2 = vpop.f32.mrf.mxu1  ;;  %v5250_v30 = vpop.f32.mrf.mxu3  ;;  %v3970_v55 = vadd.f32 %v7709_v50, %v8359_v21  ;;  %v4651_v21 = vshll.u32 %v4326_v20, 16 }
 0x36a   : > { %v5319_v54 = vadd.f32 %v5245_v1, %v4917_v56  ;;  %v5098_v1 = vrot.slane %v4325_v13, 5  ;;  %v4626_v56 = vrot.slane %v4624_v40, 4  ;;  %v4765_v9 = vpack.c.b16 %v4745_v4, %v4744_v38 }
 0x36b   : > { %v4261_v31 = vadd.f32 %v4190_v2, %v3970_v55  ;;  %v4645_v4 = vrot.slane %v4643_v42, 5  ;;  %v4657_v38 = vshll.u32 %v4327_v8, 16 }
 0x36c   : > { %6188 = vmatmul.msk.bf16.gmra.mxu1 %vm736_vm11, %v6331_v61  ;;  %v5355_v29 = vadd.f32 %v7896_v62, %v5319_v54  ;;  %v5099_v10 = vsel %vm6812_vm14, %v5097_v47, %v5098_v1  ;;  %v4640_v47 = vor.u32 %v4639_v45, %v4635_v7  ;;  %v4630_v63 = vor.u32 %v4629_v11, %v4626_v56  ;;  %v7963_v56 = vpop.f32.mrf.mxu0 }
 0x36d   : > { %v5149_v23 = vunpack.c.l.b16 %v5099_v10  ;;  %v5102_v1 = vrot.slane %v4327_v8, 5  ;;  %v4328_v10 = vld [vmem:[#allocation2 + $0xbc] sm:$0x1]  ;;  %v4661_v45 = vshrl.u32 %v4327_v8, 16  ;;  %v4648_v8 = vshrl.u32 %v4326_v20, 16  ;;  %v8361_v20 = vld [vmem:[#allocation44_spill] sm:$0xff] }
 0x36e   : > { %v5387_v57 = vmax.f32 %v5355_v29, 0.0  ;;  %v4631_v50 = vrot.slane %v4630_v63, 4  ;;  %v7973_v55 = vrot.slane %v4657_v38, 5 }
 0x36f   : > { %v4845_v44 = vpop.f32.mrf.mxu2  ;;  %v5168_v40 = vpack.c.b16 %v5149_v23, %v5148_v22  ;;  %v5104_v2 = vrot.slane %v5102_v1, 4 }
 0x370   : > { %v4918_v28 = vadd.f32 %v4845_v44, %v4260_v59  ;;  %5455 = vrot.lane.b32.xlu2 %v5387_v57, %s6480_s14  ;;  %v6332_v57 = vld [vmem:[#allocation2 + $0xa8] sm:$0xff]  ;;  %v4958_v44 = vld [vmem:[#allocation2 + $0xb4] sm:$0xe]  ;;  %v4636_v11 = vsel %vm6840_vm15, %v4631_v50, %v4635_v7  ;;  %v4653_v50 = vrot.slane %v4651_v21, 5 }
 0x371   : > { %v4192_v53 = vpop.f32.mrf.mxu1  ;;  %v5252_v54 = vpop.f32.mrf.mxu3  ;;  %v4331_v21 = vld [vmem:[#allocation2 + $0xc8] sm:$0x1] }
 0x372   : > { %v5320_v61 = vadd.f32 %v5247_v24, %v4918_v28  ;;  %v4641_v24 = vrot.slane %v4640_v47, 4  ;;  %v6228_v47 = vrot.slane %v4958_v44, 9 }
 0x374   : > { %6210 = vmatmul.msk.bf16.gmra.mxu2 %vm736_vm11, %v4765_v9  ;;  %v5356_v17 = vadd.f32 %v7896_v62, %v5320_v61  ;;  %v4646_v23 = vsel %vm6840_vm15, %v4641_v24, %v4645_v4  ;;  %v8360_v61 = vld [vmem:[#allocation43_spill] sm:$0xff]  ;;  %v5103_v24 = vsel %vm6812_vm14, %v6228_v47, %v5102_v1 }
 0x375   : > { %v3971_v9 = vadd.f32 %v7727_v25, %v8360_v61  ;;  %v7985_v61 = vpop.f32.mrf.mxu0 }
 0x376   : > { %v5388_v29 = vmax.f32 %v5356_v17, 0.0  ;;  %6249 = vmatmul.msk.bf16.gmra.mxu3 %vm736_vm11, %v5168_v40  ;;  %v4663_v17 = vrot.slane %v4661_v45, 4  ;;  %v4747_v40 = vunpack.c.l.b16 %v4646_v23  ;;  %v5150_v45 = vunpack.c.l.b16 %v5103_v24 }
 0x377   : > { %v4848_v39 = vpop.f32.mrf.mxu2  ;;  %v4262_v63 = vadd.f32 %v4192_v53, %v3971_v9  ;;  %v3972_v23 = vadd.f32 %v7911_v48, %v8361_v20 }
 0x378   : > { %v4919_v51 = vadd.f32 %v4848_v39, %v4261_v31  ;;  %5457 = vrot.lane.b32.xlu2 %v5388_v29, %s6480_s14  ;;  %v4746_v39 = vunpack.c.l.b16 %v4636_v11  ;;  %v4664_v4 = vor.u32 %v4663_v17, %v7973_v55  ;;  %v4959_v17 = vld [vmem:[#allocation2 + $0xc0] sm:$0xe] }
 0x379   : > { %v4195_v59 = vpop.f32.mrf.mxu1  ;;  %v5255_v28 = vpop.f32.mrf.mxu3 }
 0x37a   : > { %v5321_v13 = vadd.f32 %v5250_v30, %v4919_v51  ;;  %v5105_v30 = vrot.slane %v4328_v10, 5  ;;  %v4766_v44 = vpack.c.b16 %v4747_v40, %v4746_v39  ;;  %v4263_v47 = vadd.f32 %v4195_v59, %v3972_v23  ;;  %v6333_v40 = vld [vmem:[#allocation2 + $0xb4] sm:$0xff] }
 0x37b   : > { %v6229_v39 = vrot.slane %v4959_v17, 9  ;;  %v4333_v17 = vld [vmem:[#allocation2 + $0xd0] sm:$0xf] }
 0x37c   : > { %6189 = vmatmul.msk.bf16.gmra.mxu1 %vm736_vm11, %v6332_v57  ;;  %v5357_v22 = vadd.f32 %v7896_v62, %v5321_v13  ;;  %v5106_v7 = vsel %vm6812_vm14, %v5104_v2, %v5105_v30  ;;  %v4650_v57 = vrot.slane %v4648_v8, 4  ;;  %v4667_v13 = vshll.u32 %v4328_v10, 16  ;;  %v4330_v2 = vld [vmem:[#allocation2 + $0xc4] sm:$0xf] }
 0x37d   : > { %v5151_v51 = vunpack.c.l.b16 %v5106_v7 }
 0x37e   : > { %v5389_v42 = vmax.f32 %v5357_v22, 0.0  ;;  %v4654_v9 = vor.u32 %v4653_v50, %v4650_v57  ;;  %v4665_v22 = vrot.slane %v4664_v4, 4  ;;  %v4669_v10 = vrot.slane %v4667_v13, 5 }
 0x37f   : > { %v4850_v31 = vpop.f32.mrf.mxu2  ;;  %v5169_v1 = vpack.c.b16 %v5151_v51, %v5150_v45  ;;  %v5112_v51 = vrot.slane %v4331_v21, 5  ;;  %v4681_v4 = vshll.u32 %v4330_v2, 16 }
 0x380   : > { %v4920_v29 = vadd.f32 %v4850_v31, %v4262_v63  ;;  %5459 = vrot.lane.b32.xlu0 %v5389_v42, %s6480_s14  ;;  %v4329_v42 = vld [vmem:[#allocation2 + $0xc0] sm:$0xf]  ;;  %v4655_v7 = vrot.slane %v4654_v9, 4  ;;  %v4670_v31 = vsel %vm6840_vm15, %v4665_v22, %v4669_v10  ;;  %v8004_v9 = vpop.f32.mrf.mxu0 }
 0x381   : > { %v4197_v25 = vpop.f32.mrf.mxu1  ;;  %v5257_v38 = vpop.f32.mrf.mxu3  ;;  %v4672_v57 = vshrl.u32 %v4329_v42, 16  ;;  %v4675_v50 = vshll.u32 %v4329_v42, 16  ;;  %v4749_v13 = vunpack.c.l.b16 %v4670_v31  ;;  %v4691_v31 = vshll.u32 %v4331_v21, 16 }
 0x382   : > { %v5322_v53 = vadd.f32 %v5252_v54, %v4920_v29  ;;  %v5109_v54 = vrot.slane %v4330_v2, 5 }
 0x383   : > { %v4674_v22 = vrot.slane %v4672_v57, 4  ;;  %v4334_v57 = vld [vmem:[#allocation2 + $0xd4] sm:$0x1]  ;;  %v4693_v21 = vrot.slane %v4691_v31, 5 }
 0x384   : > { %6211 = vmatmul.msk.bf16.gmra.mxu2 %vm736_vm11, %v4766_v44  ;;  %v5358_v11 = vadd.f32 %v7896_v62, %v5322_v53  ;;  %v5111_v24 = vrot.slane %v5109_v54, 4  ;;  %v4685_v53 = vshrl.u32 %v4330_v2, 16  ;;  %v3973_v44 = vadd.f32 %v7927_v34, %v7687_v18 }
 0x385   : > { %v4677_v18 = vrot.slane %v4675_v50, 5  ;;  %v8006_v34 = vrot.slane %v4681_v4, 5  ;;  %v4960_v50 = vld [vmem:[#allocation2 + $0xcc] sm:$0xe] }
 0x386   : > { %v5390_v30 = vmax.f32 %v5358_v11, 0.0  ;;  %6250 = vmatmul.msk.bf16.gmra.mxu3 %vm736_vm11, %v5169_v1  ;;  %v4264_v20 = vadd.f32 %v4197_v25, %v3973_v44  ;;  %v5110_v11 = vsel %vm6812_vm14, %v6229_v39, %v5109_v54  ;;  %v5113_v1 = vsel %vm6812_vm14, %v5111_v24, %v5112_v51 }
 0x387   : > { %v4853_v8 = vpop.f32.mrf.mxu2  ;;  %v5153_v10 = vunpack.c.l.b16 %v5113_v1  ;;  %v5116_v24 = vrot.slane %v4333_v17, 5  ;;  %v6334_v1 = vld [vmem:[#allocation2 + $0xc0] sm:$0xff] }
 0x388   : > { %v4921_v63 = vadd.f32 %v4853_v8, %v4263_v47  ;;  %5461 = vrot.lane.b32.xlu1 %v5390_v30, %s6480_s14  ;;  %v4687_v47 = vrot.slane %v4685_v53, 4  ;;  %v5152_v8 = vunpack.c.l.b16 %v5110_v11  ;;  %v8016_v11 = vpop.f32.mrf.mxu0 }
 0x389   : > { %v4200_v48 = vpop.f32.mrf.mxu1  ;;  %v7991_v59 = vpop.f32.mrf.mxu3 }
 0x38a   : > { %v5323_v29 = vadd.f32 %v5255_v28, %v4921_v63  ;;  %v4660_v28 = vsel %vm6840_vm15, %v4655_v7, %v7973_v55  ;;  %v4688_v7 = vor.u32 %v4687_v47, %v8006_v34  ;;  %v5170_v51 = vpack.c.b16 %v5153_v10, %v5152_v8 }
 0x38b   : > { %v4748_v25 = vunpack.c.l.b16 %v4660_v28  ;;  %v3975_v10 = vadd.f32 %v7955_v6, %v7712_v41 }
 0x38c   : > { %6190 = vmatmul.msk.bf16.gmra.mxu1 %vm736_vm11, %v6333_v40  ;;  %v5359_v45 = vadd.f32 %v7896_v62, %v5323_v29  ;;  %v4678_v40 = vor.u32 %v4677_v18, %v4674_v22  ;;  %v3974_v29 = vadd.f32 %v7938_v19, %v7700_v52  ;;  %v4689_v28 = vrot.slane %v4688_v7, 4 }
 0x38d   : > { %v4767_v63 = vpack.c.b16 %v4749_v13, %v4748_v25  ;;  %v6230_v19 = vrot.slane %v4960_v50, 9  ;;  %v4705_v22 = vshll.u32 %v4333_v17, 16  ;;  %v4709_v18 = vshrl.u32 %v4333_v17, 16 }
 0x38e   : > { %v5391_v23 = vmax.f32 %v5359_v45, 0.0  ;;  %v4265_v4 = vadd.f32 %v4200_v48, %v3974_v29  ;;  %v4679_v45 = vrot.slane %v4678_v40, 4  ;;  %v4694_v8 = vsel %vm6840_vm15, %v4689_v28, %v4693_v21 }
 0x38f   : > { %v4855_v2 = vpop.f32.mrf.mxu2  ;;  %v5117_v17 = vsel %vm6812_vm14, %v6230_v19, %v5116_v24  ;;  %v4707_v7 = vrot.slane %v4705_v22, 5  ;;  %v4711_v31 = vrot.slane %v4709_v18, 4 }
 0x390   : > { %v4922_v30 = vadd.f32 %v4855_v2, %v4264_v20  ;;  %5463 = vrot.lane.b32.xlu2 %v5391_v23, %s6480_s14  ;;  %v5118_v20 = vrot.slane %v5116_v24, 4  ;;  %v5119_v23 = vrot.slane %v4334_v57, 5  ;;  %v4684_v25 = vsel %vm6840_vm15, %v4679_v45, %v8006_v34  ;;  %v8033_v21 = vpop.f32.mrf.mxu0 }
 0x391   : > { %v4202_v55 = vpop.f32.mrf.mxu1  ;;  %v5262_v42 = vpop.f32.mrf.mxu3  ;;  %v5154_v50 = vunpack.c.l.b16 %v5117_v17  ;;  %v4750_v6 = vunpack.c.l.b16 %v4684_v25  ;;  %v4712_v24 = vor.u32 %v4711_v31, %v4707_v7 }
 0x392   : > { %v5324_v54 = vadd.f32 %v5257_v38, %v4922_v30  ;;  %v4332_v38 = vld [vmem:[#allocation2 + $0xcc] sm:$0xf]  ;;  %v4266_v29 = vadd.f32 %v4202_v55, %v3975_v10  ;;  %v3976_v55 = vadd.f32 %v7963_v56, %v7725_v14 }
 0x393   : > { %v4696_v2 = vshrl.u32 %v4332_v38, 16  ;;  %v4699_v48 = vshll.u32 %v4332_v38, 16 }
 0x394   : > { %6212 = vmatmul.msk.bf16.gmra.mxu2 %vm736_vm11, %v4767_v63  ;;  %v5360_v39 = vadd.f32 %v7896_v62, %v5324_v54 }
 0x395   : > { %v4698_v63 = vrot.slane %v4696_v2, 4  ;;  %v4701_v40 = vrot.slane %v4699_v48, 5 }
 0x396   : > { %v5392_v53 = vmax.f32 %v5360_v39, 0.0  ;;  %6251 = vmatmul.msk.bf16.gmra.mxu3 %vm736_vm11, %v5170_v51  ;;  %v4751_v39 = vunpack.c.l.b16 %v4694_v8 }
 0x397   : > { %v4858_v44 = vpop.f32.mrf.mxu2  ;;  %v4702_v38 = vor.u32 %v4701_v40, %v4698_v63 }
 0x398   : > { %v4923_v13 = vadd.f32 %v4858_v44, %v4265_v4  ;;  %5465 = vrot.lane.b32.xlu0 %v5392_v53, %s6480_s14  ;;  %v4715_v44 = vshll.u32 %v4334_v57, 16  ;;  %v4768_v45 = vpack.c.b16 %v4751_v39, %v4750_v6  ;;  %v6335_v57 = vld [vmem:[#allocation2 + $0xcc] sm:$0xff]  ;;  %v3926_v17 = vpop.f32.mrf.mxu0 }
 0x399   : > { %v4205_v52 = vpop.f32.mrf.mxu1  ;;  %v5265_v30 = vpop.f32.mrf.mxu3 }
 0x39a   : > { %v5325_v47 = vadd.f32 %v7991_v59, %v4923_v13  ;;  %v5120_v59 = vsel %vm6812_vm14, %v5118_v20, %v5119_v23  ;;  %v4703_v20 = vrot.slane %v4702_v38, 4  ;;  %v4713_v23 = vrot.slane %v4712_v24, 4  ;;  %v8362_v24 = vld [vmem:[#allocation14_spill] sm:$0xff] }
 0x39b   : > { %v5155_v4 = vunpack.c.l.b16 %v5120_v59  ;;  %v4267_v2 = vadd.f32 %v4205_v52, %v3976_v55  ;;  %v3977_v52 = vadd.f32 %v7985_v61, %v7736_v58 }
 0x39c   : > { %6191 = vmatmul.msk.bf16.gmra.mxu1 %vm736_vm11, %v6334_v1  ;;  %v5361_v54 = vadd.f32 %v7896_v62, %v5325_v47  ;;  %v4717_v1 = vrot.slane %v4715_v44, 5  ;;  %v4708_v14 = vsel %vm6840_vm15, %v4703_v20, %v4707_v7 }
 0x39d   : > { %v5171_v13 = vpack.c.b16 %v5155_v4, %v5154_v50  ;;  %v4752_v10 = vunpack.c.l.b16 %v4708_v14 }
 0x39e   : > { %v5393_v34 = vmax.f32 %v5361_v54, 0.0  ;;  %v4718_v56 = vsel %vm6840_vm15, %v4713_v23, %v4717_v1 }
 0x39f   : > { %v4860_v51 = vpop.f32.mrf.mxu2  ;;  %v4753_v54 = vunpack.c.l.b16 %v4718_v56 }
 0x3a0   : > { %v4924_v53 = vadd.f32 %v4860_v51, %v4266_v29  ;;  %5467 = vrot.lane.b32.xlu1 %v5393_v34, %s6480_s14  ;;  %v3978_v34 = vadd.f32 %v8004_v9, %v7741_v35  ;;  %v8054_v51 = vpop.f32.mrf.mxu0  ;;  %v8060_v35 = vld [vmem:[%s8297_s4] ss:$0 sm:$0xff]  ;;  %v3979_v9 = vadd.f32 %v8016_v11, %v7753_v32 }
 0x3a1   : > { %v4207_v41 = vpop.f32.mrf.mxu1  ;;  %v5267_v28 = vpop.f32.mrf.mxu3  ;;  %v4769_v7 = vpack.c.b16 %v4753_v54, %v4752_v10  ;;  %v795_v44 = vadd.f32 %v8060_v35, %v8362_v24 }
 0x3a2   : > { %v5326_v5 = vadd.f32 %v5262_v42, %v4924_v53  ;;  %v4268_v59 = vadd.f32 %v4207_v41, %v3977_v52 }
 0x3a4   : > { %6213 = vmatmul.msk.bf16.gmra.mxu2 %vm736_vm11, %v4768_v45  ;;  %v5362_v19 = vadd.f32 %v7896_v62, %v5326_v5 }
 0x3a6   : > { %v5394_v48 = vmax.f32 %v5362_v19, 0.0  ;;  %6252 = vmatmul.msk.bf16.gmra.mxu3 %vm736_vm11, %v5171_v13  ;;  %v874_v19 = vmax.f32 %v795_v44, 0.0 }
 0x3a7   : > { %v4863_v22 = vpop.f32.mrf.mxu2 }
 0x3a8   : > { %v4925_v42 = vadd.f32 %v4863_v22, %v4267_v2  ;;  %5469 = vrot.lane.b32.xlu2 %v5394_v48, %s6480_s14  ;;  %v8071_v20 = vpop.f32.mrf.mxu0  ;;  %v3980_v2 = vadd.f32 %v8033_v21, %v7758_v33  ;;  %v8363_v22 = vld [vmem:[#allocation16_spill] sm:$0xff] }
 0x3a9   : > { %v4210_v18 = vpop.f32.mrf.mxu1  ;;  %v5270_v25 = vpop.f32.mrf.mxu3 }
 0x3aa   : > { %v5327_v47 = vadd.f32 %v5265_v30, %v4925_v42  ;;  %v4269_v61 = vadd.f32 %v4210_v18, %v3978_v34  ;;  %v8364_v42 = vld [vmem:[#allocation22_spill] sm:$0xff]  ;;  %v8366_v34 = vld [vmem:[#allocation24_spill] sm:$0xff] }
 0x3ab   : > { %v805_v18 = vadd.f32 %v8060_v35, %v8364_v42 }
 0x3ac   : > { %6192 = vmatmul.msk.bf16.gmra.mxu1 %vm736_vm11, %v6335_v57  ;;  %v5363_v8 = vadd.f32 %v7896_v62, %v5327_v47  ;;  %v797_v57 = vadd.f32 %v8060_v35, %v8363_v22 }
 0x3ad   : > { %v878_v52 = vmax.f32 %v805_v18, 0.0 }
 0x3ae   : > { %v5395_v63 = vmax.f32 %v5363_v8, 0.0  ;;  %v875_v21 = vmax.f32 %v797_v57, 0.0  ;;  %v3983_v57 = vadd.f32 %v8071_v20, %v7787_v49 }
 0x3af   : > { %v4865_v40 = vpop.f32.mrf.mxu2 }
 0x3b0   : > { %v4926_v31 = vadd.f32 %v4865_v40, %v4268_v59  ;;  %5471 = vrot.lane.b32.xlu0 %v5395_v63, %s6480_s14 }
 0x3b1   : > { %v4212_v46 = vpop.f32.mrf.mxu1  ;;  %v5272_v29 = vpop.f32.mrf.mxu3 }
 0x3b2   : > { %v5328_v30 = vadd.f32 %v5267_v28, %v4926_v31  ;;  %v4270_v5 = vadd.f32 %v4212_v46, %v3979_v9  ;;  %v3934_v31 = vpop.f32.mrf.mxu0  ;;  %v3981_v46 = vadd.f32 %v3926_v17, %v7770_v12 }
 0x3b4   : > { %6214 = vmatmul.msk.bf16.gmra.mxu2 %vm736_vm11, %v4769_v7  ;;  %v5364_v58 = vadd.f32 %v7896_v62, %v5328_v30  ;;  %v8365_v30 = vld [vmem:[#allocation18_spill] sm:$0xff] }
 0x3b6   : > { %v5396_v39 = vmax.f32 %v5364_v58, 0.0  ;;  %v807_v58 = vadd.f32 %v8060_v35, %v8366_v34 }
 0x3b7   : > { %v4868_v50 = vpop.f32.mrf.mxu2 }
 0x3b8   : > { %v4927_v4 = vadd.f32 %v4868_v50, %v4269_v61  ;;  %5473 = vrot.lane.b32.xlu1 %v5396_v39, %s6480_s14  ;;  %v879_v17 = vmax.f32 %v807_v58, 0.0 }
 0x3b9   : > { %v4215_v53 = vpop.f32.mrf.mxu1  ;;  %v5275_v6 = vpop.f32.mrf.mxu3 }
 0x3ba   : > { %v5329_v41 = vadd.f32 %v5270_v25, %v4927_v4  ;;  %v4271_v14 = vadd.f32 %v4215_v53, %v3980_v2 }
 0x3bc   : > { %v5365_v38 = vadd.f32 %v7896_v62, %v5329_v41 }
 0x3be   : > { %v5397_v45 = vmax.f32 %v5365_v38, 0.0 }
 0x3bf   : > { %v4870_v28 = vpop.f32.mrf.mxu2 }
 0x3c0   : > { %v4928_v13 = vadd.f32 %v4870_v28, %v4270_v5  ;;  %5475 = vrot.lane.b32.xlu2 %v5397_v45, %s6480_s14  ;;  %v3982_v5 = vadd.f32 %v8054_v51, %v7775_v3  ;;  %v8367_v28 = vld [vmem:[#allocation20_spill] sm:$0xff] }
 0x3c1   : > { %v4217_v55 = vpop.f32.mrf.mxu1  ;;  %v5277_v11 = vpop.f32.mrf.mxu3 }
 0x3c2   : > { %v5330_v23 = vadd.f32 %v5272_v29, %v4928_v13  ;;  %v5448_v32 = vpop.permute.xlu0 %5447  ;;  %v800_v29 = vadd.f32 %v8060_v35, %v8365_v30  ;;  %v4272_v61 = vadd.f32 %v4217_v55, %v3981_v46  ;;  %v802_v13 = vadd.f32 %v8060_v35, %v8367_v28  ;;  %v3936_v55 = vpop.f32.mrf.mxu0  ;;  %v8370_v28 = vld [vmem:[#allocation7_spill] sm:$0xff] }
 0x3c3   : > { %v5544_v1 = vsel %vm5543_vm0, %v874_v19, %v5448_v32 }
 0x3c4   : > { %5576 = vst [vmem:[%s8076_s19] sm:$0xff] %v5544_v1  ;;  %v5366_v48 = vadd.f32 %v7896_v62, %v5330_v23  ;;  %v876_v12 = vmax.f32 %v800_v29, 0.0  ;;  %v877_v2 = vmax.f32 %v802_v13, 0.0  ;;  %v812_v13 = vadd.f32 %v8060_v35, %v8370_v28 }
 0x3c6   : > { %v5398_v56 = vmax.f32 %v5366_v48, 0.0 }
 0x3c7   : > { %v4873_v47 = vpop.f32.mrf.mxu2 }
 0x3c8   : > { %v4929_v25 = vadd.f32 %v4873_v47, %v4271_v14  ;;  %5477 = vrot.lane.b32.xlu0 %v5398_v56, %s6480_s14 }
 0x3c9   : > { %v4220_v33 = vpop.f32.mrf.mxu1  ;;  %v5280_v40 = vpop.f32.mrf.mxu3 }
 0x3ca   : > { %v5331_v8 = vadd.f32 %v5275_v6, %v4929_v25  ;;  %v5456_v10 = vpop.permute.xlu2 %5455  ;;  %v5450_v54 = vpop.permute.xlu0 %5449  ;;  %v4273_v19 = vadd.f32 %v4220_v33, %v3982_v5 }
 0x3cb   : > { %v5548_v59 = vsel %vm5543_vm0, %v878_v52, %v5456_v10  ;;  %v5545_v63 = vsel %vm5543_vm0, %v875_v21, %v5450_v54  ;;  %v3939_v47 = vpop.f32.mrf.mxu0  ;;  %v8368_v54 = vld [vmem:[#allocation8_spill] sm:$0xff] }
 0x3cc   : > { %5580 = vst [vmem:[%s8076_s19 + $0x20] sm:$0xff] %v5548_v59  ;;  %v5367_v7 = vadd.f32 %v7896_v62, %v5331_v8  ;;  %v3984_v8 = vadd.f32 %v3934_v31, %v7792_v15  ;;  %v815_v49 = vadd.f32 %v8060_v35, %v8368_v54  ;;  %v3985_v31 = vadd.f32 %v3936_v55, %v7804_v27 }
 0x3cd   : > { %5577 = vst [vmem:[%s8076_s19 + $0x8] sm:$0xff] %v5545_v63  ;;  %v3986_v5 = vadd.f32 %v3939_v47, %v7809_v36 }
 0x3ce   : > { %v5399_v39 = vmax.f32 %v5367_v7, 0.0  ;;  %v882_v7 = vmax.f32 %v815_v49, 0.0  ;;  %v8372_v49 = vld [vmem:[#allocation9_spill] sm:$0xff] }
 0x3cf   : > { %v4875_v50 = vpop.f32.mrf.mxu2 }
 0x3d0   : > { %v4930_v4 = vadd.f32 %v4875_v50, %v4272_v61  ;;  %5479 = vrot.lane.b32.xlu1 %v5399_v39, %s6480_s14  ;;  %v8369_v39 = vld [vmem:[#allocation6_spill] sm:$0xff] }
 0x3d1   : > { %v4222_v53 = vpop.f32.mrf.mxu1  ;;  %v5282_v44 = vpop.f32.mrf.mxu3  ;;  %v810_v50 = vadd.f32 %v8060_v35, %v8369_v39  ;;  %v8373_v39 = vld [vmem:[#allocation10_spill] sm:$0xff] }
 0x3d2   : > { %v5332_v41 = vadd.f32 %v5277_v11, %v4930_v4  ;;  %v5458_v6 = vpop.permute.xlu2 %5457  ;;  %v5452_v9 = vpop.permute.xlu1 %5451  ;;  %v4274_v18 = vadd.f32 %v4222_v53, %v3983_v57 }
 0x3d3   : > { %v5549_v38 = vsel %vm5543_vm0, %v879_v17, %v5458_v6  ;;  %v5546_v24 = vsel %vm5543_vm0, %v876_v12, %v5452_v9  ;;  %v3941_v30 = vpop.f32.mrf.mxu0  ;;  %v880_v6 = vmax.f32 %v810_v50, 0.0  ;;  %v820_v50 = vadd.f32 %v8060_v35, %v8373_v39 }
 0x3d4   : > { %5581 = vst [vmem:[%s8076_s19 + $0x28] sm:$0xff] %v5549_v38  ;;  %v5368_v45 = vadd.f32 %v7896_v62, %v5332_v41  ;;  %v3987_v36 = vadd.f32 %v3941_v30, %v7821_v26 }
 0x3d5   : > { %5578 = vst [vmem:[%s8076_s19 + $0x10] sm:$0xff] %v5546_v24 }
 0x3d6   : > { %v5400_v23 = vmax.f32 %v5368_v45, 0.0 }
 0x3d7   : > { %v4878_v32 = vpop.f32.mrf.mxu2 }
 0x3d8   : > { %v4931_v11 = vadd.f32 %v4878_v32, %v4273_v19  ;;  %5481 = vrot.lane.b32.xlu2 %v5400_v23, %s6480_s14 }
 0x3d9   : > { %v4225_v1 = vpop.f32.mrf.mxu1  ;;  %v5285_v51 = vpop.f32.mrf.mxu3 }
 0x3da   : > { %v5333_v48 = vadd.f32 %v5280_v40, %v4931_v11  ;;  %v5454_v22 = vpop.permute.xlu1 %5453  ;;  %v4275_v20 = vadd.f32 %v4225_v1, %v3984_v8  ;;  %v881_v1 = vmax.f32 %v812_v13, 0.0 }
 0x3db   : > { %v5547_v3 = vsel %vm5543_vm0, %v877_v2, %v5454_v22 }
 0x3dc   : > { %5579 = vst [vmem:[%s8076_s19 + $0x18] sm:$0xff] %v5547_v3  ;;  %v5369_v42 = vadd.f32 %v7896_v62, %v5333_v48 }
 0x3de   : > { %v5401_v14 = vmax.f32 %v5369_v42, 0.0 }
 0x3df   : > { %v4880_v56 = vpop.f32.mrf.mxu2 }
 0x3e0   : > { %v4932_v25 = vadd.f32 %v4880_v56, %v4274_v18  ;;  %5483 = vrot.lane.b32.xlu0 %v5401_v14, %s6480_s14 }
 0x3e1   : > { %v4227_v33 = vpop.f32.mrf.mxu1  ;;  %v5287_v52 = vpop.f32.mrf.mxu3 }
 0x3e2   : > { %v5334_v21 = vadd.f32 %v5282_v44, %v4932_v25  ;;  %v4276_v4 = vadd.f32 %v4227_v33, %v3985_v31  ;;  %v3944_v44 = vpop.f32.mrf.mxu0 }
 0x3e4   : > { %v5370_v10 = vadd.f32 %v7896_v62, %v5334_v21 }
 0x3e6   : > { %v5402_v59 = vmax.f32 %v5370_v10, 0.0  ;;  %v3988_v10 = vadd.f32 %v3944_v44, %v7826_v16 }
 0x3e7   : > { %v4883_v63 = vpop.f32.mrf.mxu2 }
 0x3e8   : > { %v4933_v40 = vadd.f32 %v4883_v63, %v4275_v20  ;;  %5485 = vrot.lane.b32.xlu1 %v5402_v59, %s6480_s14  ;;  %v817_v20 = vadd.f32 %v8060_v35, %v8372_v49 }
 0x3e9   : > { %v4230_v46 = vpop.f32.mrf.mxu1  ;;  %v5290_v15 = vpop.f32.mrf.mxu3 }
 0x3ea   : > { %v5335_v29 = vadd.f32 %v5285_v51, %v4933_v40  ;;  %v5464_v34 = vpop.permute.xlu2 %5463  ;;  %v4277_v55 = vadd.f32 %v4230_v46, %v3986_v5  ;;  %v8371_v51 = vld [vmem:[#allocation11_spill] sm:$0xff]  ;;  %v3946_v18 = vpop.f32.mrf.mxu0 }
 0x3eb   : > { %v5552_v58 = vsel %vm5543_vm0, %v882_v7, %v5464_v34  ;;  %v822_v57 = vadd.f32 %v8060_v35, %v8371_v51  ;;  %v3989_v31 = vadd.f32 %v3946_v18, %v7838_v60 }
 0x3ec   : > { %5584 = vst [vmem:[%s8076_s19 + $0x40] sm:$0xff] %v5552_v58  ;;  %v5371_v61 = vadd.f32 %v7896_v62, %v5335_v29  ;;  %v883_v29 = vmax.f32 %v817_v20, 0.0 }
 0x3ed   : > { %v885_v33 = vmax.f32 %v822_v57, 0.0 }
 0x3ee   : > { %v5403_v53 = vmax.f32 %v5371_v61, 0.0 }
 0x3ef   : > { %v4885_v12 = vpop.f32.mrf.mxu2 }
 0x3f0   : > { %v4934_v17 = vadd.f32 %v4885_v12, %v4276_v4  ;;  %5487 = vrot.lane.b32.xlu2 %v5403_v53, %s6480_s14 }
 0x3f1   : > { %v4232_v41 = vpop.f32.mrf.mxu1  ;;  %v5292_v27 = vpop.f32.mrf.mxu3 }
 0x3f2   : > { %v5336_v9 = vadd.f32 %v5287_v52, %v4934_v17  ;;  %v5460_v38 = vpop.permute.xlu0 %5459  ;;  %v4278_v14 = vadd.f32 %v4232_v41, %v3987_v36  ;;  %v3949_v7 = vpop.f32.mrf.mxu0  ;;  %v884_v41 = vmax.f32 %v820_v50, 0.0 }
 0x3f3   : > { %v5550_v24 = vsel %vm5543_vm0, %v880_v6, %v5460_v38  ;;  %v3990_v44 = vadd.f32 %v3949_v7, %v7843_v43 }
 0x3f4   : > { %5582 = vst [vmem:[%s8076_s19 + $0x30] sm:$0xff] %v5550_v24  ;;  %v5372_v45 = vadd.f32 %v7896_v62, %v5336_v9  ;;  %v8137_v62 = vld [vmem:[%s8299_s6] ss:$0 sm:$0xff] }
 0x3f6   : > { %v5404_v19 = vmax.f32 %v5372_v45, 0.0  ;;  %v8374_v45 = vld [vmem:[#allocation15_spill] sm:$0xff] }
 0x3f7   : > { %v4888_v23 = vpop.f32.mrf.mxu2  ;;  %v830_v28 = vadd.f32 %v8060_v35, %v8374_v45 }
 0x3f8   : > { %v4935_v32 = vadd.f32 %v4888_v23, %v4277_v55  ;;  %5489 = vrot.lane.b32.xlu0 %v5404_v19, %s6480_s14 }
 0x3f9   : > { %v4235_v11 = vpop.f32.mrf.mxu1  ;;  %v5295_v42 = vpop.f32.mrf.mxu3 }
 0x3fa   : > { %v5337_v2 = vadd.f32 %v5290_v15, %v4935_v32  ;;  %v5462_v48 = vpop.permute.xlu1 %5461  ;;  %v4279_v59 = vadd.f32 %v4235_v11, %v3988_v10  ;;  %v3951_v9 = vpop.f32.mrf.mxu0  ;;  %v888_v32 = vmax.f32 %v830_v28, 0.0 }
 0x3fb   : > { %v5551_v22 = vsel %vm5543_vm0, %v881_v1, %v5462_v48 }
 0x3fc   : > { %5583 = vst [vmem:[%s8076_s19 + $0x38] sm:$0xff] %v5551_v22  ;;  %v5373_v3 = vadd.f32 %v8137_v62, %v5337_v2  ;;  %v3991_v22 = vadd.f32 %v3951_v9, %v7855_v37 }
 0x3fe   : > { %v5405_v56 = vmax.f32 %v5373_v3, 0.0  ;;  %v8375_v3 = vld [vmem:[#allocation12_spill] sm:$0xff] }
 0x3ff   : > { %v4890_v47 = vpop.f32.mrf.mxu2  ;;  %v825_v51 = vadd.f32 %v8060_v35, %v8375_v3  ;;  %v8382_v3 = vld [vmem:[#allocation19_spill] sm:$0xff] }
 0x400   : > { %v4936_v25 = vadd.f32 %v4890_v47, %v4278_v14  ;;  %5491 = vrot.lane.b32.xlu1 %v5405_v56, %s6480_s14 }
 0x401   : > { %v4237_v26 = vpop.f32.mrf.mxu1  ;;  %v5297_v40 = vpop.f32.mrf.mxu3  ;;  %v886_v47 = vmax.f32 %v825_v51, 0.0  ;;  %v835_v51 = vadd.f32 %v8060_v35, %v8382_v3  ;;  %v8393_v3 = vld [vmem:[#allocation33_spill] sm:$0xff] }
 0x402   : > { %v5338_v21 = vadd.f32 %v5292_v27, %v4936_v25  ;;  %v5470_v52 = vpop.permute.xlu2 %5469  ;;  %v4280_v4 = vadd.f32 %v4237_v26, %v3989_v31  ;;  %v3954_v43 = vpop.f32.mrf.mxu0  ;;  %v8379_v31 = vld [vmem:[#allocation21_spill] sm:$0xff] }
 0x403   : > { %v5555_v8 = vsel %vm5543_vm0, %v885_v33, %v5470_v52 }
 0x404   : > { %5587 = vst [vmem:[%s8076_s19 + $0x58] sm:$0xff] %v5555_v8  ;;  %v5374_v54 = vadd.f32 %v8137_v62, %v5338_v21  ;;  %v8376_v21 = vld [vmem:[#allocation45_spill] sm:$0xff] }
 0x405   : > { %v3992_v37 = vadd.f32 %v3954_v43, %v8376_v21  ;;  %v8377_v8 = vld [vmem:[#allocation13_spill] sm:$0xff]  ;;  %v8383_v21 = vld [vmem:[#allocation26_spill] sm:$0xff] }
 0x406   : > { %v5406_v63 = vmax.f32 %v5374_v54, 0.0  ;;  %v827_v10 = vadd.f32 %v8060_v35, %v8377_v8 }
 0x407   : > { %v4893_v46 = vpop.f32.mrf.mxu2 }
 0x408   : > { %v4937_v30 = vadd.f32 %v4893_v46, %v4279_v59  ;;  %5493 = vrot.lane.b32.xlu2 %v5406_v63, %s6480_s14  ;;  %v887_v7 = vmax.f32 %v827_v10, 0.0 }
 0x409   : > { %v4240_v34 = vpop.f32.mrf.mxu1  ;;  %v5300_v6 = vpop.f32.mrf.mxu3 }
 0x40a   : > { %v5339_v58 = vadd.f32 %v5295_v42, %v4937_v30  ;;  %v5466_v15 = vpop.permute.xlu0 %5465  ;;  %v4281_v13 = vadd.f32 %v4240_v34, %v3990_v44  ;;  %v3956_v49 = vpop.f32.mrf.mxu0 }
 0x40b   : > { %v5553_v16 = vsel %vm5543_vm0, %v883_v29, %v5466_v15 }
 0x40c   : > { %5585 = vst [vmem:[%s8076_s19 + $0x48] sm:$0xff] %v5553_v16  ;;  %v5375_v61 = vadd.f32 %v8137_v62, %v5339_v58  ;;  %v8378_v58 = vld [vmem:[#allocation38_spill] sm:$0xff] }
 0x40d   : > { %v3993_v15 = vadd.f32 %v3956_v49, %v8378_v58  ;;  %v8384_v49 = vld [vmem:[#allocation23_spill] sm:$0xff] }
 0x40e   : > { %v5407_v53 = vmax.f32 %v5375_v61, 0.0  ;;  %v837_v61 = vadd.f32 %v8060_v35, %v8379_v31 }
 0x40f   : > { %v4895_v12 = vpop.f32.mrf.mxu2 }
 0x410   : > { %v4938_v17 = vadd.f32 %v4895_v12, %v4280_v4  ;;  %5495 = vrot.lane.b32.xlu0 %v5407_v53, %s6480_s14 }
 0x411   : > { %v4242_v27 = vpop.f32.mrf.mxu1  ;;  %v5302_v2 = vpop.f32.mrf.mxu3 }
 0x412   : > { %v5340_v38 = vadd.f32 %v5297_v40, %v4938_v17  ;;  %v5468_v24 = vpop.permute.xlu1 %5467  ;;  %v4282_v42 = vadd.f32 %v4242_v27, %v3991_v22  ;;  %v891_v17 = vmax.f32 %v837_v61, 0.0  ;;  %v8380_v27 = vld [vmem:[#allocation46_spill] sm:$0xff]  ;;  %v8387_v61 = vld [vmem:[#allocation27_spill] sm:$0xff] }
 0x413   : > { %v5554_v60 = vsel %vm5543_vm0, %v884_v41, %v5468_v24  ;;  %v3959_v41 = vpop.f32.mrf.mxu0 }
 0x414   : > { %5586 = vst [vmem:[%s8076_s19 + $0x50] sm:$0xff] %v5554_v60  ;;  %v5376_v5 = vadd.f32 %v8137_v62, %v5340_v38  ;;  %v3994_v60 = vadd.f32 %v3959_v41, %v8380_v27 }
 0x416   : > { %v5408_v55 = vmax.f32 %v5376_v5, 0.0  ;;  %v8381_v5 = vld [vmem:[#allocation17_spill] sm:$0xff] }
 0x417   : > { %v4898_v19 = vpop.f32.mrf.mxu2  ;;  %v832_v45 = vadd.f32 %v8060_v35, %v8381_v5  ;;  %v8390_v5 = vld [vmem:[#allocation30_spill] sm:$0xff] }
 0x418   : > { %v4939_v23 = vadd.f32 %v4898_v19, %v4281_v13  ;;  %5497 = vrot.lane.b32.xlu1 %v5408_v55, %s6480_s14 }
 0x419   : > { %v4245_v57 = vpop.f32.mrf.mxu1  ;;  %v5305_v54 = vpop.f32.mrf.mxu3 }
 0x41a   : > { %v5341_v11 = vadd.f32 %v5300_v6, %v4939_v23  ;;  %v5476_v1 = vpop.permute.xlu2 %5475  ;;  %v4283_v20 = vadd.f32 %v4245_v57, %v3992_v37  ;;  %v845_v37 = vadd.f32 %v8060_v35, %v8383_v21 }
 0x41b   : > { %v5558_v48 = vsel %vm5543_vm0, %v888_v32, %v5476_v1  ;;  %v889_v32 = vmax.f32 %v832_v45, 0.0  ;;  %v855_v45 = vadd.f32 %v8060_v35, %v8390_v5 }
 0x41c   : > { %5590 = vst [vmem:[%s8076_s19 + $0x70] sm:$0xff] %v5558_v48  ;;  %v5377_v36 = vadd.f32 %v8137_v62, %v5341_v11  ;;  %v894_v8 = vmax.f32 %v845_v37, 0.0 }
 0x41e   : > { %v5409_v18 = vmax.f32 %v5377_v36, 0.0 }
 0x41f   : > { %v4900_v14 = vpop.f32.mrf.mxu2 }
 0x420   : > { %v4940_v56 = vadd.f32 %v4900_v14, %v4282_v42  ;;  %5499 = vrot.lane.b32.xlu2 %v5409_v18, %s6480_s14 }
 0x421   : > { %v4247_v63 = vpop.f32.mrf.mxu1  ;;  %v5307_v4 = vpop.f32.mrf.mxu3 }
 0x422   : > { %v5342_v25 = vadd.f32 %v5302_v2, %v4940_v56  ;;  %v5472_v26 = vpop.permute.xlu0 %5471  ;;  %v4284_v39 = vadd.f32 %v4247_v63, %v3993_v15  ;;  %v3961_v2 = vpop.f32.mrf.mxu0  ;;  %v890_v56 = vmax.f32 %v835_v51, 0.0  ;;  %v862_v51 = vadd.f32 %v8060_v35, %v8393_v3 }
 0x423   : > { %v5556_v33 = vsel %vm5543_vm0, %v886_v47, %v5472_v26  ;;  %v3995_v22 = vadd.f32 %v3961_v2, %v7887_v0  ;;  %v8392_v2 = vld [vmem:[#allocation35_spill] sm:$0xff] }
 0x424   : > { %5588 = vst [vmem:[%s8076_s19 + $0x60] sm:$0xff] %v5556_v33  ;;  %v5378_v52 = vadd.f32 %v8137_v62, %v5342_v25 }
 0x426   : > { %v5410_v59 = vmax.f32 %v5378_v52, 0.0 }
 0x427   : > { %v4903_v40 = vpop.f32.mrf.mxu2 }
 0x428   : > { %v4941_v46 = vadd.f32 %v4903_v40, %v4283_v20  ;;  %5501 = vrot.lane.b32.xlu0 %v5410_v59, %s6480_s14  ;;  %v840_v20 = vadd.f32 %v8060_v35, %v8384_v49  ;;  %v8385_v40 = vld [vmem:[#allocation25_spill] sm:$0xff] }
 0x429   : > { %v4250_v6 = vpop.f32.mrf.mxu1  ;;  %v5310_v55 = vpop.f32.mrf.mxu3 }
 0x42a   : > { %v5343_v30 = vadd.f32 %v5305_v54, %v4941_v46  ;;  %v5474_v29 = vpop.permute.xlu1 %5473  ;;  %v4285_v28 = vadd.f32 %v4250_v6, %v3994_v60  ;;  %v892_v59 = vmax.f32 %v840_v20, 0.0  ;;  %v842_v46 = vadd.f32 %v8060_v35, %v8385_v40 }
 0x42b   : > { %v5557_v34 = vsel %vm5543_vm0, %v887_v7, %v5474_v29 }
 0x42c   : > { %5589 = vst [vmem:[%s8076_s19 + $0x68] sm:$0xff] %v5557_v34  ;;  %v5379_v16 = vadd.f32 %v8137_v62, %v5343_v30  ;;  %v893_v7 = vmax.f32 %v842_v46, 0.0  ;;  %v8386_v34 = vld [vmem:[#allocation29_spill] sm:$0xff] }
 0x42d   : > { %v852_v58 = vadd.f32 %v8060_v35, %v8386_v34 }
 0x42e   : > { %v5411_v50 = vmax.f32 %v5379_v16, 0.0 }
 0x42f   : > { %v4905_v53 = vpop.f32.mrf.mxu2  ;;  %v897_v15 = vmax.f32 %v852_v58, 0.0 }
 0x430   : > { %v4942_v12 = vadd.f32 %v4905_v53, %v4284_v39  ;;  %5503 = vrot.lane.b32.xlu1 %v5411_v50, %s6480_s14  ;;  %v847_v39 = vadd.f32 %v8060_v35, %v8387_v61 }
 0x431   : > { %v4252_v48 = vpop.f32.mrf.mxu1  ;;  %v5312_v47 = vpop.f32.mrf.mxu3 }
 0x432   : > { %v5344_v9 = vadd.f32 %v5307_v4, %v4942_v12  ;;  %v5482_v38 = vpop.permute.xlu2 %5481  ;;  %v4286_v57 = vadd.f32 %v4252_v48, %v3995_v22  ;;  %v895_v50 = vmax.f32 %v847_v39, 0.0  ;;  %v8388_v12 = vld [vmem:[#allocation28_spill] sm:$0xff]  ;;  %v867_v48 = vadd.f32 %v8060_v35, %v8392_v2 }
 0x433   : > { %v5561_v24 = vsel %vm5543_vm0, %v891_v17, %v5482_v38  ;;  %v850_v17 = vadd.f32 %v8060_v35, %v8388_v12  ;;  %v8389_v38 = vld [vmem:[#allocation32_spill] sm:$0xff] }
 0x434   : > { %5593 = vst [vmem:[%s8076_s19 + $0x88] sm:$0xff] %v5561_v24  ;;  %v5380_v44 = vadd.f32 %v8137_v62, %v5344_v9  ;;  %v860_v24 = vadd.f32 %v8060_v35, %v8389_v38 }
 0x435   : > { %v896_v41 = vmax.f32 %v850_v17, 0.0 }
 0x436   : > { %v5412_v13 = vmax.f32 %v5380_v44, 0.0  ;;  %v900_v27 = vmax.f32 %v860_v24, 0.0 }
 0x437   : > { %v4908_v19 = vpop.f32.mrf.mxu2 }
 0x438   : > { %v4943_v23 = vadd.f32 %v4908_v19, %v4285_v28  ;;  %5505 = vrot.lane.b32.xlu2 %v5412_v13, %s6480_s14  ;;  %v898_v28 = vmax.f32 %v855_v45, 0.0  ;;  %v8391_v19 = vld [vmem:[#allocation31_spill] sm:$0xff] }
 0x43a   : > { %v5345_v11 = vadd.f32 %v5310_v55, %v4943_v23  ;;  %v5478_v1 = vpop.permute.xlu0 %5477  ;;  %v857_v23 = vadd.f32 %v8060_v35, %v8391_v19 }
 0x43b   : > { %v5559_v43 = vsel %vm5543_vm0, %v889_v32, %v5478_v1 }
 0x43c   : > { %5591 = vst [vmem:[%s8076_s19 + $0x78] sm:$0xff] %v5559_v43  ;;  %v5381_v36 = vadd.f32 %v8137_v62, %v5345_v11  ;;  %v899_v32 = vmax.f32 %v857_v23, 0.0  ;;  %v903_v43 = vmax.f32 %v867_v48, 0.0 }
 0x43e   : > { %v5413_v42 = vmax.f32 %v5381_v36, 0.0 }
 0x43f   : > { %v4910_v18 = vpop.f32.mrf.mxu2 }
 0x440   : > { %v4944_v14 = vadd.f32 %v4910_v18, %v4286_v57  ;;  %5507 = vrot.lane.b32.xlu0 %v5413_v42, %s6480_s14  ;;  %v901_v57 = vmax.f32 %v862_v51, 0.0 }
 0x442   : > { %v5346_v25 = vadd.f32 %v5312_v47, %v4944_v14  ;;  %v5480_v26 = vpop.permute.xlu1 %5479  ;;  %v8394_v14 = vld [vmem:[#allocation34_spill] sm:$0xff] }
 0x443   : > { %v5560_v0 = vsel %vm5543_vm0, %v890_v56, %v5480_v26  ;;  %v865_v56 = vadd.f32 %v8060_v35, %v8394_v14 }
 0x444   : > { %5592 = vst [vmem:[%s8076_s19 + $0x80] sm:$0xff] %v5560_v0  ;;  %v5382_v33 = vadd.f32 %v8137_v62, %v5346_v25  ;;  %v8395_v0 = vld [vmem:[#allocation36_spill] sm:$0xff] }
 0x445   : > { %v902_v47 = vmax.f32 %v865_v56, 0.0 }
 0x446   : > { %v5414_v52 = vmax.f32 %v5382_v33, 0.0  ;;  %v870_v33 = vadd.f32 %v8060_v35, %v8395_v0 }
 0x448   : > { %5509 = vrot.lane.b32.xlu1 %v5414_v52, %s6480_s14  ;;  %v904_v21 = vmax.f32 %v870_v33, 0.0  ;;  %s6429_s14 = sshra.s32 %s5624_s13, 4  ;;  %s6430_s14 = int_to_ptr.hbm [resolvable:$true] %s6429_s14 }
 0x449   : > { %s6431_s16 = scalar_lea.hbm %s6430_s14, 256  ;;  %p6436_p0 = scmp.lt.s32.totalorder %s6430_s14, %s8300_s7 }
 0x44a   : > { %v5488_v10 = vpop.permute.xlu2 %5487  ;;  %p6432_p11 = scmp.ne.s32.totalorder %s6430_s14, %s6431_s16  ;;  %p6437_p1 = scmp.lt.s32.totalorder %s6435_s20, %s6431_s16 }
 0x44b   : > { %v5564_v54 = vsel %vm5543_vm0, %v894_v8, %v5488_v10  ;;  %v8396_v8 = vld [vmem:[#allocation37_spill] sm:$0xff] }
 0x44c   : > { %5596 = vst [vmem:[%s8076_s19 + $0xa0] sm:$0xff] %v5564_v54  ;;  %v872_v10 = vadd.f32 %v8060_v35, %v8396_v8  ;;  %p6433_p12 = pnand %p6432_p11, %p6561_p5  ;;  %p6438_p2 = por %p6437_p1, %p6436_p0 }
 0x44e   : > { %v905_v54 = vmax.f32 %v872_v10, 0.0  ;;  %p6434_p13 = pneg %p6433_p12 }
 0x450   : > { %p6439_p3 = pnand %p6438_p2, %p6434_p13 }
 0x452   : > { %v5484_v63 = vpop.permute.xlu0 %5483 }
 0x453   : > { %v5562_v62 = vsel %vm5543_vm0, %v892_v59, %v5484_v63 }
 0x454   : > { %5594 = vst [vmem:[%s8076_s19 + $0x90] sm:$0xff] %v5562_v62 }
 0x45a   : > { %v5486_v30 = vpop.permute.xlu1 %5485 }
 0x45b   : > { %v5563_v29 = vsel %vm5543_vm0, %v893_v7, %v5486_v30 }
 0x45c   : > { %5595 = vst [vmem:[%s8076_s19 + $0x98] sm:$0xff] %v5563_v29 }
 0x462   : > { %v5494_v16 = vpop.permute.xlu2 %5493 }
 0x463   : > { %v5567_v31 = vsel %vm5543_vm0, %v897_v15, %v5494_v16 }
 0x464   : > { %5599 = vst [vmem:[%s8076_s19 + $0xb8] sm:$0xff] %v5567_v31 }
 0x46a   : > { %v5490_v4 = vpop.permute.xlu0 %5489 }
 0x46b   : > { %v5565_v53 = vsel %vm5543_vm0, %v895_v50, %v5490_v4 }
 0x46c   : > { %5597 = vst [vmem:[%s8076_s19 + $0xa8] sm:$0xff] %v5565_v53 }
 0x472   : > { %v5492_v6 = vpop.permute.xlu1 %5491 }
 0x473   : > { %v5566_v9 = vsel %vm5543_vm0, %v896_v41, %v5492_v6 }
 0x474   : > { %5598 = vst [vmem:[%s8076_s19 + $0xb0] sm:$0xff] %v5566_v9 }
 0x47a   : > { %v5500_v60 = vpop.permute.xlu2 %5499 }
 0x47b   : > { %v5570_v44 = vsel %vm5543_vm0, %v900_v27, %v5500_v60 }
 0x47c   : > { %5602 = vst [vmem:[%s8076_s19 + $0xd0] sm:$0xff] %v5570_v44 }
 0x482   : > { %v5496_v13 = vpop.permute.xlu0 %5495 }
 0x483   : > { %v5568_v55 = vsel %vm5543_vm0, %v898_v28, %v5496_v13 }
 0x484   : > { %5600 = vst [vmem:[%s8076_s19 + $0xc0] sm:$0xff] %v5568_v55 }
 0x48a   : > { %v5498_v11 = vpop.permute.xlu1 %5497 }
 0x48b   : > { %v5569_v1 = vsel %vm5543_vm0, %v899_v32, %v5498_v11 }
 0x48c   : > { %5601 = vst [vmem:[%s8076_s19 + $0xc8] sm:$0xff] %v5569_v1 }
 0x492   : > { %v5506_v22 = vpop.permute.xlu2 %5505 }
 0x493   : > { %v5573_v36 = vsel %vm5543_vm0, %v903_v43, %v5506_v22 }
 0x494   : > { %5605 = vst [vmem:[%s8076_s19 + $0xe8] sm:$0xff] %v5573_v36 }
 0x49a   : > { %v5502_v42 = vpop.permute.xlu0 %5501 }
 0x49b   : > { %v5571_v18 = vsel %vm5543_vm0, %v901_v57, %v5502_v42 }
 0x49c   : > { %5603 = vst [vmem:[%s8076_s19 + $0xd8] sm:$0xff] %v5571_v18 }
 0x4a2   : > { %v5504_v25 = vpop.permute.xlu1 %5503 }
 0x4a3   : > { %v5572_v26 = vsel %vm5543_vm0, %v902_v47, %v5504_v25 }
 0x4a4   : > { %5604 = vst [vmem:[%s8076_s19 + $0xe0] sm:$0xff] %v5572_v26 }
 0x4b2   : > { %v5508_v37 = vpop.permute.xlu0 %5507 }
 0x4b3   : > { %v5574_v52 = vsel %vm5543_vm0, %v904_v21, %v5508_v37 }
 0x4b4   : > { %5606 = vst [vmem:[%s8076_s19 + $0xf0] sm:$0xff] %v5574_v52 }
 0x4ba   : > { %v5510_v49 = vpop.permute.xlu1 %5509 }
 0x4bb   : > { %v5575_v20 = vsel %vm5543_vm0, %v905_v54, %v5510_v49 }
 0x4bc   : > { %5607 = vst [vmem:[%s8076_s19 + $0xf8] sm:$0xff] %v5575_v20 }
 0x4bd   : > { %6442 = shalt.err (!%p6439_p3)
}
 0x4be   : > { %s6481_s17 = smov 128   ;;  %s6482_s19 = smov 8  }
 0x4bf   : > { %6343 = dma.vmem_to_hbm [thread:$0]  (%p6561_p5), %s5622_s9, 4096, %s5624_s13, %s5609_s28, %s6481_s17, %s6481_s17, %s6482_s19  }
 0x4c0 PF: > { %p6349_p4 = scmp.ge.s32.totalorder %s6477_s27, 2  ;;  %s5638_s23 = sand.u32 1, %s6465_s24  }
 0x4c1   : > { %s5639_s29 = scalar_lea.sflag [#allocation4], %s5638_s23 }
 0x4c2   : > { %p6346_p7 = pnand %p6349_p4, %p6565_p6 }
 0x4c4   : > { %p6347_p8 = pneg %p6346_p7 }
 0x4c6   : > { %6460 = dma.done.wait (%p6347_p8), %s5639_s29, 4096  }
 0x4c7   : > { %6462 = vsyncadd (%p6347_p8), %s5639_s29, 4294963200  ;;  %p17_p9 = scmp.ge.s32.totalorder %s6548_s30, 4   ;;  %s8397_s24 = smov %s6469_s25 }
 0x4c8   : > { %s8398_s25 = smov %s6473_s26  ;;  %s8399_s26 = smov %s6559_s10 }
 0x4c9   : > { %s8400_s27 = smov %s6548_s30  ;;  %19 = sbr.rel (!%p17_p9) target bundleno = 3 (0x3), region = 93 }
 0x4ce   :  { %5645 = vsyncpa [#allocation4], 1 }
 0x4cf   :  { %5647 = vsyncpa [#allocation4 + $0x1], 1 }

</bundles_post_ra>
